<compile_context>
chip_gen: v7x
topology: tpu7x:2x2x1
jax: 0.10.0
libtpu: 0.0.40
codegen_flags: <defaults>
</compile_context>

<pallas_src>
import jax
import jax.numpy as jnp
from jax.experimental import pallas as pl
from jax.experimental.pallas import tpu as pltpu

EPS = 1e-5


def fused_kernel(scale_ref, x223_ref, w_ref, x217_ref, gamma_ref, beta_ref, o_ref):
    # Fold x228 into the weight tile: (tile_co, Cin) * (1, Cin) lane-broadcast.
    # Cast both MXU operands to bf16 (single-pass MXU), accumulate in f32.
    w_scaled = (w_ref[...] * scale_ref[...]).astype(jnp.bfloat16)
    x = x223_ref[...].astype(jnp.bfloat16)

    # x229/x230: 1x1 conv (no bias) == channel matmul: (tile_co, Cin) @ (Cin, P)
    z = jnp.dot(w_scaled, x, preferred_element_type=jnp.float32)

    # x231: BatchNorm2d train-mode forward; per-output-channel stats over P = N*H*W
    mean = jnp.mean(z, axis=1, keepdims=True)                               # (tile_co, 1)
    var = jnp.maximum(jnp.mean(z * z, axis=1, keepdims=True) - mean * mean, 0.0)
    a = gamma_ref[...] * jax.lax.rsqrt(var + EPS)   # fold BN into a single affine
    b = beta_ref[...] - mean * a

    # x232 + x233: residual add + ReLU
    o_ref[...] = jnp.maximum(x217_ref[...] + z * a + b, 0.0)


def _pick_cout_tile(cout, target_grid=7):
    """Pick a multiple-of-8 divisor of cout whose block count is closest to
    ~target_grid: enough pipeline steps that each v7x TensorCore overlaps the
    weight DMA with MXU work, while keeping the ~0.35us/step overhead bounded.
    For Cout=1232 this selects tile_co=176 (grid=7)."""
    cands = [t for t in range(8, cout + 1, 8) if cout % t == 0]
    if not cands:
        return cout
    return min(cands, key=lambda t: (abs(cout // t - target_grid), -t))


def fused_forward(x228, x223, x217, w, gamma, beta):
    """x228: (1,C,1,1); x223, x217: (1,C,H,W); w: (Cout,Cin,1,1); gamma/beta: (Cout,)."""
    N, C, H, Wsp = x223.shape
    assert N == 1, "kernel assumes batch 1 (as in the module's inputs)"
    P = N * H * Wsp
    Cout, Cin = w.shape[0], w.shape[1]
    assert Cin == C
    # Residual x217 is reshaped with the OUTPUT channel count; only valid if Cout == Cin.
    assert Cout == Cin, "residual reshape assumes Cout == Cin (true for this module)"

    # Free, transpose-less views: NCHW (N=1) -> (C, H*W); 1x1 kernel -> (Cout, Cin).
    x223_2d = x223.reshape(C, P)
    x217_2d = x217.reshape(Cout, P)
    scale_2d = x228.reshape(1, C)        # lane-dense; folded into the weight tile in-kernel
    w_2d = w.reshape(Cout, C)
    gamma_2d = gamma.reshape(Cout, 1)
    beta_2d = beta.reshape(Cout, 1)

    tile_co = _pick_cout_tile(Cout)
    grid = (Cout // tile_co,)

    out_2d = pl.pallas_call(
        fused_kernel,
        out_shape=jax.ShapeDtypeStruct((Cout, P), jnp.float32),
        grid=grid,
        in_specs=[
            pl.BlockSpec((1, C), lambda i: (0, 0)),        # x228 scale  (whole, DMA'd once)
            pl.BlockSpec((C, P), lambda i: (0, 0)),        # x223        (whole, DMA'd once)
            pl.BlockSpec((tile_co, C), lambda i: (i, 0)),  # weight tile (streams per block)
            pl.BlockSpec((tile_co, P), lambda i: (i, 0)),  # x217 tile
            pl.BlockSpec((tile_co, 1), lambda i: (i, 0)),  # gamma tile
            pl.BlockSpec((tile_co, 1), lambda i: (i, 0)),  # beta tile
        ],
        out_specs=pl.BlockSpec((tile_co, P), lambda i: (i, 0)),
        compiler_params=pltpu.CompilerParams(
            dimension_semantics=("parallel",),   # Cout blocks independent (BN is per-out-channel)
            vmem_limit_bytes=32 * 1024 * 1024,   # raises v5e's 16 MiB scoped default; fits v7x
        ),
    )(scale_2d, x223_2d, w_2d, x217_2d, gamma_2d, beta_2d)

    # (Cout, P) -> (1, Cout, H, W): free reshape, no transpose.
    return out_2d.reshape(N, Cout, H, Wsp)


def reference_forward(x228, x223, x217, w, gamma, beta):
    """Pure-JAX f32 reference matching the PyTorch train-mode forward."""
    y = x228 * x223                                            # (1, C, H, W)
    z = jnp.einsum("nchw,oc->nohw", y, w[:, :, 0, 0],
                   preferred_element_type=jnp.float32)         # 1x1 conv, no bias
    mean = jnp.mean(z, axis=(0, 2, 3), keepdims=True)
    var = jnp.mean((z - mean) ** 2, axis=(0, 2, 3), keepdims=True)
    zn = (z - mean) / jnp.sqrt(var + EPS)
    zn = zn * gamma.reshape(1, -1, 1, 1) + beta.reshape(1, -1, 1, 1)
    return jnp.maximum(x217 + zn, 0.0)


if __name__ == "__main__":
    N, C, H, W = 1, 1232, 14, 14   # shapes implied by the module

    key = jax.random.PRNGKey(0)
    k1, k2, k3, k4, k5, k6 = jax.random.split(key, 6)

    x217 = jax.random.normal(k1, (N, C, H, W), dtype=jnp.float32)
    x223 = jax.random.normal(k2, (N, C, H, W), dtype=jnp.float32)
    x228 = jax.random.normal(k3, (N, C, 1, 1), dtype=jnp.float32)

    # deterministic parameter init (synthetic; no checkpoint load)
    w = jax.random.normal(k4, (C, C, 1, 1), dtype=jnp.float32) * (1.0 / jnp.sqrt(C))
    gamma = 1.0 + 0.1 * jax.random.normal(k5, (C,), dtype=jnp.float32)
    beta = 0.1 * jax.random.normal(k6, (C,), dtype=jnp.float32)

    out = fused_forward(x228, x223, x217, w, gamma, beta)
    out = jax.block_until_ready(out)

    ref = reference_forward(x228, x223, x217, w, gamma, beta)
    assert out.shape == (N, C, H, W)
    max_err = float(jnp.max(jnp.abs(out - ref)))
    # Tolerance sized for the bf16 MXU path with f32 accumulation over K=1232
    # (typical abs err ~4e-3, worst case ~2e-2 on O(1) outputs).
    assert jnp.allclose(out, ref, atol=2e-2, rtol=2e-2), f"max_err={max_err}"

    print("KERNEL_OK")
</pallas_src>

<mosaic_0001>
module attributes {stable_mosaic.version = 11 : i64} {
  func.func @fused_kernel(%arg0: i32, %arg1: memref<1x1232xf32, #tpu.memory_space<vmem>>, %arg2: memref<1232x196xf32, #tpu.memory_space<vmem>>, %arg3: memref<176x1232xf32, #tpu.memory_space<vmem>>, %arg4: memref<176x196xf32, #tpu.memory_space<vmem>>, %arg5: memref<176x1xf32, #tpu.memory_space<vmem>>, %arg6: memref<176x1xf32, #tpu.memory_space<vmem>>, %arg7: memref<176x196xf32, #tpu.memory_space<vmem>>) attributes {dimension_semantics = [#tpu.dimension_semantics<parallel>], iteration_bounds = array<i64: 7>, scalar_prefetch = 0 : i64, scratch_operands = 0 : i64, tpu.core_type = #tpu.core_type<tc>, window_params = [{pipeline_mode = #tpu.pipeline_mode<synchronous>, transform_indices = @transform_0, window_bounds = array<i64: 1, 1232>}, {pipeline_mode = #tpu.pipeline_mode<synchronous>, transform_indices = @transform_1, window_bounds = array<i64: 1232, 196>}, {transform_indices = @transform_2, window_bounds = array<i64: 176, 1232>}, {transform_indices = @transform_3, window_bounds = array<i64: 176, 196>}, {transform_indices = @transform_4, window_bounds = array<i64: 176, 1>}, {transform_indices = @transform_5, window_bounds = array<i64: 176, 1>}, {transform_indices = @transform_6, window_bounds = array<i64: 176, 196>}]} {
    %c0 = arith.constant 0 : index
    %c0_0 = arith.constant 0 : index
    %0 = vector.load %arg3[%c0, %c0_0] : memref<176x1232xf32, #tpu.memory_space<vmem>>, vector<176x1232xf32>
    %c0_1 = arith.constant 0 : index
    %c0_2 = arith.constant 0 : index
    %1 = vector.load %arg1[%c0_1, %c0_2] : memref<1x1232xf32, #tpu.memory_space<vmem>>, vector<1x1232xf32>
    %2 = vector.broadcast %1 : vector<1x1232xf32> to vector<176x1232xf32>
    %3 = arith.mulf %0, %2 : vector<176x1232xf32>
    %4 = arith.truncf %3 : vector<176x1232xf32> to vector<176x1232xbf16>
    %c0_3 = arith.constant 0 : index
    %c0_4 = arith.constant 0 : index
    %5 = vector.load %arg2[%c0_3, %c0_4] : memref<1232x196xf32, #tpu.memory_space<vmem>>, vector<1232x196xf32>
    %6 = arith.truncf %5 : vector<1232x196xf32> to vector<1232x196xbf16>
    %cst = arith.constant dense<0.000000e+00> : vector<176x196xf32>
    %7 = tpu.matmul %4, %6, %cst {dimension_numbers = #tpu.dot_dimension_numbers<[1], [0], [0], [1], [0, 0, 1, 1], [], []>} : vector<176x1232xbf16>, vector<1232x196xbf16>, vector<176x196xf32> -> vector<176x196xf32>
    %cst_5 = arith.constant dense<0.000000e+00> : vector<176xf32>
    %8 = vector.multi_reduction <add>, %7, %cst_5 [1] : vector<176x196xf32> to vector<176xf32>
    %9 = vector.shape_cast %8 : vector<176xf32> to vector<176x1xf32>
    %cst_6 = arith.constant 1.960000e+02 : f32
    %10 = vector.broadcast %cst_6 : f32 to vector<176x1xf32>
    %11 = arith.divf %9, %10 : vector<176x1xf32>
    %12 = arith.mulf %7, %7 : vector<176x196xf32>
    %cst_7 = arith.constant dense<0.000000e+00> : vector<176xf32>
    %13 = vector.multi_reduction <add>, %12, %cst_7 [1] : vector<176x196xf32> to vector<176xf32>
    %14 = vector.shape_cast %13 : vector<176xf32> to vector<176x1xf32>
    %cst_8 = arith.constant 1.960000e+02 : f32
    %15 = vector.broadcast %cst_8 : f32 to vector<176x1xf32>
    %16 = arith.divf %14, %15 : vector<176x1xf32>
    %17 = arith.mulf %11, %11 : vector<176x1xf32>
    %18 = arith.subf %16, %17 : vector<176x1xf32>
    %cst_9 = arith.constant 0.000000e+00 : f32
    %19 = vector.broadcast %cst_9 : f32 to vector<176x1xf32>
    %20 = arith.maximumf %18, %19 : vector<176x1xf32>
    %c0_10 = arith.constant 0 : index
    %c0_11 = arith.constant 0 : index
    %21 = vector.load %arg5[%c0_10, %c0_11] : memref<176x1xf32, #tpu.memory_space<vmem>>, vector<176x1xf32>
    %cst_12 = arith.constant 9.99999974E-6 : f32
    %22 = vector.broadcast %cst_12 : f32 to vector<176x1xf32>
    %23 = arith.addf %20, %22 : vector<176x1xf32>
    %24 = math.rsqrt %23 : vector<176x1xf32>
    %25 = arith.mulf %21, %24 : vector<176x1xf32>
    %c0_13 = arith.constant 0 : index
    %c0_14 = arith.constant 0 : index
    %26 = vector.load %arg6[%c0_13, %c0_14] : memref<176x1xf32, #tpu.memory_space<vmem>>, vector<176x1xf32>
    %27 = arith.mulf %11, %25 : vector<176x1xf32>
    %28 = arith.subf %26, %27 : vector<176x1xf32>
    %c0_15 = arith.constant 0 : index
    %c0_16 = arith.constant 0 : index
    %29 = vector.load %arg4[%c0_15, %c0_16] : memref<176x196xf32, #tpu.memory_space<vmem>>, vector<176x196xf32>
    %30 = vector.broadcast %25 : vector<176x1xf32> to vector<176x196xf32>
    %31 = arith.mulf %7, %30 : vector<176x196xf32>
    %32 = arith.addf %29, %31 : vector<176x196xf32>
    %33 = vector.broadcast %28 : vector<176x1xf32> to vector<176x196xf32>
    %34 = arith.addf %32, %33 : vector<176x196xf32>
    %cst_17 = arith.constant 0.000000e+00 : f32
    %35 = vector.broadcast %cst_17 : f32 to vector<176x196xf32>
    %36 = arith.maximumf %34, %35 : vector<176x196xf32>
    %c0_18 = arith.constant 0 : index
    %c0_19 = arith.constant 0 : index
    %37 = vector.load %arg7[%c0_18, %c0_19] : memref<176x196xf32, #tpu.memory_space<vmem>>, vector<176x196xf32>
    tpu.vector_store %arg7[%c0_18, %c0_19], %36 {strides = array<i32>} : memref<176x196xf32, #tpu.memory_space<vmem>>, vector<176x196xf32>,
    return
  }
  func.func @transform_0(%arg0: i32) -> (i32, i32) {
    %c0_i32 = arith.constant 0 : i32
    %c0_i32_0 = arith.constant 0 : i32
    %c0_i32_1 = arith.constant 0 : i32
    return %c0_i32, %c0_i32_0 : i32, i32
  }
  func.func @transform_1(%arg0: i32) -> (i32, i32) {
    %c0_i32 = arith.constant 0 : i32
    %c0_i32_0 = arith.constant 0 : i32
    %c0_i32_1 = arith.constant 0 : i32
    return %c0_i32, %c0_i32_0 : i32, i32
  }
  func.func @transform_2(%arg0: i32) -> (i32, i32) {
    %c0_i32 = arith.constant 0 : i32
    %c0_i32_0 = arith.constant 0 : i32
    return %arg0, %c0_i32 : i32, i32
  }
  func.func @transform_3(%arg0: i32) -> (i32, i32) {
    %c0_i32 = arith.constant 0 : i32
    %c0_i32_0 = arith.constant 0 : i32
    return %arg0, %c0_i32 : i32, i32
  }
  func.func @transform_4(%arg0: i32) -> (i32, i32) {
    %c0_i32 = arith.constant 0 : i32
    %c0_i32_0 = arith.constant 0 : i32
    return %arg0, %c0_i32 : i32, i32
  }
  func.func @transform_5(%arg0: i32) -> (i32, i32) {
    %c0_i32 = arith.constant 0 : i32
    %c0_i32_0 = arith.constant 0 : i32
    return %arg0, %c0_i32 : i32, i32
  }
  func.func @transform_6(%arg0: i32) -> (i32, i32) {
    %c0_i32 = arith.constant 0 : i32
    %c0_i32_0 = arith.constant 0 : i32
    return %arg0, %c0_i32 : i32, i32
  }
}

</mosaic_0001>

<bundles_post_ra>
// kernel: tpu_custom_call.1
= control target key start
LH: loop header
LB: loop body
LE: loop exit
PB: predicated region body
PF: predicated region fallthrough
CT: control target
= control target key end

     0   :  { %11 = vsyncpa [#allocation3], 0  ;;  %s5963_s0 = inlined_call_operand.vmem [shape: f32[1,1232], index: 0, kind: input, shape index: {}]   ;;  %s5964_s1 = inlined_call_operand.vmem [shape: f32[1232,196], index: 1, kind: input, shape index: {}]   ;;  %s5965_s2 = inlined_call_operand.hbm [shape: f32[1232,1232], index: 2, kind: input, shape index: {}]   ;;  %s5966_s3 = inlined_call_operand.vmem [shape: f32[1232,196], index: 3, kind: input, shape index: {}]   ;;  %s5967_s4 = inlined_call_operand.vmem [shape: f32[1232,1], index: 4, kind: input, shape index: {}]   ;;  %s5968_s5 = inlined_call_operand.vmem [shape: f32[1232,1], index: 5, kind: input, shape index: {}]   ;;  %s5969_s6 = inlined_call_operand.vmem [shape: f32[1232,196], index: 6, kind: output, shape index: {}]  }
   0x1   :  { %13 = vsyncpa [#allocation3 + $0x1], 0  ;;  %s3663_s21 = smov 0   ;;  %s3665_s22 = smov 0  }
   0x2   :  { %s3667_s23 = smov 0   ;;  %s3669_s24 = smov 0  }
   0x3 LB: > { %s3237_s25 = sadd.s32 4294967295, %s3622_s24   ;;  %s3683_s26 = sadd.s32 1, %s3622_s24   ;;  %s3622_s24 = sphi %s3669_s24, %s6017_s24   ;;  %s3618_s23 = sphi %s3667_s23, %s6016_s23   ;;  %s3614_s22 = sphi %s3665_s22, %s6015_s22   ;;  %s3610_s21 = sphi %s3663_s21, %s6014_s21  }
   0x4   : > { %s65_s27 = ssub.s32 %s3622_s24, %s3683_s26  ;;  %s68_s28 = sadd.s32 1, %s3618_s23 }
   0x5   : > { %p66_p0 = scmp.eq.s32.totalorder %s65_s27, 0  ;;  %p75_p1 = scmp.ne.s32.totalorder %s3618_s23, %s3614_s22 }
   0x6   : > { %p76_p2 = scmp.eq.s32.totalorder %s3622_s24, 0  ;;  %p81_p3 = scmp.ne.s32.totalorder %s3614_s22, %s3610_s21 }
   0x7   : > { %s3693_s29 = scalar_select %p66_p0, %s3618_s23, %s68_s28  }
   0x8   : > { %p77_p4 = por %p76_p2, %p75_p1  ;;  %p82_p5 = scmp.eq.s32.totalorder %s3237_s25, 0 }
   0x9   : > { %p3475_p6 = scmp.lt.s32.totalorder %s3622_s24, 7  ;;  %s215_s7 = sand.u32 1, %s3618_s23  }
   0xa   : > { %p3698_p7 = por %p82_p5, %p81_p3  ;;  %s3466_s8 = smul.u32 1760, %s215_s7 }
   0xb   : > { %p3703_p8 = pnand %p3475_p6, %p77_p4  ;;  %s3476_s10 = smul.u32 28160, %s3622_s24 }
   0xc   : > { %s219_s11 = scalar_lea.vmem [#allocation2], %s3466_s8  ;;  %s3715_s16 = scalar_lea.sflag [#allocation3], %s215_s7 }
   0xd   : > { %s227_s12 = sshll.u32 %s219_s11, 4  ;;  %s3711_s15 = scalar_lea.hbm %s5965_s2, %s3476_s10  ;;  %s3713_s12 = int_to_ptr.vmem [resolvable:$true] %s227_s12 }
   0xe   : > { %s3558_s17 = scalar_lea.hbm %s3711_s15, 28160  ;;  %p3560_p10 = pneg %p3703_p8 }
   0xf   : > { %p3559_p9 = scmp.ne.s32.totalorder %s3711_s15, %s3558_s17  ;;  %s3563_s20 = scalar_lea.hbm %s5965_s2, 197120 }
  0x10   : > { %p3564_p13 = scmp.lt.u32.totalorder %s3711_s15, %s5965_s2  ;;  %p3565_p0 = scmp.lt.u32.totalorder %s3563_s20, %s3558_s17 }
  0x11   : > { %p3561_p11 = pnand %p3560_p10, %p3559_p9  ;;  %p3567_p2 = scmp.lt.u32.totalorder %s3558_s17, %s3711_s15 }
  0x12   : > { %p3566_p1 = por %p3565_p0, %p3564_p13 }
  0x13   : > { %p3562_p12 = pneg %p3561_p11 }
  0x14   : > { %p3568_p3 = por %p3567_p2, %p3566_p1 }
  0x16   : > { %p3569_p4 = pnand %p3568_p3, %p3562_p12 }
  0x18   : > { %3572 = shalt.err (!%p3569_p4)
}
  0x19   : > { %s3573_s28 = scalar_lea.vmem %s3713_s12, 28160  ;;  %s3624_s7 = smov [#allocation2]  }
  0x1a   : > { %p3574_p5 = scmp.ne.s32.totalorder %s3713_s12, %s3573_s28  ;;  %s3578_s8 = sshll.u32 %s3624_s7, 4  ;;  %s3579_s8 = int_to_ptr.vmem [resolvable:$false] %s3578_s8 }
  0x1b   : > { %s3580_s10 = scalar_lea.vmem %s3579_s8, 56320  ;;  %p3581_p11 = scmp.lt.s32.totalorder %s3713_s12, %s3579_s8 }
  0x1c   : > { %p3576_p6 = pnand %p3574_p5, %p3560_p10  ;;  %p3582_p13 = scmp.lt.s32.totalorder %s3580_s10, %s3573_s28 }
  0x1e   : > { %p3577_p9 = pneg %p3576_p6  ;;  %p3583_p0 = por %p3582_p13, %p3581_p11 }
  0x20   : > { %p3584_p1 = pnand %p3583_p0, %p3577_p9 }
  0x22   : > { %3587 = shalt.err (!%p3584_p1)
}
  0x23   : > { %s3625_s11 = smov 1280   ;;  %s3626_s13 = smov 80  }
  0x24   : > { %3474 = dma.hbm_to_vmem [thread:$0]  (!%p3703_p8), %s3711_s15, 28160, %s3713_s12, %s3715_s16, %s3625_s11, %s3625_s11, %s3626_s13  }
  0x25   : > { %p3242_p10 = scmp.ge.s32.totalorder %s3622_s24, 1  ;;  %p263_p12 = scmp.lt.s32.totalorder %s3622_s24, 8 }
  0x27   : > { %p264_p2 = pnand %p3242_p10, %p263_p12 }
  0x29   : > { %267 = sbr.rel (%p264_p2) target bundleno = 924 (0x39c), region = 44 }
  0x30   : > { %s269_s14 = sand.u32 1, %s3614_s22  }
  0x31   : > { %s3468_s17 = smul.u32 1760, %s269_s14  ;;  %s270_s18 = scalar_lea.sflag [#allocation3], %s269_s14 }
  0x33   : > { %s3746_s19 = scalar_lea.vmem [#allocation2], %s3468_s17 }
  0x34   : > { %3605 = dma.done.wait (%p3698_p7), %s270_s18, 28160  }
  0x35   : > { %3607 = vsyncadd (%p3698_p7), %s270_s18, 4294939136  ;;  %v952_v0 = vld [vmem:[%s5964_s1 + $0x8] sm:$0xff]  ;;  %v954_v1 = vld [vmem:[%s5964_s1 + $0x18] sm:$0xff]  ;;  %vm1413_vm0 = vcmask 654336   ;;  %vm2162_vm1 = vcmask 556032  }
  0x36   : > { %v1080_v2 = vld [vmem:[%s5964_s1 + $0x408] sm:$0xff]  ;;  %v1260_v3 = vpack.c.bf16 %v954_v1, %v952_v0  ;;  %v1082_v4 = vld [vmem:[%s5964_s1 + $0x418] sm:$0xff]  ;;  %v951_v5 = vld [vmem:[%s5964_s1] sm:$0xff] }
  0x37   : > { %v953_v6 = vld [vmem:[%s5964_s1 + $0x10] sm:$0xff]  ;;  %v1324_v7 = vpack.c.bf16 %v1082_v4, %v1080_v2  ;;  %v1079_v9 = vld [vmem:[%s5964_s1 + $0x400] sm:$0xff]  ;;  %v956_v11 = vld [vmem:[%s5964_s1 + $0x28] sm:$0xff] }
  0x38   : > { %v1259_v8 = vpack.c.bf16 %v953_v6, %v951_v5  ;;  %v1081_v10 = vld [vmem:[%s5964_s1 + $0x410] sm:$0xff]  ;;  %1447 = vmatprep.subr.bf16.mxu1 %v1260_v3  ;;  %v958_v13 = vld [vmem:[%s5964_s1 + $0x38] sm:$0xff]  ;;  %v1084_v14 = vld [vmem:[%s5964_s1 + $0x428] sm:$0xff] }
  0x39   : > { %v1323_v12 = vpack.c.bf16 %v1081_v10, %v1079_v9  ;;  %v1086_v15 = vld [vmem:[%s5964_s1 + $0x438] sm:$0xff]  ;;  %1733 = vmatprep.subr.bf16.mxu0 %v1324_v7  ;;  %v1262_v16 = vpack.c.bf16 %v958_v13, %v956_v11  ;;  %v955_v18 = vld [vmem:[%s5964_s1 + $0x20] sm:$0xff]  ;;  %v957_v19 = vld [vmem:[%s5964_s1 + $0x30] sm:$0xff] }
  0x3a   : > { %1448 = vmatpush1.bf16.msra.mxu1 %v1259_v8  ;;  %v1326_v17 = vpack.c.bf16 %v1086_v15, %v1084_v14  ;;  %v1083_v20 = vld [vmem:[%s5964_s1 + $0x420] sm:$0xff]  ;;  %v1261_v21 = vpack.c.bf16 %v957_v19, %v955_v18  ;;  %v1085_v22 = vld [vmem:[%s5964_s1 + $0x430] sm:$0xff]  ;;  %v960_v23 = vld [vmem:[%s5964_s1 + $0x48] sm:$0xff] }
  0x3b   : > { %1734 = vmatpush1.bf16.msra.mxu0 %v1323_v12  ;;  %v962_v24 = vld [vmem:[%s5964_s1 + $0x58] sm:$0xff]  ;;  %1449 = vmatprep.subr.bf16.mxu1 %v1262_v16  ;;  %v1325_v25 = vpack.c.bf16 %v1085_v22, %v1083_v20  ;;  %v1088_v27 = vld [vmem:[%s5964_s1 + $0x448] sm:$0xff]  ;;  %v959_v29 = vld [vmem:[%s5964_s1 + $0x40] sm:$0xff] }
  0x3c   : > { %1735 = vmatprep.subr.bf16.mxu0 %v1326_v17  ;;  %v1264_v26 = vpack.c.bf16 %v962_v24, %v960_v23  ;;  %v1090_v28 = vld [vmem:[%s5964_s1 + $0x458] sm:$0xff]  ;;  %v961_v31 = vld [vmem:[%s5964_s1 + $0x50] sm:$0xff]  ;;  %v1087_v32 = vld [vmem:[%s5964_s1 + $0x440] sm:$0xff] }
  0x3d   : > { %v1328_v30 = vpack.c.bf16 %v1090_v28, %v1088_v27  ;;  %v1089_v33 = vld [vmem:[%s5964_s1 + $0x450] sm:$0xff]  ;;  %v1263_v34 = vpack.c.bf16 %v961_v31, %v959_v29  ;;  %v964_v35 = vld [vmem:[%s5964_s1 + $0x68] sm:$0xff]  ;;  %v966_v36 = vld [vmem:[%s5964_s1 + $0x78] sm:$0xff] }
  0x3e   : > { %1450 = vmatpush1.bf16.msra.mxu1 %v1261_v21  ;;  %v1092_v37 = vld [vmem:[%s5964_s1 + $0x468] sm:$0xff]  ;;  %v1327_v38 = vpack.c.bf16 %v1089_v33, %v1087_v32  ;;  %v1266_v39 = vpack.c.bf16 %v966_v36, %v964_v35  ;;  %v1094_v40 = vld [vmem:[%s5964_s1 + $0x478] sm:$0xff]  ;;  %v963_v41 = vld [vmem:[%s5964_s1 + $0x60] sm:$0xff] }
  0x3f   : > { %1736 = vmatpush1.bf16.msra.mxu0 %v1325_v25  ;;  %1451 = vmatprep.subr.bf16.mxu1 %v1264_v26  ;;  %v965_v42 = vld [vmem:[%s5964_s1 + $0x70] sm:$0xff]  ;;  %v1330_v43 = vpack.c.bf16 %v1094_v40, %v1092_v37  ;;  %v1091_v44 = vld [vmem:[%s5964_s1 + $0x460] sm:$0xff]  ;;  %v968_v46 = vld [vmem:[%s5964_s1 + $0x88] sm:$0xff] }
  0x40   : > { %1737 = vmatprep.subr.bf16.mxu0 %v1328_v30  ;;  %v1093_v45 = vld [vmem:[%s5964_s1 + $0x470] sm:$0xff]  ;;  %v970_v47 = vld [vmem:[%s5964_s1 + $0x98] sm:$0xff]  ;;  %v1096_v48 = vld [vmem:[%s5964_s1 + $0x488] sm:$0xff]  ;;  %v1265_v50 = vpack.c.bf16 %v965_v42, %v963_v41 }
  0x41   : > { %v1098_v49 = vld [vmem:[%s5964_s1 + $0x498] sm:$0xff]  ;;  %v1329_v51 = vpack.c.bf16 %v1093_v45, %v1091_v44  ;;  %v1268_v52 = vpack.c.bf16 %v970_v47, %v968_v46  ;;  %v967_v53 = vld [vmem:[%s5964_s1 + $0x80] sm:$0xff]  ;;  %v969_v54 = vld [vmem:[%s5964_s1 + $0x90] sm:$0xff]  ;;  %v571_v47 = vlaneseq }
  0x42   : > { %1452 = vmatpush1.bf16.msra.mxu1 %v1263_v34  ;;  %v1095_v55 = vld [vmem:[%s5964_s1 + $0x480] sm:$0xff]  ;;  %v1332_v56 = vpack.c.bf16 %v1098_v49, %v1096_v48  ;;  %v1097_v57 = vld [vmem:[%s5964_s1 + $0x490] sm:$0xff]  ;;  %v972_v58 = vld [vmem:[%s5964_s1 + $0xa8] sm:$0xff]  ;;  %v1267_v62 = vpack.c.bf16 %v969_v54, %v967_v53 }
  0x43   : > { %1738 = vmatpush1.bf16.msra.mxu0 %v1327_v38  ;;  %1453 = vmatprep.subr.bf16.mxu1 %v1266_v39  ;;  %v974_v59 = vld [vmem:[%s5964_s1 + $0xb8] sm:$0xff]  ;;  %v1100_v60 = vld [vmem:[%s5964_s1 + $0x4a8] sm:$0xff]  ;;  %v1331_v63 = vpack.c.bf16 %v1097_v57, %v1095_v55  ;;  %v971_v1 = vld [vmem:[%s5964_s1 + $0xa0] sm:$0xff] }
  0x44   : > { %1739 = vmatprep.subr.bf16.mxu0 %v1330_v43  ;;  %v1102_v61 = vld [vmem:[%s5964_s1 + $0x4b8] sm:$0xff]  ;;  %v1270_v0 = vpack.c.bf16 %v974_v59, %v972_v58  ;;  %v973_v2 = vld [vmem:[%s5964_s1 + $0xb0] sm:$0xff]  ;;  %v1099_v3 = vld [vmem:[%s5964_s1 + $0x4a0] sm:$0xff] }
  0x45   : > { %v1334_v4 = vpack.c.bf16 %v1102_v61, %v1100_v60  ;;  %v1101_v5 = vld [vmem:[%s5964_s1 + $0x4b0] sm:$0xff]  ;;  %v976_v6 = vld [vmem:[%s5964_s1 + $0xc8] sm:$0xff]  ;;  %v978_v7 = vld [vmem:[%s5964_s1 + $0xd8] sm:$0xff]  ;;  %v1269_v10 = vpack.c.bf16 %v973_v2, %v971_v1  ;;  %v4004_v60 = vshrl.u32 %v571_v47, 7 }
  0x46   : > { %1454 = vmatpush1.bf16.msra.mxu1 %v1265_v50  ;;  %v1104_v8 = vld [vmem:[%s5964_s1 + $0x4c8] sm:$0xff]  ;;  %v1106_v9 = vld [vmem:[%s5964_s1 + $0x4d8] sm:$0xff]  ;;  %v1333_v11 = vpack.c.bf16 %v1101_v5, %v1099_v3  ;;  %v1272_v12 = vpack.c.bf16 %v978_v7, %v976_v6  ;;  %v975_v13 = vld [vmem:[%s5964_s1 + $0xc0] sm:$0xff] }
  0x47   : > { %1740 = vmatpush1.bf16.msra.mxu0 %v1329_v51  ;;  %1455 = vmatprep.subr.bf16.mxu1 %v1268_v52  ;;  %v977_v14 = vld [vmem:[%s5964_s1 + $0xd0] sm:$0xff]  ;;  %v1103_v15 = vld [vmem:[%s5964_s1 + $0x4c0] sm:$0xff]  ;;  %v1336_v16 = vpack.c.bf16 %v1106_v9, %v1104_v8  ;;  %v980_v18 = vld [vmem:[%s5964_s1 + $0xe8] sm:$0xff]  ;;  %v601_v47 = vsub.s32 7, %v4004_v60 }
  0x48   : > { %1741 = vmatprep.subr.bf16.mxu0 %v1332_v56  ;;  %v1105_v17 = vld [vmem:[%s5964_s1 + $0x4d0] sm:$0xff]  ;;  %v982_v19 = vld [vmem:[%s5964_s1 + $0xf8] sm:$0xff]  ;;  %v1108_v20 = vld [vmem:[%s5964_s1 + $0x4e8] sm:$0xff]  ;;  %v1271_v22 = vpack.c.bf16 %v977_v14, %v975_v13 }
  0x49   : > { %v1110_v21 = vld [vmem:[%s5964_s1 + $0x4f8] sm:$0xff]  ;;  %v1335_v23 = vpack.c.bf16 %v1105_v17, %v1103_v15  ;;  %v1274_v24 = vpack.c.bf16 %v982_v19, %v980_v18  ;;  %v979_v25 = vld [vmem:[%s5964_s1 + $0xe0] sm:$0xff]  ;;  %v981_v26 = vld [vmem:[%s5964_s1 + $0xf0] sm:$0xff]  ;;  %v585_v18 = vsub.s32 3, %v4004_v60 }
  0x4a   : > { %1456 = vmatpush1.bf16.msra.mxu1 %v1267_v62  ;;  %v1107_v27 = vld [vmem:[%s5964_s1 + $0x4e0] sm:$0xff]  ;;  %v1338_v28 = vpack.c.bf16 %v1110_v21, %v1108_v20  ;;  %v1109_v29 = vld [vmem:[%s5964_s1 + $0x4f0] sm:$0xff]  ;;  %v984_v30 = vld [vmem:[%s5964_s1 + $0x108] sm:$0xff]  ;;  %v1273_v34 = vpack.c.bf16 %v981_v26, %v979_v25 }
  0x4b   : > { %1742 = vmatpush1.bf16.msra.mxu0 %v1331_v63  ;;  %1457 = vmatprep.subr.bf16.mxu1 %v1270_v0  ;;  %v986_v31 = vld [vmem:[%s5964_s1 + $0x118] sm:$0xff]  ;;  %v1112_v32 = vld [vmem:[%s5964_s1 + $0x508] sm:$0xff]  ;;  %v1337_v35 = vpack.c.bf16 %v1109_v29, %v1107_v27  ;;  %v983_v37 = vld [vmem:[%s5964_s1 + $0x100] sm:$0xff] }
  0x4c   : > { %1743 = vmatprep.subr.bf16.mxu0 %v1334_v4  ;;  %v1114_v33 = vld [vmem:[%s5964_s1 + $0x518] sm:$0xff]  ;;  %v1276_v36 = vpack.c.bf16 %v986_v31, %v984_v30  ;;  %v985_v38 = vld [vmem:[%s5964_s1 + $0x110] sm:$0xff]  ;;  %v1111_v39 = vld [vmem:[%s5964_s1 + $0x500] sm:$0xff] }
  0x4d   : > { %v1340_v40 = vpack.c.bf16 %v1114_v33, %v1112_v32  ;;  %v1113_v41 = vld [vmem:[%s5964_s1 + $0x510] sm:$0xff]  ;;  %v988_v42 = vld [vmem:[%s5964_s1 + $0x128] sm:$0xff]  ;;  %v990_v43 = vld [vmem:[%s5964_s1 + $0x138] sm:$0xff]  ;;  %v1275_v46 = vpack.c.bf16 %v985_v38, %v983_v37 }
  0x4e   : > { %1458 = vmatpush1.bf16.msra.mxu1 %v1269_v10  ;;  %v1116_v44 = vld [vmem:[%s5964_s1 + $0x528] sm:$0xff]  ;;  %v1118_v45 = vld [vmem:[%s5964_s1 + $0x538] sm:$0xff]  ;;  %v1339_v48 = vpack.c.bf16 %v1113_v41, %v1111_v39  ;;  %v1278_v49 = vpack.c.bf16 %v990_v43, %v988_v42  ;;  %v987_v50 = vld [vmem:[%s5964_s1 + $0x120] sm:$0xff] }
  0x4f   : > { %1744 = vmatpush1.bf16.msra.mxu0 %v1333_v11  ;;  %1459 = vmatprep.subr.bf16.mxu1 %v1272_v12  ;;  %v989_v51 = vld [vmem:[%s5964_s1 + $0x130] sm:$0xff]  ;;  %v1115_v52 = vld [vmem:[%s5964_s1 + $0x520] sm:$0xff]  ;;  %v1342_v53 = vpack.c.bf16 %v1118_v45, %v1116_v44  ;;  %v992_v55 = vld [vmem:[%s5964_s1 + $0x148] sm:$0xff]  ;;  %v577_v11 = vsub.s32 1, %v4004_v60  ;;  %v593_v12 = vsub.s32 5, %v4004_v60 }
  0x50   : > { %1745 = vmatprep.subr.bf16.mxu0 %v1336_v16  ;;  %v1117_v54 = vld [vmem:[%s5964_s1 + $0x530] sm:$0xff]  ;;  %v994_v56 = vld [vmem:[%s5964_s1 + $0x158] sm:$0xff]  ;;  %v1120_v57 = vld [vmem:[%s5964_s1 + $0x548] sm:$0xff]  ;;  %v1277_v59 = vpack.c.bf16 %v989_v51, %v987_v50  ;;  %v581_v51 = vsub.s32 2, %v4004_v60 }
  0x51   : > { %v1122_v58 = vld [vmem:[%s5964_s1 + $0x558] sm:$0xff]  ;;  %v1341_v61 = vpack.c.bf16 %v1117_v54, %v1115_v52  ;;  %v1280_v62 = vpack.c.bf16 %v994_v56, %v992_v55  ;;  %v991_v63 = vld [vmem:[%s5964_s1 + $0x140] sm:$0xff]  ;;  %v993_v0 = vld [vmem:[%s5964_s1 + $0x150] sm:$0xff] }
  0x52   : > { %1460 = vmatpush1.bf16.msra.mxu1 %v1271_v22  ;;  %v1119_v1 = vld [vmem:[%s5964_s1 + $0x540] sm:$0xff]  ;;  %v1344_v2 = vpack.c.bf16 %v1122_v58, %v1120_v57  ;;  %v1121_v3 = vld [vmem:[%s5964_s1 + $0x550] sm:$0xff]  ;;  %v996_v4 = vld [vmem:[%s5964_s1 + $0x168] sm:$0xff]  ;;  %v1279_v8 = vpack.c.bf16 %v993_v0, %v991_v63  ;;  %v573_v0 = vsub.s32 0, %v4004_v60 }
  0x53   : > { %1746 = vmatpush1.bf16.msra.mxu0 %v1335_v23  ;;  %1461 = vmatprep.subr.bf16.mxu1 %v1274_v24  ;;  %v998_v5 = vld [vmem:[%s5964_s1 + $0x178] sm:$0xff]  ;;  %v1124_v6 = vld [vmem:[%s5964_s1 + $0x568] sm:$0xff]  ;;  %v995_v9 = vld [vmem:[%s5964_s1 + $0x160] sm:$0xff]  ;;  %v1343_v13 = vpack.c.bf16 %v1121_v3, %v1119_v1 }
  0x54   : > { %1747 = vmatprep.subr.bf16.mxu0 %v1338_v28  ;;  %v1126_v7 = vld [vmem:[%s5964_s1 + $0x578] sm:$0xff]  ;;  %v997_v10 = vld [vmem:[%s5964_s1 + $0x170] sm:$0xff]  ;;  %v1282_v14 = vpack.c.bf16 %v998_v5, %v996_v4  ;;  %v1123_v15 = vld [vmem:[%s5964_s1 + $0x560] sm:$0xff] }
  0x55   : > { %v1125_v16 = vld [vmem:[%s5964_s1 + $0x570] sm:$0xff]  ;;  %v1000_v17 = vld [vmem:[%s5964_s1 + $0x188] sm:$0xff]  ;;  %v1346_v19 = vpack.c.bf16 %v1126_v7, %v1124_v6  ;;  %v1002_v20 = vld [vmem:[%s5964_s1 + $0x198] sm:$0xff]  ;;  %v1281_v26 = vpack.c.bf16 %v997_v10, %v995_v9  ;;  %v589_v6 = vsub.s32 4, %v4004_v60 }
  0x56   : > { %1462 = vmatpush1.bf16.msra.mxu1 %v1273_v34  ;;  %v1128_v21 = vld [vmem:[%s5964_s1 + $0x588] sm:$0xff]  ;;  %v1130_v22 = vld [vmem:[%s5964_s1 + $0x598] sm:$0xff]  ;;  %v4062_v25 = vld [vmem:[%s5963_s0] sm:$0xff]  ;;  %v1345_v27 = vpack.c.bf16 %v1125_v16, %v1123_v15  ;;  %v1284_v32 = vpack.c.bf16 %v1002_v20, %v1000_v17 }
  0x57   : > { %1748 = vmatpush1.bf16.msra.mxu0 %v1337_v35  ;;  %1463 = vmatprep.subr.bf16.mxu1 %v1276_v36  ;;  %v348_v23 = vld [vmem:[%s3746_s19 + $0x8] sm:$0xff]  ;;  %v358_v24 = vld [vmem:[%s3746_s19 + $0x58] sm:$0xff]  ;;  %v4067_v28 = vrot.slane %v4062_v25, %v577_v11  ;;  %v4072_v31 = vrot.slane %v4062_v25, %v593_v12  ;;  %v1348_v33 = vpack.c.bf16 %v1130_v22, %v1128_v21  ;;  %v999_v34 = vld [vmem:[%s5964_s1 + $0x180] sm:$0xff] }
  0x58   : > { %1749 = vmatprep.subr.bf16.mxu0 %v1340_v40  ;;  %v352_v29 = vld [vmem:[%s3746_s19 + $0x28] sm:$0xff]  ;;  %v362_v30 = vld [vmem:[%s3746_s19 + $0x78] sm:$0xff]  ;;  %v1001_v35 = vld [vmem:[%s5964_s1 + $0x190] sm:$0xff]  ;;  %v4084_v37 = vrot.slane %v4062_v25, %v585_v18  ;;  %v4133_v1 = vrot.slane %v4062_v25, %v601_v47  ;;  %v4144_v7 = vrot.slane %v4062_v25, %v581_v51  ;;  %v4179_v22 = vrot.slane %v4062_v25, %v573_v0 }
  0x59   : > { %v1127_v36 = vld [vmem:[%s5964_s1 + $0x580] sm:$0xff]  ;;  %v1129_v38 = vld [vmem:[%s5964_s1 + $0x590] sm:$0xff]  ;;  %v1004_v39 = vld [vmem:[%s5964_s1 + $0x1a8] sm:$0xff]  ;;  %v622_v41 = vmul.f32 %v4067_v28, %v348_v23  ;;  %v632_v42 = vmul.f32 %v4067_v28, %v358_v24  ;;  %v626_v43 = vmul.f32 %v4072_v31, %v352_v29  ;;  %v636_v44 = vmul.f32 %v4072_v31, %v362_v30 }
  0x5a   : > { %1464 = vmatpush1.bf16.msra.mxu1 %v1275_v46  ;;  %v1006_v40 = vld [vmem:[%s5964_s1 + $0x1b8] sm:$0xff]  ;;  %v1132_v45 = vld [vmem:[%s5964_s1 + $0x5a8] sm:$0xff]  ;;  %v1347_v52 = vpack.c.bf16 %v1129_v38, %v1127_v36  ;;  %v1003_v54 = vld [vmem:[%s5964_s1 + $0x1a0] sm:$0xff]  ;;  %v4188_v30 = vrot.slane %v4062_v25, %v589_v6 }
  0x5b   : > { %1750 = vmatpush1.bf16.msra.mxu0 %v1339_v48  ;;  %1465 = vmatprep.subr.bf16.mxu1 %v1278_v49  ;;  %v1134_v46 = vld [vmem:[%s5964_s1 + $0x5b8] sm:$0xff]  ;;  %v1283_v48 = vpack.c.bf16 %v1001_v35, %v999_v34  ;;  %v842_v49 = vpack.c.bf16 %v632_v42, %v622_v41  ;;  %v846_v50 = vpack.c.bf16 %v636_v44, %v626_v43  ;;  %v1005_v55 = vld [vmem:[%s5964_s1 + $0x1b0] sm:$0xff]  ;;  %v1131_v56 = vld [vmem:[%s5964_s1 + $0x5a0] sm:$0xff] }
  0x5c   : > { %1751 = vmatprep.subr.bf16.mxu0 %v1342_v53  ;;  %v1286_v53 = vpack.c.bf16 %v1006_v40, %v1004_v39  ;;  %v1350_v57 = vpack.c.bf16 %v1134_v46, %v1132_v45  ;;  %v1133_v58 = vld [vmem:[%s5964_s1 + $0x5b0] sm:$0xff]  ;;  %v1138_v63 = vld [vmem:[%s5964_s1 + $0x5d8] sm:$0xff]  ;;  %v1285_v3 = vpack.c.bf16 %v1005_v55, %v1003_v54  ;;  %v1007_v4 = vld [vmem:[%s5964_s1 + $0x1c0] sm:$0xff] }
  0x5d   : > { %1479 = vmatprep.mubr.bf16.mxu1 %v842_v49  ;;  %1765 = vmatprep.mubr.bf16.mxu0 %v846_v50  ;;  %v1009_v5 = vld [vmem:[%s5964_s1 + $0x1d0] sm:$0xff]  ;;  %v1135_v10 = vld [vmem:[%s5964_s1 + $0x5c0] sm:$0xff]  ;;  %v1014_v15 = vld [vmem:[%s5964_s1 + $0x1f8] sm:$0xff] }
  0x5e   : > { %1466 = vmatpush1.bf16.msra.mxu1 %v1277_v59  ;;  %v1008_v59 = vld [vmem:[%s5964_s1 + $0x1c8] sm:$0xff]  ;;  %v1137_v12 = vld [vmem:[%s5964_s1 + $0x5d0] sm:$0xff]  ;;  %v1142_v17 = vld [vmem:[%s5964_s1 + $0x5f8] sm:$0xff]  ;;  %v1287_v24 = vpack.c.bf16 %v1009_v5, %v1007_v4 }
  0x5f   : > { %1752 = vmatpush1.bf16.msra.mxu0 %v1341_v61  ;;  %1467 = vmatprep.subr.bf16.mxu1 %v1280_v62  ;;  %v1010_v61 = vld [vmem:[%s5964_s1 + $0x1d8] sm:$0xff]  ;;  %v1136_v62 = vld [vmem:[%s5964_s1 + $0x5c8] sm:$0xff]  ;;  %v1011_v18 = vld [vmem:[%s5964_s1 + $0x1e0] sm:$0xff] }
  0x60   : > { %1753 = vmatprep.subr.bf16.mxu0 %v1344_v2  ;;  %v597_v2 = vsub.s32 6, %v4004_v60  ;;  %v1288_v9 = vpack.c.bf16 %v1010_v61, %v1008_v59  ;;  %v1140_v16 = vld [vmem:[%s5964_s1 + $0x5e8] sm:$0xff]  ;;  %v1139_v20 = vld [vmem:[%s5964_s1 + $0x5e0] sm:$0xff]  ;;  %v1141_v21 = vld [vmem:[%s5964_s1 + $0x5f0] sm:$0xff] }
  0x61   : > { %v351_v29 = vld [vmem:[%s3746_s19 + $0x20] sm:$0xff]  ;;  %v361_v34 = vld [vmem:[%s3746_s19 + $0x70] sm:$0xff]  ;;  %v1144_v35 = vld [vmem:[%s5964_s1 + $0x608] sm:$0xff]  ;;  %v1354_v38 = vpack.c.bf16 %v1142_v17, %v1140_v16  ;;  %v1353_v47 = vpack.c.bf16 %v1141_v21, %v1139_v20 }
  0x62   : > { %1468 = vmatpush1.bf16.msra.mxu1 %v1279_v8  ;;  %v1349_v8 = vpack.c.bf16 %v1133_v58, %v1131_v56  ;;  %v4182_v23 = vrot.slane %v4062_v25, %v597_v2  ;;  %v1016_v36 = vld [vmem:[%s5964_s1 + $0x208] sm:$0xff]  ;;  %v1018_v25 = vld [vmem:[%s5964_s1 + $0x218] sm:$0xff]  ;;  %v635_v49 = vmul.f32 %v4188_v30, %v361_v34  ;;  %v1143_v50 = vld [vmem:[%s5964_s1 + $0x600] sm:$0xff] }
  0x63   : > { %1754 = vmatpush1.bf16.msra.mxu0 %v1343_v13  ;;  %1469 = vmatprep.subr.bf16.mxu1 %v1282_v14  ;;  %v1012_v13 = vld [vmem:[%s5964_s1 + $0x1e8] sm:$0xff]  ;;  %v1352_v14 = vpack.c.bf16 %v1138_v63, %v1136_v62  ;;  %v378_v40 = vld [vmem:[%s3746_s19 + $0xf8] sm:$0xff]  ;;  %v1145_v51 = vld [vmem:[%s5964_s1 + $0x610] sm:$0xff]  ;;  %v1292_v54 = vpack.c.bf16 %v1018_v25, %v1016_v36 }
  0x64   : > { %1755 = vmatprep.subr.bf16.mxu0 %v1346_v19  ;;  %v1013_v19 = vld [vmem:[%s5964_s1 + $0x1f0] sm:$0xff]  ;;  %v368_v39 = vld [vmem:[%s3746_s19 + $0xa8] sm:$0xff]  ;;  %v1146_v43 = vld [vmem:[%s5964_s1 + $0x618] sm:$0xff]  ;;  %v652_v58 = vmul.f32 %v4067_v28, %v378_v40  ;;  %v1355_v16 = vpack.c.bf16 %v1145_v51, %v1143_v50 }
  0x65   : > { %v372_v44 = vld [vmem:[%s3746_s19 + $0xc8] sm:$0xff]  ;;  %v382_v45 = vld [vmem:[%s3746_s19 + $0x118] sm:$0xff]  ;;  %v1289_v46 = vpack.c.bf16 %v1013_v19, %v1011_v18  ;;  %v4234_v59 = vld [vmem:[%s5964_s1 + $0x620] sm:$0xff]  ;;  %v1356_v61 = vpack.c.bf16 %v1146_v43, %v1144_v35 }
  0x66   : > { %1470 = vmatpush1.bf16.msra.mxu1 %v1281_v26  ;;  %v347_v26 = vld [vmem:[%s3746_s19] sm:$0xff]  ;;  %v1148_v55 = vld [vmem:[%s5964_s1 + $0x628] sm:$0xff]  ;;  %v1150_v56 = vld [vmem:[%s5964_s1 + $0x638] sm:$0xff]  ;;  %v646_v62 = vmul.f32 %v4072_v31, %v372_v44  ;;  %v656_v63 = vmul.f32 %v4072_v31, %v382_v45 }
  0x67   : > { %1756 = vmatpush1.bf16.msra.mxu0 %v1345_v27  ;;  %1471 = vmatprep.subr.bf16.mxu1 %v1284_v32  ;;  %v357_v27 = vld [vmem:[%s3746_s19 + $0x50] sm:$0xff]  ;;  %v1351_v32 = vpack.c.bf16 %v1137_v12, %v1135_v10  ;;  %v621_v41 = vmul.f32 %v4179_v22, %v347_v26  ;;  %v371_v6 = vld [vmem:[%s3746_s19 + $0xc0] sm:$0xff]  ;;  %v388_v18 = vld [vmem:[%s3746_s19 + $0x148] sm:$0xff]  ;;  %v1358_v21 = vpack.c.bf16 %v1150_v56, %v1148_v55 }
  0x68   : > { %1757 = vmatprep.subr.bf16.mxu0 %v1348_v33  ;;  %v1290_v33 = vpack.c.bf16 %v1014_v15, %v1012_v13  ;;  %v631_v42 = vmul.f32 %v4179_v22, %v357_v27  ;;  %v4241_v2 = vld [vmem:[%s5964_s1 + $0x630] sm:$0xff]  ;;  %v1022_v13 = vld [vmem:[%s5964_s1 + $0x238] sm:$0xff]  ;;  %v1024_v20 = vld [vmem:[%s5964_s1 + $0x248] sm:$0xff]  ;;  %v645_v35 = vmul.f32 %v4188_v30, %v371_v6 }
  0x69   : > { %v377_v4 = vld [vmem:[%s3746_s19 + $0xf0] sm:$0xff]  ;;  %v398_v19 = vld [vmem:[%s3746_s19 + $0x198] sm:$0xff]  ;;  %v1357_v26 = vpack.c.bf16 %v4241_v2, %v4234_v59  ;;  %v1152_v25 = vld [vmem:[%s5964_s1 + $0x648] sm:$0xff] }
  0x6a   : > { %1472 = vmatpush1.bf16.msra.mxu1 %v1283_v48  ;;  %v625_v48 = vmul.f32 %v4188_v30, %v351_v29  ;;  %v841_v5 = vpack.c.bf16 %v631_v42, %v621_v41  ;;  %v1021_v15 = vld [vmem:[%s5964_s1 + $0x230] sm:$0xff]  ;;  %v1026_v29 = vld [vmem:[%s5964_s1 + $0x258] sm:$0xff]  ;;  %v651_v34 = vmul.f32 %v4179_v22, %v377_v4  ;;  %v662_v41 = vmul.f32 %v4067_v28, %v388_v18  ;;  %v1151_v43 = vld [vmem:[%s5964_s1 + $0x640] sm:$0xff] }
  0x6b   : > { %1758 = vmatpush1.bf16.msra.mxu0 %v1347_v52  ;;  %1473 = vmatprep.subr.bf16.mxu1 %v1286_v53  ;;  %v1015_v52 = vld [vmem:[%s5964_s1 + $0x200] sm:$0xff]  ;;  %v1017_v53 = vld [vmem:[%s5964_s1 + $0x210] sm:$0xff]  ;;  %v672_v42 = vmul.f32 %v4067_v28, %v398_v19  ;;  %v1296_v45 = vpack.c.bf16 %v1026_v29, %v1024_v20  ;;  %v1156_v56 = vld [vmem:[%s5964_s1 + $0x668] sm:$0xff] }
  0x6c   : > { %1759 = vmatprep.subr.bf16.mxu0 %v1350_v57  ;;  %v642_v57 = vmul.f32 %v4067_v28, %v368_v39  ;;  %v845_v10 = vpack.c.bf16 %v635_v49, %v625_v48  ;;  %v1291_v12 = vpack.c.bf16 %v1017_v53, %v1015_v52  ;;  %v1154_v39 = vld [vmem:[%s5964_s1 + $0x658] sm:$0xff]  ;;  %v1153_v44 = vld [vmem:[%s5964_s1 + $0x650] sm:$0xff]  ;;  %v387_v49 = vld [vmem:[%s3746_s19 + $0x140] sm:$0xff] }
  0x6d   : > { %v1360_v48 = vpack.c.bf16 %v1154_v39, %v1152_v25  ;;  %v397_v50 = vld [vmem:[%s3746_s19 + $0x190] sm:$0xff]  ;;  %v1023_v51 = vld [vmem:[%s5964_s1 + $0x240] sm:$0xff]  ;;  %v862_v59 = vpack.c.bf16 %v672_v42, %v662_v41  ;;  %v1359_v2 = vpack.c.bf16 %v1153_v44, %v1151_v43  ;;  %v418_v6 = vld [vmem:[%s3746_s19 + $0x238] sm:$0xff] }
  0x6e   : > { %1474 = vmatpush1.bf16.msra.mxu1 %v1285_v3  ;;  %v367_v3 = vld [vmem:[%s3746_s19 + $0xa0] sm:$0xff]  ;;  %v852_v17 = vpack.c.bf16 %v652_v58, %v642_v57  ;;  %v1025_v52 = vld [vmem:[%s5964_s1 + $0x250] sm:$0xff]  ;;  %v1158_v57 = vld [vmem:[%s5964_s1 + $0x678] sm:$0xff] }
  0x6f   : > { %1760 = vmatpush1.bf16.msra.mxu0 %v1349_v8  ;;  %1475 = vmatprep.subr.bf16.mxu1 %v1288_v9  ;;  %v381_v8 = vld [vmem:[%s3746_s19 + $0x110] sm:$0xff]  ;;  %v1020_v9 = vld [vmem:[%s5964_s1 + $0x228] sm:$0xff]  ;;  %v641_v27 = vmul.f32 %v4179_v22, %v367_v3  ;;  %v391_v53 = vld [vmem:[%s3746_s19 + $0x160] sm:$0xff] }
  0x70   : > { %1761 = vmatprep.subr.bf16.mxu0 %v1352_v14  ;;  %v1019_v14 = vld [vmem:[%s5964_s1 + $0x220] sm:$0xff]  ;;  %v655_v36 = vmul.f32 %v4188_v30, %v381_v8  ;;  %v401_v55 = vld [vmem:[%s3746_s19 + $0x1b0] sm:$0xff]  ;;  %v1295_v8 = vpack.c.bf16 %v1025_v52, %v1023_v51  ;;  %v1160_v19 = vld [vmem:[%s5964_s1 + $0x688] sm:$0xff] }
  0x71   : > { %v1293_v40 = vpack.c.bf16 %v1021_v15, %v1019_v14  ;;  %v1157_v4 = vld [vmem:[%s5964_s1 + $0x670] sm:$0xff]  ;;  %v661_v14 = vmul.f32 %v4179_v22, %v387_v49  ;;  %v671_v15 = vmul.f32 %v4179_v22, %v397_v50  ;;  %v1162_v20 = vld [vmem:[%s5964_s1 + $0x698] sm:$0xff]  ;;  %v411_v41 = vld [vmem:[%s3746_s19 + $0x200] sm:$0xff] }
  0x72   : > { %1476 = vmatpush1.bf16.msra.mxu1 %v1287_v24  ;;  %v856_v24 = vpack.c.bf16 %v656_v63, %v646_v62  ;;  %v855_v58 = vpack.c.bf16 %v655_v36, %v645_v35  ;;  %v1028_v62 = vld [vmem:[%s5964_s1 + $0x268] sm:$0xff]  ;;  %v1030_v63 = vld [vmem:[%s5964_s1 + $0x278] sm:$0xff]  ;;  %v1029_v18 = vld [vmem:[%s5964_s1 + $0x270] sm:$0xff]  ;;  %v1364_v39 = vpack.c.bf16 %v1162_v20, %v1160_v19 }
  0x73   : > { %1762 = vmatpush1.bf16.msra.mxu0 %v1351_v32  ;;  %1477 = vmatprep.subr.bf16.mxu1 %v1290_v33  ;;  %v392_v32 = vld [vmem:[%s3746_s19 + $0x168] sm:$0xff]  ;;  %v402_v33 = vld [vmem:[%s3746_s19 + $0x1b8] sm:$0xff]  ;;  %v1159_v35 = vld [vmem:[%s5964_s1 + $0x680] sm:$0xff]  ;;  %v861_v43 = vpack.c.bf16 %v671_v15, %v661_v14 }
  0x74   : > { %1763 = vmatprep.subr.bf16.mxu0 %v1354_v38  ;;  %v1294_v38 = vpack.c.bf16 %v1022_v13, %v1020_v9  ;;  %v1362_v9 = vpack.c.bf16 %v1158_v57, %v1156_v56  ;;  %v422_v13 = vld [vmem:[%s3746_s19 + $0x258] sm:$0xff]  ;;  %v1161_v36 = vld [vmem:[%s5964_s1 + $0x690] sm:$0xff]  ;;  %v1031_v42 = vld [vmem:[%s5964_s1 + $0x280] sm:$0xff] }
  0x75   : > { %v1034_v29 = vld [vmem:[%s5964_s1 + $0x298] sm:$0xff]  ;;  %v421_v44 = vld [vmem:[%s3746_s19 + $0x250] sm:$0xff]  ;;  %v1163_v51 = vld [vmem:[%s5964_s1 + $0x6a0] sm:$0xff] }
  0x76   : > { %1478 = vmatpush1.bf16.msra.mxu1 %v1289_v46  ;;  %v666_v46 = vmul.f32 %v4072_v31, %v392_v32  ;;  %v1036_v52 = vld [vmem:[%s5964_s1 + $0x2a8] sm:$0xff]  ;;  %v1165_v56 = vld [vmem:[%s5964_s1 + $0x6b0] sm:$0xff]  ;;  %v427_v20 = vld [vmem:[%s3746_s19 + $0x280] sm:$0xff] }
  0x77   : > { %1764 = vmatpush1.bf16.msra.mxu0 %v1353_v47  ;;  %1590 = vmatprep.subr.bf16.mxu1 %v1292_v54  ;;  %v676_v47 = vmul.f32 %v4072_v31, %v402_v33  ;;  %v851_v54 = vpack.c.bf16 %v651_v34, %v641_v27  ;;  %v1032_v27 = vld [vmem:[%s5964_s1 + $0x288] sm:$0xff]  ;;  %v696_v34 = vmul.f32 %v4072_v31, %v422_v13 }
  0x78   : > { %1876 = vmatprep.subr.bf16.mxu0 %v1356_v61  ;;  %v1155_v61 = vld [vmem:[%s5964_s1 + $0x660] sm:$0xff]  ;;  %v428_v57 = vld [vmem:[%s3746_s19 + $0x288] sm:$0xff] }
  0x79   : > { %1480 = vmatmul.mubr.bf16.vlgmr.msra.gmra.mrb[0].mxu1 %v841_v5  ;;  %v866_v3 = vpack.c.bf16 %v676_v47, %v666_v46  ;;  %v408_v5 = vld [vmem:[%s3746_s19 + $0x1e8] sm:$0xff]  ;;  %v1361_v32 = vpack.c.bf16 %v1157_v4, %v1155_v61  ;;  %v1033_v46 = vld [vmem:[%s5964_s1 + $0x290] sm:$0xff]  ;;  %v702_v13 = vmul.f32 %v4067_v28, %v428_v57 }
  0x7a   : > { %1766 = vmatmul.mubr.bf16.vlgmr.msra.gmra.mrb[0].mxu0 %v845_v10  ;;  %1591 = vmatpush1.bf16.msra.mxu1 %v1291_v12  ;;  %v1027_v10 = vld [vmem:[%s5964_s1 + $0x260] sm:$0xff]  ;;  %v412_v12 = vld [vmem:[%s3746_s19 + $0x208] sm:$0xff]  ;;  %v1299_v61 = vpack.c.bf16 %v1033_v46, %v1031_v42 }
  0x7b   : > { %1877 = vmatpush1.bf16.msra.mxu0 %v1355_v16  ;;  %1489 = vmatprep.mubr.bf16.mxu1 %v852_v17  ;;  %v665_v16 = vmul.f32 %v4188_v30, %v391_v53  ;;  %v1298_v17 = vpack.c.bf16 %v1030_v63, %v1028_v62  ;;  %v686_v33 = vmul.f32 %v4072_v31, %v412_v12  ;;  %v1164_v47 = vld [vmem:[%s5964_s1 + $0x6a8] sm:$0xff]  ;;  %v1038_v53 = vld [vmem:[%s5964_s1 + $0x2b8] sm:$0xff] }
  0x7c   : > { %1878 = vmatprep.subr.bf16.mxu0 %v1358_v21  ;;  %1775 = vmatprep.mubr.bf16.mxu0 %v856_v24  ;;  %v675_v21 = vmul.f32 %v4188_v30, %v401_v55  ;;  %v682_v24 = vmul.f32 %v4067_v28, %v408_v5  ;;  %v1297_v25 = vpack.c.bf16 %v1029_v18, %v1027_v10  ;;  %v432_v63 = vld [vmem:[%s3746_s19 + $0x2a8] sm:$0xff]  ;;  %v1170_v10 = vld [vmem:[%s5964_s1 + $0x6d8] sm:$0xff] }
  0x7d   : > { %1592 = vmatprep.subr.bf16.mxu1 %v1294_v38  ;;  %v407_v38 = vld [vmem:[%s3746_s19 + $0x1e0] sm:$0xff]  ;;  %v1363_v55 = vpack.c.bf16 %v1161_v36, %v1159_v35  ;;  %v685_v5 = vmul.f32 %v4188_v30, %v411_v41  ;;  %v695_v12 = vmul.f32 %v4188_v30, %v421_v44  ;;  %v1040_v15 = vld [vmem:[%s5964_s1 + $0x2c8] sm:$0xff]  ;;  %v706_v18 = vmul.f32 %v4072_v31, %v432_v63  ;;  %v441_v35 = vld [vmem:[%s3746_s19 + $0x2f0] sm:$0xff] }
  0x7e   : > { %1593 = vmatpush1.bf16.msra.mxu1 %v1293_v40  ;;  %v417_v40 = vld [vmem:[%s3746_s19 + $0x230] sm:$0xff]  ;;  %v865_v49 = vpack.c.bf16 %v675_v21, %v665_v16  ;;  %v1042_v16 = vld [vmem:[%s5964_s1 + $0x2d8] sm:$0xff]  ;;  %v448_v42 = vld [vmem:[%s3746_s19 + $0x328] sm:$0xff]  ;;  %v715_v63 = vmul.f32 %v4188_v30, %v441_v35 }
  0x7f   : > { %1879 = vmatpush1.bf16.msra.mxu0 %v1357_v26  ;;  %1594 = vmatprep.subr.bf16.mxu1 %v1296_v45  ;;  %v692_v26 = vmul.f32 %v4067_v28, %v418_v6  ;;  %v1300_v45 = vpack.c.bf16 %v1034_v29, %v1032_v27  ;;  %v691_v4 = vmul.f32 %v4179_v22, %v417_v40  ;;  %v437_v21 = vld [vmem:[%s3746_s19 + $0x2d0] sm:$0xff]  ;;  %v1167_v29 = vld [vmem:[%s5964_s1 + $0x6c0] sm:$0xff]  ;;  %v1046_v44 = vld [vmem:[%s5964_s1 + $0x2f8] sm:$0xff] }
  0x80   : > { %1880 = vmatprep.subr.bf16.mxu0 %v1360_v48  ;;  %v1166_v48 = vld [vmem:[%s5964_s1 + $0x6b8] sm:$0xff]  ;;  %v1302_v6 = vpack.c.bf16 %v1038_v53, %v1036_v52  ;;  %v1304_v36 = vpack.c.bf16 %v1042_v16, %v1040_v15  ;;  %v875_v40 = vpack.c.bf16 %v695_v12, %v685_v5  ;;  %v1171_v53 = vld [vmem:[%s5964_s1 + $0x6e0] sm:$0xff]  ;;  %v457_v12 = vld [vmem:[%s3746_s19 + $0x370] sm:$0xff] }
  0x81   : > { %1490 = vmatmul.mubr.bf16.gmra.mrb[4].mxu1 %v851_v54  ;;  %v872_v50 = vpack.c.bf16 %v692_v26, %v682_v24  ;;  %v876_v54 = vpack.c.bf16 %v696_v34, %v686_v33  ;;  %v1366_v62 = vpack.c.bf16 %v1166_v48, %v1164_v47  ;;  %v431_v24 = vld [vmem:[%s3746_s19 + $0x2a0] sm:$0xff]  ;;  %v458_v47 = vld [vmem:[%s3746_s19 + $0x378] sm:$0xff]  ;;  %v452_v48 = vld [vmem:[%s3746_s19 + $0x348] sm:$0xff] }
  0x82   : > { %1776 = vmatmul.mubr.bf16.gmra.mrb[4].mxu0 %v855_v58  ;;  %1499 = vmatprep.mubr.bf16.mxu1 %v862_v59  ;;  %v438_v58 = vld [vmem:[%s3746_s19 + $0x2d8] sm:$0xff]  ;;  %v681_v59 = vmul.f32 %v4179_v22, %v407_v38  ;;  %v1039_v33 = vld [vmem:[%s5964_s1 + $0x2c0] sm:$0xff]  ;;  %v1041_v38 = vld [vmem:[%s5964_s1 + $0x2d0] sm:$0xff]  ;;  %v705_v57 = vmul.f32 %v4188_v30, %v431_v24 }
  0x83   : > { %1881 = vmatpush1.bf16.msra.mxu0 %v1359_v2  ;;  %1785 = vmatprep.mubr.bf16.mxu0 %v866_v3  ;;  %v442_v2 = vld [vmem:[%s3746_s19 + $0x2f8] sm:$0xff]  ;;  %v1035_v3 = vld [vmem:[%s5964_s1 + $0x2a0] sm:$0xff]  ;;  %v712_v14 = vmul.f32 %v4067_v28, %v438_v58  ;;  %v1049_v24 = vld [vmem:[%s5964_s1 + $0x310] sm:$0xff] }
  0x84   : > { %1595 = vmatpush1.bf16.msra.mxu1 %v1295_v8  ;;  %1882 = vmatprep.subr.bf16.mxu0 %v1362_v9  ;;  %v1037_v8 = vld [vmem:[%s5964_s1 + $0x2b0] sm:$0xff]  ;;  %v1168_v9 = vld [vmem:[%s5964_s1 + $0x6c8] sm:$0xff]  ;;  %v716_v19 = vmul.f32 %v4072_v31, %v442_v2  ;;  %v871_v34 = vpack.c.bf16 %v691_v4, %v681_v59  ;;  %v722_v2 = vmul.f32 %v4067_v28, %v448_v42  ;;  %v1050_v5 = vld [vmem:[%s5964_s1 + $0x318] sm:$0xff] }
  0x85   : > { %1596 = vmatprep.subr.bf16.mxu1 %v1298_v17  ;;  %v1365_v17 = vpack.c.bf16 %v1165_v56, %v1163_v51  ;;  %v1301_v26 = vpack.c.bf16 %v1037_v8, %v1035_v3  ;;  %v1368_v27 = vpack.c.bf16 %v1170_v10, %v1168_v9  ;;  %v882_v41 = vpack.c.bf16 %v712_v14, %v702_v13  ;;  %v1045_v59 = vld [vmem:[%s5964_s1 + $0x2f0] sm:$0xff]  ;;  %v1048_v4 = vld [vmem:[%s5964_s1 + $0x308] sm:$0xff]  ;;  %v447_v9 = vld [vmem:[%s3746_s19 + $0x320] sm:$0xff] }
  0x86   : > { %v1303_v51 = vpack.c.bf16 %v1041_v38, %v1039_v33  ;;  %v711_v56 = vmul.f32 %v4179_v22, %v437_v21  ;;  %v732_v3 = vmul.f32 %v4067_v28, %v458_v47  ;;  %v451_v13 = vld [vmem:[%s3746_s19 + $0x340] sm:$0xff]  ;;  %v1308_v21 = vpack.c.bf16 %v1050_v5, %v1048_v4  ;;  %v468_v33 = vld [vmem:[%s3746_s19 + $0x3c8] sm:$0xff]  ;;  %v1054_v35 = vld [vmem:[%s5964_s1 + $0x338] sm:$0xff] }
  0x87   : > { %1883 = vmatpush1.bf16.msra.mxu0 %v1361_v32  ;;  %v1169_v32 = vld [vmem:[%s5964_s1 + $0x6d0] sm:$0xff]  ;;  %v1175_v16 = vld [vmem:[%s5964_s1 + $0x700] sm:$0xff]  ;;  %v731_v47 = vmul.f32 %v4179_v22, %v457_v12 }
  0x88   : > { %1597 = vmatpush1.bf16.msra.mxu1 %v1297_v25  ;;  %1884 = vmatprep.subr.bf16.mxu0 %v1364_v39  ;;  %v1172_v25 = vld [vmem:[%s5964_s1 + $0x6e8] sm:$0xff]  ;;  %v1174_v39 = vld [vmem:[%s5964_s1 + $0x6f8] sm:$0xff]  ;;  %v1367_v46 = vpack.c.bf16 %v1169_v32, %v1167_v29  ;;  %v885_v29 = vpack.c.bf16 %v715_v63, %v705_v57  ;;  %v892_v32 = vpack.c.bf16 %v732_v3, %v722_v2  ;;  %v477_v63 = vld [vmem:[%s3746_s19 + $0x410] sm:$0xff] }
  0x89   : > { %1500 = vmatmul.mubr.bf16.gmra.mrb[8].mxu1 %v861_v43  ;;  %1598 = vmatprep.subr.bf16.mxu1 %v1300_v45  ;;  %v1044_v43 = vld [vmem:[%s5964_s1 + $0x2e8] sm:$0xff]  ;;  %v886_v45 = vpack.c.bf16 %v716_v19, %v706_v18  ;;  %v1370_v52 = vpack.c.bf16 %v1174_v39, %v1172_v25  ;;  %v1047_v18 = vld [vmem:[%s5964_s1 + $0x300] sm:$0xff]  ;;  %v478_v25 = vld [vmem:[%s3746_s19 + $0x418] sm:$0xff] }
  0x8a   : > { %1786 = vmatmul.mubr.bf16.gmra.mrb[8].mxu0 %v865_v49  ;;  %1509 = vmatprep.mubr.bf16.mxu1 %v872_v50  ;;  %v462_v49 = vld [vmem:[%s3746_s19 + $0x398] sm:$0xff]  ;;  %v4446_v50 = vmul.f32 %v4179_v22, %v427_v20  ;;  %v1306_v58 = vpack.c.bf16 %v1046_v44, %v1044_v43  ;;  %v461_v20 = vld [vmem:[%s3746_s19 + $0x390] sm:$0xff]  ;;  %v472_v39 = vld [vmem:[%s3746_s19 + $0x3e8] sm:$0xff]  ;;  %v1307_v42 = vpack.c.bf16 %v1049_v24, %v1047_v18 }
  0x8b   : > { %1795 = vmatprep.mubr.bf16.mxu0 %v876_v54  ;;  %1885 = vmatpush1.bf16.msra.mxu0 %v1363_v55  ;;  %v1173_v54 = vld [vmem:[%s5964_s1 + $0x6f0] sm:$0xff]  ;;  %v1043_v55 = vld [vmem:[%s5964_s1 + $0x2e0] sm:$0xff]  ;;  %v736_v8 = vmul.f32 %v4072_v31, %v462_v49  ;;  %v1058_v57 = vld [vmem:[%s5964_s1 + $0x358] sm:$0xff] }
  0x8c   : > { %1599 = vmatpush1.bf16.msra.mxu1 %v1299_v61  ;;  %1886 = vmatprep.subr.bf16.mxu0 %v1366_v62  ;;  %v1176_v61 = vld [vmem:[%s5964_s1 + $0x708] sm:$0xff]  ;;  %v1178_v62 = vld [vmem:[%s5964_s1 + $0x718] sm:$0xff]  ;;  %v1369_v10 = vpack.c.bf16 %v1173_v54, %v1171_v53  ;;  %v1305_v14 = vpack.c.bf16 %v1045_v59, %v1043_v55  ;;  %v881_v19 = vpack.c.bf16 %v711_v56, %v4446_v50  ;;  %v1179_v44 = vld [vmem:[%s5964_s1 + $0x720] sm:$0xff] }
  0x8d   : > { %1600 = vmatprep.subr.bf16.mxu1 %v1302_v6  ;;  %v726_v6 = vmul.f32 %v4072_v31, %v452_v48  ;;  %v1372_v15 = vpack.c.bf16 %v1178_v62, %v1176_v61  ;;  %v725_v48 = vmul.f32 %v4188_v30, %v451_v13  ;;  %v1053_v50 = vld [vmem:[%s5964_s1 + $0x330] sm:$0xff]  ;;  %v735_v53 = vmul.f32 %v4188_v30, %v461_v20  ;;  %v1056_v56 = vld [vmem:[%s5964_s1 + $0x348] sm:$0xff]  ;;  %v467_v61 = vld [vmem:[%s3746_s19 + $0x3c0] sm:$0xff] }
  0x8e   : > { %v742_v54 = vmul.f32 %v4067_v28, %v468_v33  ;;  %v752_v55 = vmul.f32 %v4067_v28, %v478_v25  ;;  %v471_v2 = vld [vmem:[%s3746_s19 + $0x3e0] sm:$0xff]  ;;  %v1312_v12 = vpack.c.bf16 %v1058_v57, %v1056_v56  ;;  %v1057_v13 = vld [vmem:[%s5964_s1 + $0x350] sm:$0xff]  ;;  %v488_v18 = vld [vmem:[%s3746_s19 + $0x468] sm:$0xff]  ;;  %v751_v25 = vmul.f32 %v4179_v22, %v477_v63 }
  0x8f   : > { %1887 = vmatpush1.bf16.msra.mxu0 %v1365_v17  ;;  %v1177_v17 = vld [vmem:[%s5964_s1 + $0x710] sm:$0xff]  ;;  %v1183_v5 = vld [vmem:[%s5964_s1 + $0x740] sm:$0xff]  ;;  %v1062_v20 = vld [vmem:[%s5964_s1 + $0x378] sm:$0xff] }
  0x90   : > { %1601 = vmatpush1.bf16.msra.mxu1 %v1301_v26  ;;  %1888 = vmatprep.subr.bf16.mxu0 %v1368_v27  ;;  %v1180_v26 = vld [vmem:[%s5964_s1 + $0x728] sm:$0xff]  ;;  %v1182_v27 = vld [vmem:[%s5964_s1 + $0x738] sm:$0xff]  ;;  %v1371_v38 = vpack.c.bf16 %v1177_v17, %v1175_v16  ;;  %v895_v16 = vpack.c.bf16 %v735_v53, %v725_v48  ;;  %v902_v17 = vpack.c.bf16 %v752_v55, %v742_v54  ;;  %v497_v53 = vld [vmem:[%s3746_s19 + $0x4b0] sm:$0xff] }
  0x91   : > { %1510 = vmatmul.mubr.bf16.gmra.mrb[12].mxu1 %v871_v34  ;;  %1602 = vmatprep.subr.bf16.mxu1 %v1304_v36  ;;  %v1052_v34 = vld [vmem:[%s5964_s1 + $0x328] sm:$0xff]  ;;  %v896_v36 = vpack.c.bf16 %v736_v8, %v726_v6  ;;  %v1374_v43 = vpack.c.bf16 %v1182_v27, %v1180_v26  ;;  %v1185_v6 = vld [vmem:[%s5964_s1 + $0x750] sm:$0xff]  ;;  %v1055_v8 = vld [vmem:[%s5964_s1 + $0x340] sm:$0xff] }
  0x92   : > { %1796 = vmatmul.mubr.bf16.gmra.mrb[12].mxu0 %v875_v40  ;;  %1519 = vmatprep.mubr.bf16.mxu1 %v882_v41  ;;  %v482_v40 = vld [vmem:[%s3746_s19 + $0x438] sm:$0xff]  ;;  %v4513_v41 = vmul.f32 %v4179_v22, %v447_v9  ;;  %v1310_v49 = vpack.c.bf16 %v1054_v35, %v1052_v34  ;;  %v492_v26 = vld [vmem:[%s3746_s19 + $0x488] sm:$0xff]  ;;  %v1311_v33 = vpack.c.bf16 %v1057_v13, %v1055_v8  ;;  %v1187_v35 = vld [vmem:[%s5964_s1 + $0x760] sm:$0xff] }
  0x93   : > { %1805 = vmatprep.mubr.bf16.mxu0 %v886_v45  ;;  %1889 = vmatpush1.bf16.msra.mxu0 %v1367_v46  ;;  %v1181_v45 = vld [vmem:[%s5964_s1 + $0x730] sm:$0xff]  ;;  %v1051_v46 = vld [vmem:[%s5964_s1 + $0x320] sm:$0xff]  ;;  %v756_v59 = vmul.f32 %v4072_v31, %v482_v40  ;;  %v498_v24 = vld [vmem:[%s3746_s19 + $0x4b8] sm:$0xff] }
  0x94   : > { %1603 = vmatpush1.bf16.msra.mxu1 %v1303_v51  ;;  %1890 = vmatprep.subr.bf16.mxu0 %v1370_v52  ;;  %v1184_v51 = vld [vmem:[%s5964_s1 + $0x748] sm:$0xff]  ;;  %v1186_v52 = vld [vmem:[%s5964_s1 + $0x758] sm:$0xff]  ;;  %v1373_v62 = vpack.c.bf16 %v1181_v45, %v1179_v44  ;;  %v1309_v3 = vpack.c.bf16 %v1053_v50, %v1051_v46  ;;  %v891_v9 = vpack.c.bf16 %v731_v47, %v4513_v41  ;;  %v1061_v41 = vld [vmem:[%s5964_s1 + $0x370] sm:$0xff] }
  0x95   : > { %1604 = vmatprep.subr.bf16.mxu1 %v1306_v58  ;;  %v746_v58 = vmul.f32 %v4072_v31, %v472_v39  ;;  %v1376_v4 = vpack.c.bf16 %v1186_v52, %v1184_v51  ;;  %v502_v27 = vld [vmem:[%s3746_s19 + $0x4d8] sm:$0xff]  ;;  %v745_v39 = vmul.f32 %v4188_v30, %v471_v2  ;;  %v762_v45 = vmul.f32 %v4067_v28, %v488_v18  ;;  %v1064_v47 = vld [vmem:[%s5964_s1 + $0x388] sm:$0xff]  ;;  %v487_v51 = vld [vmem:[%s3746_s19 + $0x460] sm:$0xff] }
  0x96   : > { %v772_v46 = vmul.f32 %v4067_v28, %v498_v24  ;;  %v1066_v48 = vld [vmem:[%s5964_s1 + $0x398] sm:$0xff]  ;;  %v776_v50 = vmul.f32 %v4072_v31, %v502_v27  ;;  %v491_v54 = vld [vmem:[%s3746_s19 + $0x480] sm:$0xff]  ;;  %v1065_v2 = vld [vmem:[%s5964_s1 + $0x390] sm:$0xff] }
  0x97   : > { %1891 = vmatpush1.bf16.msra.mxu0 %v1369_v10  ;;  %v481_v10 = vld [vmem:[%s3746_s19 + $0x430] sm:$0xff]  ;;  %v1191_v57 = vld [vmem:[%s5964_s1 + $0x780] sm:$0xff]  ;;  %v1316_v63 = vpack.c.bf16 %v1066_v48, %v1064_v47  ;;  %v508_v8 = vld [vmem:[%s3746_s19 + $0x508] sm:$0xff]  ;;  %v765_v27 = vmul.f32 %v4188_v30, %v491_v54 }
  0x98   : > { %1605 = vmatpush1.bf16.msra.mxu1 %v1305_v14  ;;  %1892 = vmatprep.subr.bf16.mxu0 %v1372_v15  ;;  %v1188_v14 = vld [vmem:[%s5964_s1 + $0x768] sm:$0xff]  ;;  %v1190_v15 = vld [vmem:[%s5964_s1 + $0x778] sm:$0xff]  ;;  %v755_v44 = vmul.f32 %v4188_v30, %v481_v10  ;;  %v1067_v24 = vld [vmem:[%s5964_s1 + $0x3a0] sm:$0xff] }
  0x99   : > { %1520 = vmatmul.mubr.bf16.gmra.mrb[16].mxu1 %v881_v19  ;;  %1606 = vmatprep.subr.bf16.mxu1 %v1308_v21  ;;  %v1060_v19 = vld [vmem:[%s5964_s1 + $0x368] sm:$0xff]  ;;  %v906_v21 = vpack.c.bf16 %v756_v59, %v746_v58  ;;  %v1378_v34 = vpack.c.bf16 %v1190_v15, %v1188_v14  ;;  %v1193_v58 = vld [vmem:[%s5964_s1 + $0x790] sm:$0xff]  ;;  %v1063_v59 = vld [vmem:[%s5964_s1 + $0x380] sm:$0xff] }
  0x9a   : > { %1806 = vmatmul.mubr.bf16.gmra.mrb[16].mxu0 %v885_v29  ;;  %1529 = vmatprep.mubr.bf16.mxu1 %v892_v32  ;;  %v1375_v29 = vpack.c.bf16 %v1185_v6, %v1183_v5  ;;  %v4580_v32 = vmul.f32 %v4179_v22, %v467_v61  ;;  %v1314_v40 = vpack.c.bf16 %v1062_v20, %v1060_v19  ;;  %v1070_v10 = vld [vmem:[%s5964_s1 + $0x3b8] sm:$0xff]  ;;  %v512_v14 = vld [vmem:[%s3746_s19 + $0x528] sm:$0xff]  ;;  %v1195_v20 = vld [vmem:[%s5964_s1 + $0x7a0] sm:$0xff] }
  0x9b   : > { %1815 = vmatprep.mubr.bf16.mxu0 %v896_v36  ;;  %1893 = vmatpush1.bf16.msra.mxu0 %v1371_v38  ;;  %v1189_v36 = vld [vmem:[%s5964_s1 + $0x770] sm:$0xff]  ;;  %v1059_v38 = vld [vmem:[%s5964_s1 + $0x360] sm:$0xff]  ;;  %v905_v5 = vpack.c.bf16 %v755_v44, %v745_v39  ;;  %v912_v6 = vpack.c.bf16 %v772_v46, %v762_v45  ;;  %v518_v13 = vld [vmem:[%s3746_s19 + $0x558] sm:$0xff]  ;;  %v1315_v18 = vpack.c.bf16 %v1065_v2, %v1063_v59 }
  0x9c   : > { %1607 = vmatpush1.bf16.msra.mxu1 %v1307_v42  ;;  %1894 = vmatprep.subr.bf16.mxu0 %v1374_v43  ;;  %v1192_v42 = vld [vmem:[%s5964_s1 + $0x788] sm:$0xff]  ;;  %v1194_v43 = vld [vmem:[%s5964_s1 + $0x798] sm:$0xff]  ;;  %v1377_v52 = vpack.c.bf16 %v1189_v36, %v1187_v35  ;;  %v1313_v55 = vpack.c.bf16 %v1061_v41, %v1059_v38  ;;  %v901_v61 = vpack.c.bf16 %v751_v25, %v4580_v32  ;;  %v1069_v32 = vld [vmem:[%s5964_s1 + $0x3b0] sm:$0xff] }
  0x9d   : > { %1608 = vmatprep.subr.bf16.mxu1 %v1310_v49  ;;  %v766_v49 = vmul.f32 %v4072_v31, %v492_v26  ;;  %v1380_v56 = vpack.c.bf16 %v1194_v43, %v1192_v42  ;;  %v522_v15 = vld [vmem:[%s3746_s19 + $0x578] sm:$0xff]  ;;  %v771_v26 = vmul.f32 %v4179_v22, %v497_v53  ;;  %v782_v36 = vmul.f32 %v4067_v28, %v508_v8  ;;  %v1072_v25 = vld [vmem:[%s5964_s1 + $0x3c8] sm:$0xff]  ;;  %v507_v42 = vld [vmem:[%s3746_s19 + $0x500] sm:$0xff] }
  0x9e   : > { %v792_v38 = vmul.f32 %v4067_v28, %v518_v13  ;;  %v1074_v39 = vld [vmem:[%s5964_s1 + $0x3d8] sm:$0xff]  ;;  %v796_v41 = vmul.f32 %v4072_v31, %v522_v15  ;;  %v517_v44 = vld [vmem:[%s3746_s19 + $0x550] sm:$0xff]  ;;  %v511_v45 = vld [vmem:[%s3746_s19 + $0x520] sm:$0xff]  ;;  %v1317_v46 = vpack.c.bf16 %v1069_v32, %v1067_v24 }
  0x9f   : > { %1895 = vmatpush1.bf16.msra.mxu0 %v1373_v62  ;;  %v501_v62 = vld [vmem:[%s3746_s19 + $0x4d0] sm:$0xff]  ;;  %v1199_v48 = vld [vmem:[%s5964_s1 + $0x7c0] sm:$0xff]  ;;  %v1320_v53 = vpack.c.bf16 %v1074_v39, %v1072_v25  ;;  %v528_v59 = vld [vmem:[%s3746_s19 + $0x5a8] sm:$0xff]  ;;  %v785_v15 = vmul.f32 %v4188_v30, %v511_v45 }
  0xa0   : > { %1609 = vmatpush1.bf16.msra.mxu1 %v1309_v3  ;;  %1896 = vmatprep.subr.bf16.mxu0 %v1376_v4  ;;  %v1196_v3 = vld [vmem:[%s5964_s1 + $0x7a8] sm:$0xff]  ;;  %v1198_v4 = vld [vmem:[%s5964_s1 + $0x7b8] sm:$0xff]  ;;  %v775_v35 = vmul.f32 %v4188_v30, %v501_v62  ;;  %v1073_v54 = vld [vmem:[%s5964_s1 + $0x3d0] sm:$0xff] }
  0xa1   : > { %1530 = vmatmul.mubr.bf16.gmra.mrb[20].mxu1 %v891_v9  ;;  %1610 = vmatprep.subr.bf16.mxu1 %v1312_v12  ;;  %v1068_v9 = vld [vmem:[%s5964_s1 + $0x3a8] sm:$0xff]  ;;  %v916_v12 = vpack.c.bf16 %v776_v50, %v766_v49  ;;  %v1382_v19 = vpack.c.bf16 %v1198_v4, %v1196_v3  ;;  %v1201_v49 = vld [vmem:[%s5964_s1 + $0x7d0] sm:$0xff]  ;;  %v1071_v50 = vld [vmem:[%s5964_s1 + $0x3c0] sm:$0xff] }
  0xa2   : > { %1816 = vmatmul.mubr.bf16.gmra.mrb[20].mxu0 %v895_v16  ;;  %1539 = vmatprep.mubr.bf16.mxu1 %v902_v17  ;;  %v1379_v16 = vpack.c.bf16 %v1193_v58, %v1191_v57  ;;  %v4647_v17 = vmul.f32 %v4179_v22, %v487_v51  ;;  %v915_v57 = vpack.c.bf16 %v775_v35, %v765_v27  ;;  %v1078_v62 = vld [vmem:[%s5964_s1 + $0x3f8] sm:$0xff]  ;;  %v532_v3 = vld [vmem:[%s3746_s19 + $0x5c8] sm:$0xff]  ;;  %v1075_v13 = vld [vmem:[%s5964_s1 + $0x3e0] sm:$0xff] }
  0xa3   : > { %1825 = vmatprep.mubr.bf16.mxu0 %v906_v21  ;;  %1897 = vmatpush1.bf16.msra.mxu0 %v1375_v29  ;;  %v1197_v21 = vld [vmem:[%s5964_s1 + $0x7b0] sm:$0xff]  ;;  %v1318_v29 = vpack.c.bf16 %v1070_v10, %v1068_v9  ;;  %v922_v58 = vpack.c.bf16 %v792_v38, %v782_v36  ;;  %v538_v2 = vld [vmem:[%s3746_s19 + $0x5f8] sm:$0xff]  ;;  %v1319_v8 = vpack.c.bf16 %v1073_v54, %v1071_v50  ;;  %v1203_v10 = vld [vmem:[%s5964_s1 + $0x7e0] sm:$0xff] }
  0xa4   : > { %1611 = vmatpush1.bf16.msra.mxu1 %v1311_v33  ;;  %1898 = vmatprep.subr.bf16.mxu0 %v1378_v34  ;;  %v1200_v33 = vld [vmem:[%s5964_s1 + $0x7c8] sm:$0xff]  ;;  %v1202_v34 = vld [vmem:[%s5964_s1 + $0x7d8] sm:$0xff]  ;;  %v1381_v43 = vpack.c.bf16 %v1197_v21, %v1195_v20  ;;  %v911_v51 = vpack.c.bf16 %v771_v26, %v4647_v17  ;;  %v1077_v17 = vld [vmem:[%s5964_s1 + $0x3f0] sm:$0xff]  ;;  %v802_v21 = vmul.f32 %v4067_v28, %v528_v59 }
  0xa5   : > { %1612 = vmatprep.subr.bf16.mxu1 %v1314_v40  ;;  %v786_v40 = vmul.f32 %v4072_v31, %v512_v14  ;;  %v1384_v47 = vpack.c.bf16 %v1202_v34, %v1200_v33  ;;  %v542_v4 = vld [vmem:[%s3746_s19 + $0x618] sm:$0xff]  ;;  %v791_v14 = vmul.f32 %v4179_v22, %v517_v44  ;;  %v812_v24 = vmul.f32 %v4067_v28, %v538_v2  ;;  %v527_v38 = vld [vmem:[%s3746_s19 + $0x5a0] sm:$0xff]  ;;  %v537_v25 = vld [vmem:[%s3746_s19 + $0x5f0] sm:$0xff] }
  0xa6   : > { %v806_v26 = vmul.f32 %v4072_v31, %v532_v3  ;;  %v816_v27 = vmul.f32 %v4072_v31, %v542_v4  ;;  %v1321_v32 = vpack.c.bf16 %v1077_v17, %v1075_v13  ;;  %v531_v39 = vld [vmem:[%s3746_s19 + $0x5c0] sm:$0xff]  ;;  %v552_v44 = vld [vmem:[%s3746_s19 + $0x668] sm:$0xff]  ;;  %v562_v45 = vld [vmem:[%s3746_s19 + $0x6b8] sm:$0xff] }
  0xa7   : > { %1899 = vmatpush1.bf16.msra.mxu0 %v1377_v52  ;;  %v521_v52 = vld [vmem:[%s3746_s19 + $0x570] sm:$0xff]  ;;  %v932_v36 = vpack.c.bf16 %v812_v24, %v802_v21  ;;  %v551_v59 = vld [vmem:[%s3746_s19 + $0x660] sm:$0xff]  ;;  %v360_v2 = vld [vmem:[%s3746_s19 + $0x68] sm:$0xff] }
  0xa8   : > { %1613 = vmatpush1.bf16.msra.mxu1 %v1313_v55  ;;  %1900 = vmatprep.subr.bf16.mxu0 %v1380_v56  ;;  %v1204_v55 = vld [vmem:[%s5964_s1 + $0x7e8] sm:$0xff]  ;;  %v1206_v56 = vld [vmem:[%s5964_s1 + $0x7f8] sm:$0xff]  ;;  %v795_v20 = vmul.f32 %v4188_v30, %v521_v52  ;;  %v826_v52 = vmul.f32 %v4072_v31, %v552_v44  ;;  %v373_v44 = vld [vmem:[%s3746_s19 + $0xd0] sm:$0xff] }
  0xa9   : > { %1540 = vmatmul.mubr.bf16.gmra.mrb[24].mxu1 %v901_v61  ;;  %1614 = vmatprep.subr.bf16.mxu1 %v1316_v63  ;;  %v1076_v61 = vld [vmem:[%s5964_s1 + $0x3e8] sm:$0xff]  ;;  %v926_v63 = vpack.c.bf16 %v796_v41, %v786_v40  ;;  %v1386_v9 = vpack.c.bf16 %v1206_v56, %v1204_v55  ;;  %v936_v40 = vpack.c.bf16 %v816_v27, %v806_v26  ;;  %v541_v41 = vld [vmem:[%s3746_s19 + $0x610] sm:$0xff]  ;;  %v354_v3 = vld [vmem:[%s3746_s19 + $0x38] sm:$0xff] }
  0xaa   : > { %1826 = vmatmul.mubr.bf16.gmra.mrb[24].mxu0 %v905_v5  ;;  %1549 = vmatprep.mubr.bf16.mxu1 %v912_v6  ;;  %v1383_v5 = vpack.c.bf16 %v1201_v49, %v1199_v48  ;;  %v781_v6 = vmul.f32 %v4179_v22, %v507_v42  ;;  %v925_v35 = vpack.c.bf16 %v795_v20, %v785_v15  ;;  %v548_v42 = vld [vmem:[%s3746_s19 + $0x648] sm:$0xff]  ;;  %v349_v15 = vld [vmem:[%s3746_s19 + $0x10] sm:$0xff]  ;;  %v374_v26 = vld [vmem:[%s3746_s19 + $0xd8] sm:$0xff] }
  0xab   : > { %1835 = vmatprep.mubr.bf16.mxu0 %v916_v12  ;;  %1901 = vmatpush1.bf16.msra.mxu0 %v1379_v16  ;;  %v1205_v12 = vld [vmem:[%s5964_s1 + $0x7f0] sm:$0xff]  ;;  %v1322_v16 = vpack.c.bf16 %v1078_v62, %v1076_v61  ;;  %v805_v48 = vmul.f32 %v4188_v30, %v531_v39  ;;  %v815_v49 = vmul.f32 %v4188_v30, %v541_v41  ;;  %v364_v4 = vld [vmem:[%s3746_s19 + $0x88] sm:$0xff] }
  0xac   : > { %1615 = vmatpush1.bf16.msra.mxu1 %v1315_v18  ;;  %1902 = vmatprep.subr.bf16.mxu0 %v1382_v19  ;;  %v1208_v18 = vld [vmem:[%s5964_s1 + $0x808] sm:$0xff]  ;;  %v1210_v19 = vld [vmem:[%s5964_s1 + $0x818] sm:$0xff]  ;;  %v921_v34 = vpack.c.bf16 %v791_v14, %v781_v6  ;;  %v822_v50 = vmul.f32 %v4067_v28, %v548_v42  ;;  %v561_v62 = vld [vmem:[%s3746_s19 + $0x6b0] sm:$0xff]  ;;  %v623_v21 = vmul.f32 %v4144_v7, %v349_v15 }
  0xad   : > { %1616 = vmatprep.subr.bf16.mxu1 %v1318_v29  ;;  %v1385_v29 = vpack.c.bf16 %v1205_v12, %v1203_v10  ;;  %v1388_v33 = vpack.c.bf16 %v1210_v19, %v1208_v18  ;;  %v935_v55 = vpack.c.bf16 %v815_v49, %v805_v48  ;;  %v835_v6 = vmul.f32 %v4188_v30, %v561_v62  ;;  %v353_v18 = vld [vmem:[%s3746_s19 + $0x30] sm:$0xff]  ;;  %v363_v19 = vld [vmem:[%s3746_s19 + $0x80] sm:$0xff]  ;;  %v380_v20 = vld [vmem:[%s3746_s19 + $0x108] sm:$0xff] }
  0xae   : > { %v628_v10 = vmul.f32 %v4133_v1, %v354_v3  ;;  %v384_v27 = vld [vmem:[%s3746_s19 + $0x128] sm:$0xff]  ;;  %v369_v42 = vld [vmem:[%s3746_s19 + $0xb0] sm:$0xff]  ;;  %v1211_v48 = vld [vmem:[%s5964_s1 + $0x820] sm:$0xff]  ;;  %v647_v62 = vmul.f32 %v4182_v23, %v373_v44 }
  0xaf   : > { %1903 = vmatpush1.bf16.msra.mxu0 %v1381_v43  ;;  %v558_v43 = vld [vmem:[%s3746_s19 + $0x698] sm:$0xff]  ;;  %v1212_v39 = vld [vmem:[%s5964_s1 + $0x828] sm:$0xff]  ;;  %v1213_v49 = vld [vmem:[%s5964_s1 + $0x830] sm:$0xff] }
  0xb0   : > { %1617 = vmatpush1.bf16.msra.mxu1 %v1317_v46  ;;  %1904 = vmatprep.subr.bf16.mxu0 %v1384_v47  ;;  %v801_v46 = vmul.f32 %v4179_v22, %v527_v38  ;;  %v811_v47 = vmul.f32 %v4179_v22, %v537_v25  ;;  %v648_v38 = vmul.f32 %v4133_v1, %v374_v26  ;;  %v399_v15 = vld [vmem:[%s3746_s19 + $0x1a0] sm:$0xff]  ;;  %v1221_v26 = vld [vmem:[%s5964_s1 + $0x870] sm:$0xff] }
  0xb1   : > { %1550 = vmatmul.mubr.bf16.gmra.mrb[28].mxu1 %v911_v51  ;;  %1618 = vmatprep.subr.bf16.mxu1 %v1320_v53  ;;  %v832_v51 = vmul.f32 %v4067_v28, %v558_v43  ;;  %v836_v53 = vmul.f32 %v4072_v31, %v562_v45  ;;  %v825_v31 = vmul.f32 %v4188_v30, %v551_v59  ;;  %v370_v30 = vld [vmem:[%s3746_s19 + $0xb8] sm:$0xff]  ;;  %v379_v43 = vld [vmem:[%s3746_s19 + $0x100] sm:$0xff] }
  0xb2   : > { %1836 = vmatmul.mubr.bf16.gmra.mrb[28].mxu0 %v915_v57  ;;  %1559 = vmatprep.mubr.bf16.mxu1 %v922_v58  ;;  %v931_v54 = vpack.c.bf16 %v811_v47, %v801_v46  ;;  %v547_v57 = vld [vmem:[%s3746_s19 + $0x640] sm:$0xff]  ;;  %v557_v58 = vld [vmem:[%s3746_s19 + $0x690] sm:$0xff]  ;;  %v658_v25 = vmul.f32 %v4133_v1, %v384_v27  ;;  %v643_v59 = vmul.f32 %v4144_v7, %v369_v42  ;;  %v414_v27 = vld [vmem:[%s3746_s19 + $0x218] sm:$0xff] }
  0xb3   : > { %1845 = vmatprep.mubr.bf16.mxu0 %v926_v63  ;;  %1905 = vmatpush1.bf16.msra.mxu0 %v1383_v5  ;;  %v942_v56 = vpack.c.bf16 %v832_v51, %v822_v50  ;;  %v946_v61 = vpack.c.bf16 %v836_v53, %v826_v52  ;;  %v350_v63 = vld [vmem:[%s3746_s19 + $0x18] sm:$0xff]  ;;  %v821_v28 = vmul.f32 %v4179_v22, %v547_v57  ;;  %v383_v47 = vld [vmem:[%s3746_s19 + $0x120] sm:$0xff]  ;;  %v1216_v51 = vld [vmem:[%s5964_s1 + $0x848] sm:$0xff] }
  0xb4   : > { %1619 = vmatpush1.bf16.msra.mxu1 %v1319_v8  ;;  %1906 = vmatprep.subr.bf16.mxu0 %v1386_v9  ;;  %v831_v5 = vmul.f32 %v4179_v22, %v557_v58  ;;  %v624_v8 = vmul.f32 %v4084_v37, %v350_v63  ;;  %v634_v9 = vmul.f32 %v4084_v37, %v360_v2  ;;  %v390_v52 = vld [vmem:[%s3746_s19 + $0x158] sm:$0xff]  ;;  %v400_v53 = vld [vmem:[%s3746_s19 + $0x1a8] sm:$0xff]  ;;  %v1223_v44 = vld [vmem:[%s5964_s1 + $0x880] sm:$0xff] }
  0xb5   : > { %1620 = vmatprep.subr.bf16.mxu1 %v1322_v16  ;;  %v638_v22 = vmul.f32 %v4133_v1, %v364_v4  ;;  %v945_v13 = vpack.c.bf16 %v835_v6, %v825_v31  ;;  %v359_v16 = vld [vmem:[%s3746_s19 + $0x60] sm:$0xff]  ;;  %v394_v57 = vld [vmem:[%s3746_s19 + $0x178] sm:$0xff]  ;;  %v404_v58 = vld [vmem:[%s3746_s19 + $0x1c8] sm:$0xff]  ;;  %v657_v63 = vmul.f32 %v4182_v23, %v383_v47  ;;  %v1389_v2 = vpack.c.bf16 %v1213_v49, %v1211_v48 }
  0xb6   : > { %v941_v12 = vpack.c.bf16 %v831_v5, %v821_v28  ;;  %v844_v14 = vpack.c.bf16 %v634_v9, %v624_v8  ;;  %v633_v24 = vmul.f32 %v4144_v7, %v359_v16  ;;  %v664_v3 = vmul.f32 %v4084_v37, %v390_v52  ;;  %v1215_v6 = vld [vmem:[%s5964_s1 + $0x840] sm:$0xff]  ;;  %v1217_v8 = vld [vmem:[%s5964_s1 + $0x850] sm:$0xff]  ;;  %v1228_v48 = vld [vmem:[%s5964_s1 + $0x8a8] sm:$0xff] }
  0xb7   : > { %1907 = vmatpush1.bf16.msra.mxu0 %v1385_v29  ;;  %v848_v17 = vpack.c.bf16 %v638_v22, %v628_v10  ;;  %v627_v29 = vmul.f32 %v4182_v23, %v353_v18  ;;  %v674_v4 = vmul.f32 %v4084_v37, %v400_v53  ;;  %v668_v5 = vmul.f32 %v4133_v1, %v394_v57  ;;  %v389_v10 = vld [vmem:[%s3746_s19 + $0x150] sm:$0xff]  ;;  %v1220_v22 = vld [vmem:[%s5964_s1 + $0x868] sm:$0xff]  ;;  %v1230_v49 = vld [vmem:[%s5964_s1 + $0x8b8] sm:$0xff] }
  0xb8   : > { %1621 = vmatpush1.bf16.msra.mxu1 %v1321_v32  ;;  %2019 = vmatprep.subr.bf16.mxu0 %v1388_v33  ;;  %v637_v32 = vmul.f32 %v4182_v23, %v363_v19  ;;  %v843_v41 = vpack.c.bf16 %v633_v24, %v623_v21  ;;  %v678_v31 = vmul.f32 %v4133_v1, %v404_v58  ;;  %v393_v16 = vld [vmem:[%s3746_s19 + $0x170] sm:$0xff]  ;;  %v420_v21 = vld [vmem:[%s3746_s19 + $0x248] sm:$0xff]  ;;  %v419_v52 = vld [vmem:[%s3746_s19 + $0x240] sm:$0xff] }
  0xb9   : > { %1560 = vmatmul.mubr.bf16.gmra.mrb[32].mxu1 %v921_v34  ;;  %3264 = vmatprep.subr.bf16.mxu1 %v1388_v33  ;;  %v1207_v33 = vld [vmem:[%s5964_s1 + $0x800] sm:$0xff]  ;;  %v1209_v34 = vld [vmem:[%s5964_s1 + $0x810] sm:$0xff]  ;;  %v1391_v19 = vpack.c.bf16 %v1217_v8, %v1215_v6  ;;  %v430_v57 = vld [vmem:[%s3746_s19 + $0x298] sm:$0xff] }
  0xba   : > { %1846 = vmatmul.mubr.bf16.gmra.mrb[32].mxu0 %v925_v35  ;;  %1569 = vmatprep.mubr.bf16.mxu1 %v932_v36  ;;  %v644_v35 = vmul.f32 %v4084_v37, %v370_v30  ;;  %v654_v36 = vmul.f32 %v4084_v37, %v380_v20  ;;  %v847_v45 = vpack.c.bf16 %v637_v32, %v627_v29  ;;  %v1219_v30 = vld [vmem:[%s5964_s1 + $0x860] sm:$0xff]  ;;  %v410_v20 = vld [vmem:[%s3746_s19 + $0x1f8] sm:$0xff]  ;;  %v424_v29 = vld [vmem:[%s3746_s19 + $0x268] sm:$0xff] }
  0xbb   : > { %1855 = vmatprep.mubr.bf16.mxu0 %v936_v40  ;;  %v1214_v40 = vld [vmem:[%s5964_s1 + $0x838] sm:$0xff]  ;;  %v1387_v46 = vpack.c.bf16 %v1209_v34, %v1207_v33  ;;  %v868_v18 = vpack.c.bf16 %v678_v31, %v668_v5  ;;  %v663_v32 = vmul.f32 %v4144_v7, %v389_v10  ;;  %v673_v33 = vmul.f32 %v4144_v7, %v399_v15  ;;  %v409_v47 = vld [vmem:[%s3746_s19 + $0x1f0] sm:$0xff]  ;;  %v440_v58 = vld [vmem:[%s3746_s19 + $0x2e8] sm:$0xff] }
  0xbc   : > { %v854_v50 = vpack.c.bf16 %v654_v36, %v644_v35  ;;  %v667_v34 = vmul.f32 %v4182_v23, %v393_v16  ;;  %v1224_v35 = vld [vmem:[%s5964_s1 + $0x888] sm:$0xff]  ;;  %v1226_v36 = vld [vmem:[%s5964_s1 + $0x898] sm:$0xff]  ;;  %v698_v42 = vmul.f32 %v4133_v1, %v424_v29  ;;  %v413_v53 = vld [vmem:[%s3746_s19 + $0x210] sm:$0xff]  ;;  %v704_v8 = vmul.f32 %v4084_v37, %v430_v57 }
  0xbd   : > { %v1232_v5 = vld [vmem:[%s5964_s1 + $0x8c8] sm:$0xff]  ;;  %v1234_v31 = vld [vmem:[%s5964_s1 + $0x8d8] sm:$0xff]  ;;  %v1233_v15 = vld [vmem:[%s5964_s1 + $0x8d0] sm:$0xff] }
  0xbe   : > { %v450_v29 = vld [vmem:[%s3746_s19 + $0x338] sm:$0xff] }
  0xc1   : > { %1570 = vmatmul.mubr.bf16.gmra.mrb[36].mxu1 %v931_v54  ;;  %v858_v54 = vpack.c.bf16 %v658_v25, %v648_v38  ;;  %v684_v25 = vmul.f32 %v4084_v37, %v410_v20 }
  0xc2   : > { %1856 = vmatmul.mubr.bf16.gmra.mrb[36].mxu0 %v935_v55  ;;  %1579 = vmatprep.mubr.bf16.mxu1 %v942_v56  ;;  %v1390_v55 = vpack.c.bf16 %v1214_v40, %v1212_v39  ;;  %v1218_v56 = vld [vmem:[%s5964_s1 + $0x858] sm:$0xff]  ;;  %v694_v39 = vmul.f32 %v4084_v37, %v420_v21  ;;  %v1393_v40 = vpack.c.bf16 %v1221_v26, %v1219_v30  ;;  %v439_v21 = vld [vmem:[%s3746_s19 + $0x2e0] sm:$0xff] }
  0xc3   : > { %1865 = vmatprep.mubr.bf16.mxu0 %v946_v61  ;;  %v653_v61 = vmul.f32 %v4144_v7, %v379_v43  ;;  %v1392_v28 = vpack.c.bf16 %v1218_v56, %v1216_v51  ;;  %v1396_v43 = vpack.c.bf16 %v1226_v36, %v1224_v35  ;;  %v443_v26 = vld [vmem:[%s3746_s19 + $0x300] sm:$0xff]  ;;  %v464_v35 = vld [vmem:[%s3746_s19 + $0x3a8] sm:$0xff] }
  0xc4   : > { %v874_v51 = vpack.c.bf16 %v694_v39, %v684_v25  ;;  %v1237_v25 = vld [vmem:[%s5964_s1 + $0x8f0] sm:$0xff] }
  0xc5   : > { %v853_v9 = vpack.c.bf16 %v653_v61, %v643_v59  ;;  %v434_v59 = vld [vmem:[%s3746_s19 + $0x2b8] sm:$0xff]  ;;  %v444_v61 = vld [vmem:[%s3746_s19 + $0x308] sm:$0xff] }
  0xc6   : > { %v708_v10 = vmul.f32 %v4133_v1, %v434_v59  ;;  %v459_v59 = vld [vmem:[%s3746_s19 + $0x380] sm:$0xff] }
  0xc9   : > { %1580 = vmatmul.mubr.bf16.gmra.mrb[40].mxu1 %v941_v12  ;;  %v1222_v12 = vld [vmem:[%s5964_s1 + $0x878] sm:$0xff] }
  0xca   : > { %1866 = vmatmul.mubr.bf16.gmra.mrb[40].mxu0 %v945_v13  ;;  %1622 = vmatprep.mubr.bf16.mxu1 %v844_v14  ;;  %v857_v13 = vpack.c.bf16 %v657_v63, %v647_v62  ;;  %v864_v14 = vpack.c.bf16 %v674_v4, %v664_v3  ;;  %v1394_v24 = vpack.c.bf16 %v1222_v12, %v1220_v22  ;;  %v1227_v63 = vld [vmem:[%s5964_s1 + $0x8a0] sm:$0xff] }
  0xcb   : > { %1908 = vmatprep.mubr.bf16.mxu0 %v848_v17  ;;  %v403_v17 = vld [vmem:[%s3746_s19 + $0x1c0] sm:$0xff]  ;;  %v1398_v62 = vpack.c.bf16 %v1230_v49, %v1228_v48  ;;  %v683_v3 = vmul.f32 %v4144_v7, %v409_v47  ;;  %v693_v4 = vmul.f32 %v4144_v7, %v419_v52  ;;  %v718_v22 = vmul.f32 %v4133_v1, %v444_v61  ;;  %v1241_v52 = vld [vmem:[%s5964_s1 + $0x910] sm:$0xff] }
  0xcc   : > { %v677_v38 = vmul.f32 %v4182_v23, %v403_v17  ;;  %v429_v17 = vld [vmem:[%s3746_s19 + $0x290] sm:$0xff]  ;;  %v738_v48 = vmul.f32 %v4133_v1, %v464_v35 }
  0xcd   : > { %v873_v16 = vpack.c.bf16 %v693_v4, %v683_v3  ;;  %v703_v39 = vmul.f32 %v4144_v7, %v429_v17  ;;  %v453_v61 = vld [vmem:[%s3746_s19 + $0x350] sm:$0xff]  ;;  %v480_v3 = vld [vmem:[%s3746_s19 + $0x428] sm:$0xff]  ;;  %v474_v4 = vld [vmem:[%s3746_s19 + $0x3f8] sm:$0xff] }
  0xce   : > { %v748_v17 = vmul.f32 %v4133_v1, %v474_v4  ;;  %v473_v35 = vld [vmem:[%s3746_s19 + $0x3f0] sm:$0xff] }
  0xcf   : > { %v493_v4 = vld [vmem:[%s3746_s19 + $0x490] sm:$0xff] }
  0xd1   : > { %1623 = vmatmul.mubr.bf16.vlgmr.msra.gmra.mrb[0].mxu1 %v843_v41  ;;  %v688_v41 = vmul.f32 %v4133_v1, %v414_v27  ;;  %v888_v27 = vpack.c.bf16 %v718_v22, %v708_v10  ;;  %v733_v10 = vmul.f32 %v4144_v7, %v459_v59  ;;  %v727_v22 = vmul.f32 %v4182_v23, %v453_v61  ;;  %v1257_v59 = vld [vmem:[%s5964_s1 + $0x990] sm:$0xff] }
  0xd2   : > { %1909 = vmatmul.mubr.bf16.vlgmr.msra.gmra.mrb[0].mxu0 %v847_v45  ;;  %3277 = vmatpush1.bf16.msra.mxu1 %v1387_v46  ;;  %v1225_v45 = vld [vmem:[%s5964_s1 + $0x890] sm:$0xff] }
  0xd3   : > { %2020 = vmatpush1.bf16.msra.mxu0 %v1387_v46  ;;  %1632 = vmatprep.mubr.bf16.mxu1 %v854_v50  ;;  %v863_v46 = vpack.c.bf16 %v673_v33, %v663_v32  ;;  %v867_v50 = vpack.c.bf16 %v677_v38, %v667_v34  ;;  %v1395_v56 = vpack.c.bf16 %v1225_v45, %v1223_v44  ;;  %v460_v32 = vld [vmem:[%s3746_s19 + $0x388] sm:$0xff]  ;;  %v454_v33 = vld [vmem:[%s3746_s19 + $0x358] sm:$0xff]  ;;  %v1235_v38 = vld [vmem:[%s5964_s1 + $0x8e0] sm:$0xff] }
  0xd4   : > { %1918 = vmatprep.mubr.bf16.mxu0 %v858_v54  ;;  %2021 = vmatprep.subr.bf16.mxu0 %v1390_v55  ;;  %v423_v54 = vld [vmem:[%s3746_s19 + $0x260] sm:$0xff]  ;;  %v717_v44 = vmul.f32 %v4182_v23, %v443_v26  ;;  %v724_v45 = vmul.f32 %v4084_v37, %v450_v29  ;;  %v728_v47 = vmul.f32 %v4133_v1, %v454_v33  ;;  %v469_v26 = vld [vmem:[%s3746_s19 + $0x3d0] sm:$0xff]  ;;  %v1254_v29 = vld [vmem:[%s5964_s1 + $0x978] sm:$0xff] }
  0xd5   : > { %3265 = vmatprep.subr.bf16.mxu1 %v1390_v55  ;;  %v878_v55 = vpack.c.bf16 %v698_v42, %v688_v41  ;;  %v697_v6 = vmul.f32 %v4182_v23, %v423_v54  ;;  %v1240_v42 = vld [vmem:[%s5964_s1 + $0x908] sm:$0xff]  ;;  %v1401_v49 = vpack.c.bf16 %v1237_v25, %v1235_v38  ;;  %v449_v54 = vld [vmem:[%s3746_s19 + $0x330] sm:$0xff]  ;;  %v490_v25 = vld [vmem:[%s3746_s19 + $0x478] sm:$0xff] }
  0xd6   : > { %3278 = vmatpush1.bf16.msra.mxu1 %v1389_v2 }
  0xd7   : > { %2022 = vmatpush1.bf16.msra.mxu0 %v1389_v2  ;;  %3266 = vmatprep.subr.bf16.mxu1 %v1392_v28  ;;  %v1229_v2 = vld [vmem:[%s5964_s1 + $0x8b0] sm:$0xff] }
  0xd8   : > { %2023 = vmatprep.subr.bf16.mxu0 %v1392_v28  ;;  %v687_v28 = vmul.f32 %v4182_v23, %v413_v53  ;;  %v1397_v12 = vpack.c.bf16 %v1229_v2, %v1227_v63  ;;  %v898_v63 = vpack.c.bf16 %v738_v48, %v728_v47  ;;  %v470_v2 = vld [vmem:[%s3746_s19 + $0x3d8] sm:$0xff]  ;;  %v747_v48 = vmul.f32 %v4182_v23, %v473_v35  ;;  %v544_v35 = vld [vmem:[%s3746_s19 + $0x628] sm:$0xff] }
  0xd9   : > { %1633 = vmatmul.mubr.bf16.gmra.mrb[4].mxu1 %v853_v9  ;;  %v714_v9 = vmul.f32 %v4084_v37, %v440_v58 }
  0xda   : > { %1919 = vmatmul.mubr.bf16.gmra.mrb[4].mxu0 %v857_v13  ;;  %1642 = vmatprep.mubr.bf16.mxu1 %v864_v14  ;;  %v1400_v13 = vpack.c.bf16 %v1234_v31, %v1232_v5  ;;  %v1231_v14 = vld [vmem:[%s5964_s1 + $0x8c0] sm:$0xff]  ;;  %v877_v30 = vpack.c.bf16 %v697_v6, %v687_v28  ;;  %v484_v5 = vld [vmem:[%s3746_s19 + $0x448] sm:$0xff] }
  0xdb   : > { %1928 = vmatprep.mubr.bf16.mxu0 %v868_v18  ;;  %2024 = vmatpush1.bf16.msra.mxu0 %v1391_v19  ;;  %v1236_v18 = vld [vmem:[%s5964_s1 + $0x8e8] sm:$0xff]  ;;  %v884_v20 = vpack.c.bf16 %v714_v9, %v704_v8  ;;  %v1399_v34 = vpack.c.bf16 %v1233_v15, %v1231_v14  ;;  %v1243_v6 = vld [vmem:[%s5964_s1 + $0x920] sm:$0xff]  ;;  %v1245_v8 = vld [vmem:[%s5964_s1 + $0x930] sm:$0xff]  ;;  %v723_v9 = vmul.f32 %v4144_v7, %v449_v54 }
  0xdc   : > { %3279 = vmatpush1.bf16.msra.mxu1 %v1391_v19  ;;  %2025 = vmatprep.subr.bf16.mxu0 %v1394_v24  ;;  %v1238_v19 = vld [vmem:[%s5964_s1 + $0x8f8] sm:$0xff]  ;;  %v744_v15 = vmul.f32 %v4084_v37, %v470_v2  ;;  %v489_v2 = vld [vmem:[%s3746_s19 + $0x470] sm:$0xff] }
  0xdd   : > { %3267 = vmatprep.subr.bf16.mxu1 %v1394_v24  ;;  %v433_v24 = vld [vmem:[%s3746_s19 + $0x2b0] sm:$0xff]  ;;  %v1402_v36 = vpack.c.bf16 %v1238_v19, %v1236_v18  ;;  %v758_v18 = vmul.f32 %v4133_v1, %v484_v5  ;;  %v1405_v19 = vpack.c.bf16 %v1245_v8, %v1243_v6  ;;  %v503_v5 = vld [vmem:[%s3746_s19 + $0x4e0] sm:$0xff]  ;;  %v520_v6 = vld [vmem:[%s3746_s19 + $0x568] sm:$0xff] }
  0xde   : > { %v707_v41 = vmul.f32 %v4182_v23, %v433_v24  ;;  %v893_v24 = vpack.c.bf16 %v733_v10, %v723_v9  ;;  %v514_v9 = vld [vmem:[%s3746_s19 + $0x538] sm:$0xff]  ;;  %v524_v10 = vld [vmem:[%s3746_s19 + $0x588] sm:$0xff] }
  0xdf   : > { %2026 = vmatpush1.bf16.msra.mxu0 %v1393_v40  ;;  %v908_v38 = vpack.c.bf16 %v758_v18, %v748_v17  ;;  %v788_v17 = vmul.f32 %v4133_v1, %v514_v9  ;;  %v798_v18 = vmul.f32 %v4133_v1, %v524_v10  ;;  %v563_v10 = vld [vmem:[%s3746_s19 + $0x6c0] sm:$0xff] }
  0xe0   : > { %3280 = vmatpush1.bf16.msra.mxu1 %v1393_v40  ;;  %2027 = vmatprep.subr.bf16.mxu0 %v1396_v43  ;;  %v713_v40 = vmul.f32 %v4144_v7, %v439_v21  ;;  %v887_v57 = vpack.c.bf16 %v717_v44, %v707_v41  ;;  %v1249_v21 = vld [vmem:[%s5964_s1 + $0x950] sm:$0xff]  ;;  %v1251_v44 = vld [vmem:[%s5964_s1 + $0x960] sm:$0xff] }
  0xe1   : > { %1643 = vmatmul.mubr.bf16.gmra.mrb[8].mxu1 %v863_v46  ;;  %3268 = vmatprep.subr.bf16.mxu1 %v1396_v43  ;;  %v1242_v43 = vld [vmem:[%s5964_s1 + $0x918] sm:$0xff]  ;;  %v734_v46 = vmul.f32 %v4084_v37, %v460_v32 }
  0xe2   : > { %1929 = vmatmul.mubr.bf16.gmra.mrb[8].mxu0 %v867_v50  ;;  %1652 = vmatprep.mubr.bf16.mxu1 %v874_v51  ;;  %v1404_v50 = vpack.c.bf16 %v1242_v43, %v1240_v42  ;;  %v1239_v51 = vld [vmem:[%s5964_s1 + $0x900] sm:$0xff]  ;;  %v883_v53 = vpack.c.bf16 %v713_v40, %v703_v39  ;;  %v500_v39 = vld [vmem:[%s3746_s19 + $0x4c8] sm:$0xff]  ;;  %v494_v40 = vld [vmem:[%s3746_s19 + $0x498] sm:$0xff] }
  0xe3   : > { %1938 = vmatprep.mubr.bf16.mxu0 %v878_v55  ;;  %2028 = vmatpush1.bf16.msra.mxu0 %v1395_v56  ;;  %v1244_v55 = vld [vmem:[%s5964_s1 + $0x928] sm:$0xff]  ;;  %v894_v58 = vpack.c.bf16 %v734_v46, %v724_v45  ;;  %v1403_v28 = vpack.c.bf16 %v1241_v52, %v1239_v51  ;;  %v1253_v45 = vld [vmem:[%s5964_s1 + $0x970] sm:$0xff]  ;;  %v743_v46 = vmul.f32 %v4144_v7, %v469_v26 }
  0xe4   : > { %3281 = vmatpush1.bf16.msra.mxu1 %v1395_v56  ;;  %2029 = vmatprep.subr.bf16.mxu0 %v1398_v62  ;;  %v1246_v56 = vld [vmem:[%s5964_s1 + $0x938] sm:$0xff]  ;;  %v504_v42 = vld [vmem:[%s3746_s19 + $0x4e8] sm:$0xff]  ;;  %v764_v52 = vmul.f32 %v4084_v37, %v490_v25  ;;  %v768_v54 = vmul.f32 %v4133_v1, %v494_v40  ;;  %v513_v26 = vld [vmem:[%s3746_s19 + $0x530] sm:$0xff] }
  0xe5   : > { %3269 = vmatprep.subr.bf16.mxu1 %v1398_v62  ;;  %v463_v62 = vld [vmem:[%s3746_s19 + $0x3a0] sm:$0xff]  ;;  %v1406_v31 = vpack.c.bf16 %v1246_v56, %v1244_v55  ;;  %v778_v55 = vmul.f32 %v4133_v1, %v504_v42  ;;  %v1409_v56 = vpack.c.bf16 %v1253_v45, %v1251_v44  ;;  %v787_v25 = vmul.f32 %v4182_v23, %v513_v26 }
  0xe6   : > { %v737_v14 = vmul.f32 %v4182_v23, %v463_v62  ;;  %v475_v26 = vld [vmem:[%s3746_s19 + $0x400] sm:$0xff] }
  0xe7   : > { %2030 = vmatpush1.bf16.msra.mxu0 %v1397_v12 }
  0xe8   : > { %3282 = vmatpush1.bf16.msra.mxu1 %v1397_v12  ;;  %2031 = vmatprep.subr.bf16.mxu0 %v1400_v13  ;;  %v1248_v12 = vld [vmem:[%s5964_s1 + $0x948] sm:$0xff]  ;;  %v897_v32 = vpack.c.bf16 %v737_v14, %v727_v22  ;;  %v763_v22 = vmul.f32 %v4144_v7, %v489_v2  ;;  %v777_v14 = vmul.f32 %v4182_v23, %v503_v5 }
  0xe9   : > { %1653 = vmatmul.mubr.bf16.gmra.mrb[12].mxu1 %v873_v16  ;;  %3270 = vmatprep.subr.bf16.mxu1 %v1400_v13  ;;  %v1250_v13 = vld [vmem:[%s5964_s1 + $0x958] sm:$0xff]  ;;  %v754_v16 = vmul.f32 %v4084_v37, %v480_v3  ;;  %v499_v3 = vld [vmem:[%s3746_s19 + $0x4c0] sm:$0xff] }
  0xea   : > { %1939 = vmatmul.mubr.bf16.gmra.mrb[12].mxu0 %v877_v30  ;;  %1662 = vmatprep.mubr.bf16.mxu1 %v884_v20  ;;  %v1408_v30 = vpack.c.bf16 %v1250_v13, %v1248_v12  ;;  %v1247_v20 = vld [vmem:[%s5964_s1 + $0x940] sm:$0xff]  ;;  %v773_v12 = vmul.f32 %v4144_v7, %v499_v3  ;;  %v767_v13 = vmul.f32 %v4182_v23, %v493_v4 }
  0xeb   : > { %1948 = vmatprep.mubr.bf16.mxu0 %v888_v27  ;;  %2032 = vmatpush1.bf16.msra.mxu0 %v1399_v34  ;;  %v1252_v27 = vld [vmem:[%s5964_s1 + $0x968] sm:$0xff]  ;;  %v904_v33 = vpack.c.bf16 %v754_v16, %v744_v15  ;;  %v1407_v41 = vpack.c.bf16 %v1249_v21, %v1247_v20  ;;  %v794_v16 = vmul.f32 %v4084_v37, %v520_v6  ;;  %v509_v21 = vld [vmem:[%s3746_s19 + $0x510] sm:$0xff] }
  0xec   : > { %3283 = vmatpush1.bf16.msra.mxu1 %v1399_v34  ;;  %2033 = vmatprep.subr.bf16.mxu0 %v1402_v36  ;;  %v479_v34 = vld [vmem:[%s3746_s19 + $0x420] sm:$0xff]  ;;  %v1410_v43 = vpack.c.bf16 %v1254_v29, %v1252_v27  ;;  %v928_v27 = vpack.c.bf16 %v798_v18, %v788_v17  ;;  %v549_v6 = vld [vmem:[%s3746_s19 + $0x650] sm:$0xff] }
  0xed   : > { %3271 = vmatprep.subr.bf16.mxu1 %v1402_v36  ;;  %v483_v36 = vld [vmem:[%s3746_s19 + $0x440] sm:$0xff]  ;;  %v753_v47 = vmul.f32 %v4144_v7, %v479_v34  ;;  %v534_v34 = vld [vmem:[%s3746_s19 + $0x5d8] sm:$0xff] }
  0xee   : > { %v757_v51 = vmul.f32 %v4182_v23, %v483_v36  ;;  %v523_v29 = vld [vmem:[%s3746_s19 + $0x580] sm:$0xff]  ;;  %v783_v36 = vmul.f32 %v4144_v7, %v509_v21  ;;  %v808_v42 = vmul.f32 %v4133_v1, %v534_v34  ;;  %v506_v34 = vld [vmem:[%s3746_s19 + $0x4f8] sm:$0xff] }
  0xef   : > { %2034 = vmatpush1.bf16.msra.mxu0 %v1401_v49  ;;  %v903_v61 = vpack.c.bf16 %v753_v47, %v743_v46  ;;  %v529_v47 = vld [vmem:[%s3746_s19 + $0x5b0] sm:$0xff] }
  0xf0   : > { %3284 = vmatpush1.bf16.msra.mxu1 %v1401_v49  ;;  %2035 = vmatprep.subr.bf16.mxu0 %v1404_v50  ;;  %v1256_v49 = vld [vmem:[%s5964_s1 + $0x988] sm:$0xff]  ;;  %v907_v62 = vpack.c.bf16 %v757_v51, %v747_v48  ;;  %v539_v48 = vld [vmem:[%s3746_s19 + $0x600] sm:$0xff] }
  0xf1   : > { %1663 = vmatmul.mubr.bf16.gmra.mrb[16].mxu1 %v883_v53  ;;  %3272 = vmatprep.subr.bf16.mxu1 %v1404_v50  ;;  %v1258_v50 = vld [vmem:[%s5964_s1 + $0x998] sm:$0xff]  ;;  %v774_v53 = vmul.f32 %v4084_v37, %v500_v39  ;;  %v797_v39 = vmul.f32 %v4182_v23, %v523_v29  ;;  %v543_v51 = vld [vmem:[%s3746_s19 + $0x620] sm:$0xff] }
  0xf2   : > { %1949 = vmatmul.mubr.bf16.gmra.mrb[16].mxu0 %v887_v57  ;;  %1672 = vmatprep.mubr.bf16.mxu1 %v894_v58  ;;  %v1412_v57 = vpack.c.bf16 %v1258_v50, %v1256_v49  ;;  %v1255_v58 = vld [vmem:[%s5964_s1 + $0x980] sm:$0xff]  ;;  %v533_v49 = vld [vmem:[%s3746_s19 + $0x5d0] sm:$0xff] }
  0xf3   : > { %1958 = vmatprep.mubr.bf16.mxu0 %v898_v63  ;;  %2036 = vmatpush1.bf16.msra.mxu0 %v1403_v28  ;;  %v914_v63 = vpack.c.bf16 %v774_v53, %v764_v52  ;;  %v1411_v8 = vpack.c.bf16 %v1257_v59, %v1255_v58  ;;  %v927_v45 = vpack.c.bf16 %v797_v39, %v787_v25  ;;  %v550_v52 = vld [vmem:[%s3746_s19 + $0x658] sm:$0xff]  ;;  %v560_v53 = vld [vmem:[%s3746_s19 + $0x6a8] sm:$0xff] }
  0xf4   : > { %3285 = vmatpush1.bf16.msra.mxu1 %v1403_v28  ;;  %2037 = vmatprep.subr.bf16.mxu0 %v1406_v31  ;;  %v918_v28 = vpack.c.bf16 %v778_v55, %v768_v54  ;;  %v554_v54 = vld [vmem:[%s3746_s19 + $0x678] sm:$0xff]  ;;  %v564_v55 = vld [vmem:[%s3746_s19 + $0x6c8] sm:$0xff]  ;;  %v807_v58 = vmul.f32 %v4182_v23, %v533_v49  ;;  %v817_v59 = vmul.f32 %v4182_v23, %v543_v51 }
  0xf5   : > { %3273 = vmatprep.subr.bf16.mxu1 %v1406_v31  ;;  %v510_v31 = vld [vmem:[%s3746_s19 + $0x518] sm:$0xff]  ;;  %v828_v2 = vmul.f32 %v4133_v1, %v554_v54  ;;  %v838_v3 = vmul.f32 %v4133_v1, %v564_v55  ;;  %v516_v51 = vld [vmem:[%s3746_s19 + $0x548] sm:$0xff] }
  0xf6   : > { %v784_v15 = vmul.f32 %v4084_v37, %v510_v31  ;;  %v937_v5 = vpack.c.bf16 %v817_v59, %v807_v58  ;;  %v406_v54 = vld [vmem:[%s3746_s19 + $0x1d8] sm:$0xff] }
  0xf7   : > { %2038 = vmatpush1.bf16.msra.mxu0 %v1405_v19  ;;  %v948_v9 = vpack.c.bf16 %v838_v3, %v828_v2 }
  0xf8   : > { %3286 = vmatpush1.bf16.msra.mxu1 %v1405_v19  ;;  %2039 = vmatprep.subr.bf16.mxu0 %v1408_v30  ;;  %v913_v19 = vpack.c.bf16 %v773_v12, %v763_v22  ;;  %v924_v20 = vpack.c.bf16 %v794_v16, %v784_v15  ;;  %v476_v22 = vld [vmem:[%s3746_s19 + $0x408] sm:$0xff]  ;;  %v486_v12 = vld [vmem:[%s3746_s19 + $0x458] sm:$0xff]  ;;  %v837_v16 = vmul.f32 %v4182_v23, %v563_v10 }
  0xf9   : > { %1673 = vmatmul.mubr.bf16.gmra.mrb[20].mxu1 %v893_v24  ;;  %3274 = vmatprep.subr.bf16.mxu1 %v1408_v30  ;;  %v917_v30 = vpack.c.bf16 %v777_v14, %v767_v13  ;;  %v519_v24 = vld [vmem:[%s3746_s19 + $0x560] sm:$0xff]  ;;  %v356_v13 = vld [vmem:[%s3746_s19 + $0x48] sm:$0xff]  ;;  %v366_v14 = vld [vmem:[%s3746_s19 + $0x98] sm:$0xff] }
  0xfa   : > { %1959 = vmatmul.mubr.bf16.gmra.mrb[20].mxu0 %v897_v32  ;;  %1682 = vmatprep.mubr.bf16.mxu1 %v904_v33  ;;  %v530_v32 = vld [vmem:[%s3746_s19 + $0x5b8] sm:$0xff]  ;;  %v540_v33 = vld [vmem:[%s3746_s19 + $0x608] sm:$0xff] }
  0xfb   : > { %1968 = vmatprep.mubr.bf16.mxu0 %v908_v38  ;;  %2040 = vmatpush1.bf16.msra.mxu0 %v1407_v41  ;;  %v793_v38 = vmul.f32 %v4144_v7, %v519_v24  ;;  %v804_v40 = vmul.f32 %v4084_v37, %v530_v32  ;;  %v355_v24 = vld [vmem:[%s3746_s19 + $0x40] sm:$0xff]  ;;  %v365_v32 = vld [vmem:[%s3746_s19 + $0x90] sm:$0xff]  ;;  %v546_v10 = vld [vmem:[%s3746_s19 + $0x638] sm:$0xff] }
  0xfc   : > { %3287 = vmatpush1.bf16.msra.mxu1 %v1407_v41  ;;  %2041 = vmatprep.subr.bf16.mxu0 %v1410_v43  ;;  %v814_v41 = vmul.f32 %v4084_v37, %v540_v33  ;;  %v496_v33 = vld [vmem:[%s3746_s19 + $0x4a8] sm:$0xff] }
  0xfd   : > { %3275 = vmatprep.subr.bf16.mxu1 %v1410_v43  ;;  %v818_v43 = vmul.f32 %v4133_v1, %v544_v35  ;;  %v923_v44 = vpack.c.bf16 %v793_v38, %v783_v36  ;;  %v823_v1 = vmul.f32 %v4144_v7, %v549_v6  ;;  %v376_v35 = vld [vmem:[%s3746_s19 + $0xe8] sm:$0xff]  ;;  %v386_v36 = vld [vmem:[%s3746_s19 + $0x138] sm:$0xff]  ;;  %v525_v6 = vld [vmem:[%s3746_s19 + $0x590] sm:$0xff] }
  0xfe   : > { %v934_v46 = vpack.c.bf16 %v814_v41, %v804_v40 }
  0xff   : > { %2042 = vmatpush1.bf16.msra.mxu0 %v1409_v56  ;;  %v938_v50 = vpack.c.bf16 %v818_v43, %v808_v42 }
 0x100   : > { %3288 = vmatpush1.bf16.msra.mxu1 %v1409_v56  ;;  %2043 = vmatprep.subr.bf16.mxu0 %v1412_v57  ;;  %v803_v56 = vmul.f32 %v4144_v7, %v529_v47  ;;  %v495_v47 = vld [vmem:[%s3746_s19 + $0x4a0] sm:$0xff] }
 0x101   : > { %1683 = vmatmul.mubr.bf16.gmra.mrb[24].mxu1 %v903_v61  ;;  %3276 = vmatprep.subr.bf16.mxu1 %v1412_v57  ;;  %v813_v57 = vmul.f32 %v4144_v7, %v539_v48  ;;  %v824_v61 = vmul.f32 %v4084_v37, %v550_v52  ;;  %v505_v48 = vld [vmem:[%s3746_s19 + $0x4f0] sm:$0xff]  ;;  %v526_v52 = vld [vmem:[%s3746_s19 + $0x598] sm:$0xff] }
 0x102   : > { %1969 = vmatmul.mubr.bf16.gmra.mrb[24].mxu0 %v907_v62  ;;  %1692 = vmatprep.mubr.bf16.mxu1 %v914_v63  ;;  %v834_v62 = vmul.f32 %v4084_v37, %v560_v53  ;;  %v568_v63 = vld [vmem:[%s5963_s0 + $0x8] sm:$0x3]  ;;  %v559_v37 = vld [vmem:[%s3746_s19 + $0x6a0] sm:$0xff] }
 0x103   : > { %1978 = vmatprep.mubr.bf16.mxu0 %v918_v28  ;;  %2044 = vmatpush1.bf16.msra.mxu0 %v1411_v8  ;;  %v933_v4 = vpack.c.bf16 %v813_v57, %v803_v56  ;;  %v5086_v28 = vrot.slane %v568_v63, %v577_v11  ;;  %v833_v15 = vmul.f32 %v4144_v7, %v559_v37  ;;  %v396_v53 = vld [vmem:[%s3746_s19 + $0x188] sm:$0xff] }
 0x104   : > { %3289 = vmatpush1.bf16.msra.mxu1 %v1411_v8  ;;  %v944_v31 = vpack.c.bf16 %v834_v62, %v824_v61  ;;  %v553_v8 = vld [vmem:[%s3746_s19 + $0x670] sm:$0xff] }
 0x105   : > { %v827_v11 = vmul.f32 %v4182_v23, %v553_v8  ;;  %v750_v17 = vmul.f32 %v5086_v28, %v476_v22  ;;  %v760_v18 = vmul.f32 %v5086_v28, %v486_v12  ;;  %v640_v7 = vmul.f32 %v5086_v28, %v366_v14  ;;  %v405_v8 = vld [vmem:[%s3746_s19 + $0x1d0] sm:$0xff]  ;;  %v416_v22 = vld [vmem:[%s3746_s19 + $0x228] sm:$0xff]  ;;  %v426_v12 = vld [vmem:[%s3746_s19 + $0x278] sm:$0xff] }
 0x106   : > { %v770_v39 = vmul.f32 %v5086_v28, %v496_v33  ;;  %v780_v40 = vmul.f32 %v5086_v28, %v506_v34  ;;  %v650_v41 = vmul.f32 %v5086_v28, %v376_v35  ;;  %v660_v42 = vmul.f32 %v5086_v28, %v386_v36  ;;  %v436_v33 = vld [vmem:[%s3746_s19 + $0x2c8] sm:$0xff]  ;;  %v446_v34 = vld [vmem:[%s3746_s19 + $0x318] sm:$0xff] }
 0x107   : > { %v947_v21 = vpack.c.bf16 %v837_v16, %v827_v11  ;;  %v910_v23 = vpack.c.bf16 %v760_v18, %v750_v17  ;;  %v790_v59 = vmul.f32 %v5086_v28, %v516_v51  ;;  %v800_v61 = vmul.f32 %v5086_v28, %v526_v52 }
 0x108   : > { %v860_v49 = vpack.c.bf16 %v660_v42, %v650_v41  ;;  %v670_v62 = vmul.f32 %v5086_v28, %v396_v53  ;;  %v820_v16 = vmul.f32 %v5086_v28, %v546_v10  ;;  %v690_v17 = vmul.f32 %v5086_v28, %v416_v22 }
 0x109   : > { %1693 = vmatmul.mubr.bf16.gmra.mrb[28].mxu1 %v913_v19  ;;  %v630_v19 = vmul.f32 %v5086_v28, %v356_v13  ;;  %v700_v18 = vmul.f32 %v5086_v28, %v426_v12 }
 0x10a   : > { %1979 = vmatmul.mubr.bf16.gmra.mrb[28].mxu0 %v917_v30  ;;  %1702 = vmatprep.mubr.bf16.mxu1 %v924_v20  ;;  %v5106_v30 = vrot.slane %v568_v63, %v573_v0  ;;  %v943_v20 = vpack.c.bf16 %v833_v15, %v823_v1  ;;  %v680_v63 = vmul.f32 %v5086_v28, %v406_v54 }
 0x10b   : > { %1988 = vmatprep.mubr.bf16.mxu0 %v928_v27  ;;  %v485_v27 = vld [vmem:[%s3746_s19 + $0x450] sm:$0xff]  ;;  %v850_v29 = vpack.c.bf16 %v640_v7, %v630_v19 }
 0x10c   : > { %v629_v60 = vmul.f32 %v5106_v30, %v355_v24  ;;  %v749_v0 = vmul.f32 %v5106_v30, %v475_v26  ;;  %v759_v38 = vmul.f32 %v5106_v30, %v485_v27  ;;  %v639_v25 = vmul.f32 %v5106_v30, %v365_v32  ;;  %v545_v24 = vld [vmem:[%s3746_s19 + $0x630] sm:$0xff]  ;;  %v566_v32 = vld [vmem:[%s3746_s19 + $0x6d8] sm:$0xff] }
 0x10d   : > { %v769_v56 = vmul.f32 %v5106_v30, %v495_v47  ;;  %v779_v57 = vmul.f32 %v5106_v30, %v505_v48  ;;  %v870_v37 = vpack.c.bf16 %v680_v63, %v670_v62  ;;  %v799_v1 = vmul.f32 %v5106_v30, %v525_v6  ;;  %v425_v27 = vld [vmem:[%s3746_s19 + $0x270] sm:$0xff]  ;;  %v435_v47 = vld [vmem:[%s3746_s19 + $0x2c0] sm:$0xff] }
 0x10e   : > { %v909_v43 = vpack.c.bf16 %v759_v38, %v749_v0  ;;  %v679_v15 = vmul.f32 %v5106_v30, %v405_v8  ;;  %v880_v26 = vpack.c.bf16 %v700_v18, %v690_v17  ;;  %v699_v0 = vmul.f32 %v5106_v30, %v425_v27  ;;  %v445_v48 = vld [vmem:[%s3746_s19 + $0x310] sm:$0xff] }
 0x10f   : > { %v919_v2 = vpack.c.bf16 %v779_v57, %v769_v56  ;;  %v709_v53 = vmul.f32 %v5106_v30, %v435_v47  ;;  %v719_v54 = vmul.f32 %v5106_v30, %v445_v48  ;;  %v465_v62 = vld [vmem:[%s3746_s19 + $0x3b0] sm:$0xff] }
 0x111   : > { %1703 = vmatmul.mubr.bf16.gmra.mrb[32].mxu1 %v923_v44  ;;  %v849_v44 = vpack.c.bf16 %v639_v25, %v629_v60  ;;  %v819_v60 = vmul.f32 %v5106_v30, %v545_v24  ;;  %v840_v25 = vmul.f32 %v5086_v28, %v566_v32 }
 0x112   : > { %1989 = vmatmul.mubr.bf16.gmra.mrb[32].mxu0 %v927_v45  ;;  %1712 = vmatprep.mubr.bf16.mxu1 %v934_v46  ;;  %v920_v45 = vpack.c.bf16 %v780_v40, %v770_v39  ;;  %v375_v46 = vld [vmem:[%s3746_s19 + $0xe0] sm:$0xff]  ;;  %v710_v39 = vmul.f32 %v5086_v28, %v436_v33  ;;  %v720_v40 = vmul.f32 %v5086_v28, %v446_v34 }
 0x113   : > { %1998 = vmatprep.mubr.bf16.mxu0 %v938_v50  ;;  %v385_v50 = vld [vmem:[%s3746_s19 + $0x130] sm:$0xff]  ;;  %v649_v55 = vmul.f32 %v5106_v30, %v375_v46 }
 0x114   : > { %v659_v58 = vmul.f32 %v5106_v30, %v385_v50  ;;  %v890_v46 = vpack.c.bf16 %v720_v40, %v710_v39  ;;  %v466_v50 = vld [vmem:[%s3746_s19 + $0x3b8] sm:$0xff] }
 0x115   : > { %v740_v56 = vmul.f32 %v5086_v28, %v466_v50 }
 0x116   : > { %v859_v3 = vpack.c.bf16 %v659_v58, %v649_v55  ;;  %v889_v58 = vpack.c.bf16 %v719_v54, %v709_v53 }
 0x119   : > { %1713 = vmatmul.mubr.bf16.gmra.mrb[36].mxu1 %v933_v4  ;;  %v930_v4 = vpack.c.bf16 %v800_v61, %v790_v59  ;;  %v455_v61 = vld [vmem:[%s3746_s19 + $0x360] sm:$0xff] }
 0x11a   : > { %1999 = vmatmul.mubr.bf16.gmra.mrb[36].mxu0 %v937_v5  ;;  %1722 = vmatprep.mubr.bf16.mxu1 %v944_v31  ;;  %v395_v5 = vld [vmem:[%s3746_s19 + $0x180] sm:$0xff]  ;;  %v729_v63 = vmul.f32 %v5106_v30, %v455_v61 }
 0x11b   : > { %2008 = vmatprep.mubr.bf16.mxu0 %v948_v9  ;;  %v515_v31 = vld [vmem:[%s3746_s19 + $0x540] sm:$0xff]  ;;  %v536_v9 = vld [vmem:[%s3746_s19 + $0x5e8] sm:$0xff]  ;;  %v669_v13 = vmul.f32 %v5106_v30, %v395_v5 }
 0x11c   : > { %v789_v14 = vmul.f32 %v5106_v30, %v515_v31  ;;  %v810_v11 = vmul.f32 %v5086_v28, %v536_v9 }
 0x11d   : > { %v869_v7 = vpack.c.bf16 %v679_v15, %v669_v13 }
 0x11e   : > { %v929_v19 = vpack.c.bf16 %v799_v1, %v789_v14 }
 0x121   : > { %1723 = vmatmul.mubr.bf16.gmra.mrb[40].mxu1 %v943_v20  ;;  %v940_v20 = vpack.c.bf16 %v820_v16, %v810_v11 }
 0x122   : > { %2009 = vmatmul.mubr.bf16.gmra.mrb[40].mxu0 %v947_v21  ;;  %3255 = vmatprep.mubr.msk.bf16.mxu1 %vm1413_vm0, %v910_v23  ;;  %v415_v21 = vld [vmem:[%s3746_s19 + $0x220] sm:$0xff] }
 0x123   : > { %3249 = vmatprep.mubr.msk.bf16.mxu0 %vm1413_vm0, %v850_v29  ;;  %v535_v23 = vld [vmem:[%s3746_s19 + $0x5e0] sm:$0xff]  ;;  %v556_v29 = vld [vmem:[%s3746_s19 + $0x688] sm:$0xff]  ;;  %v689_v35 = vmul.f32 %v5106_v30, %v415_v21 }
 0x124   : > { %v809_v36 = vmul.f32 %v5106_v30, %v535_v23  ;;  %v830_v38 = vmul.f32 %v5086_v28, %v556_v29 }
 0x125   : > { %v879_v42 = vpack.c.bf16 %v699_v0, %v689_v35 }
 0x126   : > { %v939_v41 = vpack.c.bf16 %v819_v60, %v809_v36 }
 0x129   : > { %2112 = vmatmul.mubr.bf16.vlgmr.msra.gmra.mrb[44].mxu1 %v909_v43  ;;  %v950_v43 = vpack.c.bf16 %v840_v25, %v830_v38 }
 0x12a   : > { %2052 = vmatmul.mubr.bf16.vlgmr.msra.gmra.mrb[0].mxu0 %v849_v44  ;;  %3256 = vmatprep.mubr.msk.bf16.mxu1 %vm1413_vm0, %v920_v45  ;;  %v555_v44 = vld [vmem:[%s3746_s19 + $0x680] sm:$0xff]  ;;  %v565_v45 = vld [vmem:[%s3746_s19 + $0x6d0] sm:$0xff] }
 0x12b   : > { %3250 = vmatprep.mubr.msk.bf16.mxu0 %vm1413_vm0, %v860_v49  ;;  %v456_v49 = vld [vmem:[%s3746_s19 + $0x368] sm:$0xff]  ;;  %v829_v51 = vmul.f32 %v5106_v30, %v555_v44  ;;  %v839_v52 = vmul.f32 %v5106_v30, %v565_v45  ;;  %s320_s19 = smul.u32 22, %s3237_s25 }
 0x12c   : > { %v730_v55 = vmul.f32 %v5086_v28, %v456_v49 }
 0x12d   : > { %v949_v57 = vpack.c.bf16 %v839_v52, %v829_v51  ;;  %p321_p7 = scmp.lt.s32.totalorder %s320_s19, 153 }
 0x12e   : > { %v900_v59 = vpack.c.bf16 %v740_v56, %v730_v55 }
 0x12f   : > { %s6019_s19 = smov (!%p321_p7, %s320_s19), 153 }
 0x130   : > { %s3245_s24 = sshll.u32 %s6019_s19, 3  ;;  %s3262_s13 = sshll.u32 %s6019_s19, 4 }
 0x131   : > { %2122 = vmatmul.mubr.bf16.gmra.mrb[48].mxu1 %v919_v2  ;;  %v739_v2 = vmul.f32 %v5106_v30, %v465_v62  ;;  %s5620_s30 = scalar_lea.vmem %s5967_s4, %s3245_s24  ;;  %s5639_s11 = scalar_lea.vmem %s5968_s5, %s3245_s24 }
 0x132   : > { %2062 = vmatmul.mubr.bf16.gmra.mrb[4].mxu0 %v859_v3  ;;  %3257 = vmatprep.mubr.msk.bf16.mxu1 %vm1413_vm0, %v930_v4  ;;  %s5783_s18 = scalar_lea.vmem %s5966_s3, %s3262_s13  ;;  %s5806_s9 = scalar_lea.vmem %s5969_s6, %s3262_s13 }
 0x133   : > { %3251 = vmatprep.mubr.msk.bf16.mxu0 %vm1413_vm0, %v870_v37  ;;  %v899_v3 = vpack.c.bf16 %v739_v2, %v729_v63 }
 0x139   : > { %2132 = vmatmul.mubr.bf16.gmra.mrb[52].mxu1 %v929_v19 }
 0x13a   : > { %2072 = vmatmul.mubr.bf16.gmra.mrb[8].mxu0 %v869_v7  ;;  %3258 = vmatprep.mubr.msk.bf16.mxu1 %vm1413_vm0, %v940_v20 }
 0x13b   : > { %3252 = vmatprep.mubr.msk.bf16.mxu0 %vm1413_vm0, %v880_v26 }
 0x141   : > { %2142 = vmatmul.mubr.bf16.gmra.mrb[56].mxu1 %v939_v41 }
 0x142   : > { %2082 = vmatmul.mubr.bf16.gmra.mrb[12].mxu0 %v879_v42  ;;  %3259 = vmatprep.mubr.msk.bf16.mxu1 %vm1413_vm0, %v950_v43 }
 0x143   : > { %3253 = vmatprep.mubr.msk.bf16.mxu0 %vm1413_vm0, %v890_v46 }
 0x149   : > { %2152 = vmatmul.mubr.bf16.gmra.mrb[60].mxu1 %v949_v57 }
 0x14a   : > { %2092 = vmatmul.mubr.bf16.gmra.mrb[16].mxu0 %v889_v58 }
 0x14b   : > { %3254 = vmatprep.mubr.msk.bf16.mxu0 %vm1413_vm0, %v900_v59 }
 0x152   : > { %2102 = vmatmul.mubr.bf16.gmra.mrb[20].mxu0 %v899_v3 }
 0x1a4   : > { %v5199_v4 = vpop.f32.mrb[0].mxu1 }
 0x1a5   : > { %v5201_v5 = vpop.f32.mrb[1].mxu1 }
 0x1a6   : > { %v5203_v28 = vpop.f32.mrb[2].mxu1 }
 0x1a7   : > { %v5205_v31 = vpop.f32.mrb[3].mxu1 }
 0x1ac   : > { %v5207_v6 = vpop.f32.mrb[4].mxu1 }
 0x1ad   : > { %v5209_v37 = vpop.f32.mrb[5].mxu1 }
 0x1ae   : > { %v5211_v8 = vpop.f32.mrb[6].mxu1 }
 0x1af   : > { %v5213_v9 = vpop.f32.mrb[7].mxu1 }
 0x1b4   : > { %v5215_v30 = vpop.f32.mrb[8].mxu1 }
 0x1b5   : > { %v5217_v10 = vpop.f32.mrb[9].mxu1 }
 0x1b6   : > { %v5219_v22 = vpop.f32.mrb[10].mxu1 }
 0x1b7   : > { %v5221_v12 = vpop.f32.mrb[11].mxu1 }
 0x1bc   : > { %v5223_v13 = vpop.f32.mrb[12].mxu1 }
 0x1bd   : > { %v5225_v14 = vpop.f32.mrb[13].mxu1 }
 0x1be   : > { %v5227_v1 = vpop.f32.mrb[14].mxu1 }
 0x1bf   : > { %v5229_v15 = vpop.f32.mrb[15].mxu1 }
 0x1c4   : > { %v5231_v11 = vpop.f32.mrb[16].mxu1 }
 0x1c5   : > { %v5233_v16 = vpop.f32.mrb[17].mxu1 }
 0x1c6   : > { %v5235_v17 = vpop.f32.mrb[18].mxu1 }
 0x1c7   : > { %v5237_v18 = vpop.f32.mrb[19].mxu1 }
 0x1cc   : > { %v5239_v19 = vpop.f32.mrb[20].mxu1 }
 0x1cd   : > { %v5241_v7 = vpop.f32.mrb[21].mxu1 }
 0x1ce   : > { %v5243_v20 = vpop.f32.mrb[22].mxu1 }
 0x1cf   : > { %v5245_v21 = vpop.f32.mrb[23].mxu1 }
 0x1d4   : > { %v1684_v23 = vpop.f32.mrb[24].mxu1 }
 0x1d5   : > { %v1970_v24 = vpop.f32.mrb[24].mxu0  ;;  %v1686_v26 = vpop.f32.mrb[25].mxu1 }
 0x1d6   : > { %v3314_v27 = vadd.f32 %v1970_v24, %v1684_v23  ;;  %v1972_v29 = vpop.f32.mrb[25].mxu0  ;;  %v1688_v32 = vpop.f32.mrb[26].mxu1 }
 0x1d7   : > { %v3316_v33 = vadd.f32 %v1972_v29, %v1686_v26  ;;  %v1974_v34 = vpop.f32.mrb[26].mxu0  ;;  %v1690_v35 = vpop.f32.mrb[27].mxu1 }
 0x1d8   : > { %v3318_v36 = vadd.f32 %v1974_v34, %v1688_v32  ;;  %v1976_v60 = vpop.f32.mrb[27].mxu0 }
 0x1d9   : > { %v5247_v0 = vadd.f32 %v1976_v60, %v1690_v35 }
 0x1dc   : > { %v1694_v38 = vpop.f32.mrb[28].mxu1 }
 0x1dd   : > { %v1980_v25 = vpop.f32.mrb[28].mxu0  ;;  %v1696_v39 = vpop.f32.mrb[29].mxu1 }
 0x1de   : > { %v5249_v40 = vadd.f32 %v1980_v25, %v1694_v38  ;;  %v1982_v41 = vpop.f32.mrb[29].mxu0  ;;  %v1698_v42 = vpop.f32.mrb[30].mxu1 }
 0x1df   : > { %v5251_v43 = vadd.f32 %v1982_v41, %v1696_v39  ;;  %v1984_v44 = vpop.f32.mrb[30].mxu0  ;;  %v1700_v45 = vpop.f32.mrb[31].mxu1 }
 0x1e0   : > { %v5253_v46 = vadd.f32 %v1984_v44, %v1698_v42  ;;  %v1986_v47 = vpop.f32.mrb[31].mxu0 }
 0x1e1   : > { %v5255_v48 = vadd.f32 %v1986_v47, %v1700_v45 }
 0x1e4   : > { %v1704_v49 = vpop.f32.mrb[32].mxu1 }
 0x1e5   : > { %v1990_v50 = vpop.f32.mrb[32].mxu0  ;;  %v1706_v51 = vpop.f32.mrb[33].mxu1 }
 0x1e6   : > { %v5257_v52 = vadd.f32 %v1990_v50, %v1704_v49  ;;  %v1992_v53 = vpop.f32.mrb[33].mxu0  ;;  %v1708_v54 = vpop.f32.mrb[34].mxu1 }
 0x1e7   : > { %v5259_v55 = vadd.f32 %v1992_v53, %v1706_v51  ;;  %v1994_v56 = vpop.f32.mrb[34].mxu0  ;;  %v1710_v57 = vpop.f32.mrb[35].mxu1 }
 0x1e8   : > { %v5261_v58 = vadd.f32 %v1994_v56, %v1708_v54  ;;  %v1996_v59 = vpop.f32.mrb[35].mxu0 }
 0x1e9   : > { %v5263_v61 = vadd.f32 %v1996_v59, %v1710_v57 }
 0x1ec   : > { %v1714_v62 = vpop.f32.mrb[36].mxu1 }
 0x1ed   : > { %v2000_v63 = vpop.f32.mrb[36].mxu0  ;;  %v1716_v2 = vpop.f32.mrb[37].mxu1 }
 0x1ee   : > { %v5265_v3 = vadd.f32 %v2000_v63, %v1714_v62  ;;  %v2002_v23 = vpop.f32.mrb[37].mxu0  ;;  %v1718_v24 = vpop.f32.mrb[38].mxu1 }
 0x1ef   : > { %v5267_v26 = vadd.f32 %v2002_v23, %v1716_v2  ;;  %v2004_v29 = vpop.f32.mrb[38].mxu0  ;;  %v1720_v32 = vpop.f32.mrb[39].mxu1 }
 0x1f0   : > { %v5269_v34 = vadd.f32 %v2004_v29, %v1718_v24  ;;  %v2006_v35 = vpop.f32.mrb[39].mxu0 }
 0x1f1   : > { %v5271_v60 = vadd.f32 %v2006_v35, %v1720_v32 }
 0x1f4   : > { %v1724_v38 = vpop.f32.mrb[40].mxu1 }
 0x1f5   : > { %v2010_v25 = vpop.f32.mrb[40].mxu0  ;;  %v1726_v39 = vpop.f32.mrb[41].mxu1 }
 0x1f6   : > { %v5273_v41 = vadd.f32 %v2010_v25, %v1724_v38  ;;  %v2012_v42 = vpop.f32.mrb[41].mxu0  ;;  %v1728_v44 = vpop.f32.mrb[42].mxu1 }
 0x1f7   : > { %v5275_v45 = vadd.f32 %v2012_v42, %v1726_v39  ;;  %v2014_v47 = vpop.f32.mrb[42].mxu0  ;;  %v1730_v49 = vpop.f32.mrb[43].mxu1 }
 0x1f8   : > { %v5277_v50 = vadd.f32 %v2014_v47, %v1728_v44  ;;  %v2016_v51 = vpop.f32.mrb[43].mxu0 }
 0x1f9   : > { %v5279_v53 = vadd.f32 %v2016_v51, %v1730_v49 }
 0x1fc   : > { %v2113_v54 = vpop.f32.mrb[44].mxu1 }
 0x1fd   : > { %v2053_v56 = vpop.f32.mrb[0].mxu0  ;;  %v5281_v57 = vadd.f32 %v3314_v27, %v2113_v54  ;;  %v2115_v59 = vpop.f32.mrb[45].mxu1 }
 0x1fe   : > { %v5284_v62 = vadd.f32 %v2053_v56, %v5199_v4  ;;  %v2055_v63 = vpop.f32.mrb[1].mxu0  ;;  %v5286_v2 = vadd.f32 %v3316_v33, %v2115_v59  ;;  %v2117_v23 = vpop.f32.mrb[46].mxu1 }
 0x1ff   : > { %v5289_v24 = vadd.f32 %v2055_v63, %v5201_v5  ;;  %v2057_v29 = vpop.f32.mrb[2].mxu0  ;;  %v5291_v32 = vadd.f32 %v3318_v36, %v2117_v23  ;;  %v2119_v35 = vpop.f32.mrb[47].mxu1 }
 0x200   : > { %v5294_v38 = vadd.f32 %v2057_v29, %v5203_v28  ;;  %v2059_v27 = vpop.f32.mrb[3].mxu0  ;;  %v5297_v25 = vadd.f32 %v5247_v0, %v2119_v35  ;;  %v2211_v28 = vsel %vm2162_vm1, %v5286_v2, 0.0 }
 0x201   : > { %v5300_v4 = vadd.f32 %v2059_v27, %v5205_v31  ;;  %v2163_v33 = vsel %vm2162_vm1, %v5289_v24, 0.0  ;;  %v2212_v29 = vadd.f32 %v5281_v57, %v2211_v28 }
 0x202   : > { %v2164_v5 = vadd.f32 %v5284_v62, %v2163_v33  ;;  %v2215_v36 = vsel %vm2162_vm1, %v5297_v25, 0.0  ;;  %v2301_v31 = vmul.f32 %v5297_v25, %v5297_v25  ;;  %v2276_v51 = vmul.f32 %v5294_v38, %v5294_v38 }
 0x203   : > { %v2216_v39 = vadd.f32 %v5291_v32, %v2215_v36  ;;  %v2277_v0 = vmul.f32 %v5300_v4, %v5300_v4  ;;  %v2275_v36 = vmul.f32 %v5289_v24, %v5289_v24 }
 0x204   : > { %2165 = vadd.xlane.f32.xlu0 %v2164_v5  ;;  %v2123_v42 = vpop.f32.mrb[48].mxu1 }
 0x205   : > { %v2063_v44 = vpop.f32.mrb[4].mxu0  ;;  %v5315_v47 = vadd.f32 %v5249_v40, %v2123_v42  ;;  %v2125_v49 = vpop.f32.mrb[49].mxu1  ;;  %2217 = vadd.xlane.f32.xlu1 %v2216_v39  ;;  %v2322_v54 = vsel %vm2162_vm1, %v2277_v0, 0.0  ;;  %v2167_v40 = vsel %vm2162_vm1, %v5300_v4, 0.0 }
 0x206   : > { %v5321_v56 = vadd.f32 %v2063_v44, %v5207_v6  ;;  %v2065_v59 = vpop.f32.mrb[5].mxu0  ;;  %v5324_v63 = vadd.f32 %v5251_v43, %v2125_v49  ;;  %v2127_v23 = vpop.f32.mrb[50].mxu1  ;;  %v2323_v6 = vadd.f32 %v2322_v54, %v2276_v51  ;;  %v2168_v42 = vadd.f32 %v5294_v38, %v2167_v40 }
 0x207   : > { %v5330_v35 = vadd.f32 %v2065_v59, %v5209_v37  ;;  %v2067_v27 = vpop.f32.mrb[6].mxu0  ;;  %v5333_v33 = vadd.f32 %v5253_v46, %v2127_v23  ;;  %v2129_v5 = vpop.f32.mrb[51].mxu1  ;;  %v2370_v37 = vsel %vm2162_vm1, %v2301_v31, 0.0  ;;  %v2300_v46 = vmul.f32 %v5291_v32, %v5291_v32 }
 0x208   : > { %v5338_v43 = vadd.f32 %v2067_v27, %v5211_v8  ;;  %v2069_v39 = vpop.f32.mrb[7].mxu0  ;;  %v5341_v28 = vadd.f32 %v5255_v48, %v2129_v5  ;;  %2213 = vadd.xlane.f32.xlu0 %v2212_v29  ;;  %v2318_v8 = vsel %vm2162_vm1, %v2275_v36, 0.0  ;;  %v2299_v49 = vmul.f32 %v5286_v2, %v5286_v2 }
 0x209   : > { %v5345_v0 = vadd.f32 %v2069_v39, %v5213_v9  ;;  %2324 = vadd.xlane.f32.xlu1 %v2323_v6  ;;  %v2371_v44 = vadd.f32 %v2370_v37, %v2300_v46  ;;  %v2274_v31 = vmul.f32 %v5284_v62, %v5284_v62  ;;  %v2171_v9 = vsel %vm2162_vm1, %v5330_v35, 0.0 }
 0x20a   : > { %v2172_v37 = vadd.f32 %v5321_v56, %v2171_v9  ;;  %v2366_v46 = vsel %vm2162_vm1, %v2299_v49, 0.0 }
 0x20b   : > { %v2319_v5 = vadd.f32 %v2318_v8, %v2274_v31  ;;  %v2281_v9 = vmul.f32 %v5345_v0, %v5345_v0 }
 0x20c   : > { %2169 = vadd.xlane.f32.xlu0 %v2168_v42  ;;  %v2133_v48 = vpop.f32.mrb[52].mxu1 }
 0x20d   : > { %v2073_v51 = vpop.f32.mrb[8].mxu0  ;;  %v5358_v54 = vadd.f32 %v5257_v52, %v2133_v48  ;;  %v2135_v59 = vpop.f32.mrb[53].mxu1  ;;  %2372 = vadd.xlane.f32.xlu1 %v2371_v44  ;;  %v2279_v48 = vmul.f32 %v5330_v35, %v5330_v35 }
 0x20e   : > { %v5361_v23 = vadd.f32 %v2073_v51, %v5215_v30  ;;  %v2075_v29 = vpop.f32.mrb[9].mxu0  ;;  %v5364_v40 = vadd.f32 %v5259_v55, %v2135_v59  ;;  %v2137_v27 = vpop.f32.mrb[54].mxu1 }
 0x20f   : > { %v5367_v6 = vadd.f32 %v2075_v29, %v5217_v10  ;;  %v2077_v36 = vpop.f32.mrb[10].mxu0  ;;  %v5370_v39 = vadd.f32 %v5261_v58, %v2137_v27  ;;  %v2139_v52 = vpop.f32.mrb[55].mxu1  ;;  %v2298_v10 = vmul.f32 %v5281_v57, %v5281_v57  ;;  %v2175_v58 = vsel %vm2162_vm1, %v5345_v0, 0.0 }
 0x210   : > { %v5375_v30 = vadd.f32 %v2077_v36, %v5219_v22  ;;  %v2079_v42 = vpop.f32.mrb[11].mxu0  ;;  %v5378_v55 = vadd.f32 %v5263_v61, %v2139_v52  ;;  %2320 = vadd.xlane.f32.xlu0 %v2319_v5  ;;  %v2219_v22 = vsel %vm2162_vm1, %v5324_v63, 0.0  ;;  %v2176_v49 = vadd.f32 %v5338_v43, %v2175_v58 }
 0x211   : > { %v5385_v44 = vadd.f32 %v2079_v42, %v5221_v12  ;;  %2173 = vadd.xlane.f32.xlu1 %v2172_v37  ;;  %v2367_v8 = vadd.f32 %v2366_v46, %v2298_v10  ;;  %v2223_v61 = vsel %vm2162_vm1, %v5341_v28, 0.0  ;;  %v2220_v29 = vadd.f32 %v5315_v47, %v2219_v22 }
 0x212   : > { %v2224_v37 = vadd.f32 %v5333_v33, %v2223_v61  ;;  %v2278_v46 = vmul.f32 %v5321_v56, %v5321_v56 }
 0x214   : > { %2368 = vadd.xlane.f32.xlu0 %v2367_v8  ;;  %v2143_v31 = vpop.f32.mrb[56].mxu1 }
 0x215   : > { %v2083_v12 = vpop.f32.mrb[12].mxu0  ;;  %v5397_v51 = vadd.f32 %v5265_v3, %v2143_v31  ;;  %v2145_v59 = vpop.f32.mrb[57].mxu1  ;;  %2177 = vadd.xlane.f32.xlu1 %v2176_v49 }
 0x216   : > { %v5401_v27 = vadd.f32 %v2083_v12, %v5223_v13  ;;  %v2085_v5 = vpop.f32.mrb[13].mxu0  ;;  %v5404_v36 = vadd.f32 %v5267_v26, %v2145_v59  ;;  %v2147_v52 = vpop.f32.mrb[58].mxu1  ;;  %v2326_v13 = vsel %vm2162_vm1, %v2279_v48, 0.0  ;;  %v2303_v26 = vmul.f32 %v5324_v63, %v5324_v63 }
 0x217   : > { %5986 = vst [vmem:[#allocation5_spill] sm:$0xff] %v5397_v51  ;;  %v5410_v3 = vadd.f32 %v2085_v5, %v5225_v14  ;;  %v2087_v42 = vpop.f32.mrb[14].mxu0  ;;  %v5413_v10 = vadd.f32 %v5269_v34, %v2147_v52  ;;  %v2149_v58 = vpop.f32.mrb[59].mxu1  ;;  %v2330_v14 = vsel %vm2162_vm1, %v2281_v9, 0.0  ;;  %v2305_v34 = vmul.f32 %v5341_v28, %v5341_v28 }
 0x218   : > { %5987 = vst [vmem:[#allocation6_spill] sm:$0xff] %v5404_v36  ;;  %v5419_v8 = vadd.f32 %v2087_v42, %v5227_v1  ;;  %v2089_v22 = vpop.f32.mrb[15].mxu0  ;;  %v5422_v49 = vadd.f32 %v5271_v60, %v2149_v58  ;;  %2221 = vadd.xlane.f32.xlu0 %v2220_v29  ;;  %v2280_v48 = vmul.f32 %v5338_v43, %v5338_v43  ;;  %v2374_v12 = vsel %vm2162_vm1, %v2303_v26, 0.0 }
 0x219   : > { %v5428_v61 = vadd.f32 %v2089_v22, %v5229_v15  ;;  %2225 = vadd.xlane.f32.xlu1 %v2224_v37  ;;  %v2327_v31 = vadd.f32 %v2326_v13, %v2278_v46  ;;  %v2302_v59 = vmul.f32 %v5315_v47, %v5315_v47  ;;  %v2378_v9 = vsel %vm2162_vm1, %v2305_v34, 0.0 }
 0x21a   : > { %5988 = vst [vmem:[#allocation7_spill] sm:$0xff] %v5419_v8  ;;  %v2331_v1 = vadd.f32 %v2330_v14, %v2280_v48  ;;  %v2304_v52 = vmul.f32 %v5333_v33, %v5333_v33  ;;  %v2179_v48 = vsel %vm2162_vm1, %v5367_v6, 0.0 }
 0x21b   : > { %5989 = vst [vmem:[#allocation8_spill] sm:$0xff] %v5428_v61  ;;  %v2375_v13 = vadd.f32 %v2374_v12, %v2302_v59  ;;  %v2285_v59 = vmul.f32 %v5385_v44, %v5385_v44 }
 0x21c   : > { %2328 = vadd.xlane.f32.xlu0 %v2327_v31  ;;  %v2153_v60 = vpop.f32.mrb[60].mxu1  ;;  %v2379_v34 = vadd.f32 %v2378_v9, %v2304_v52 }
 0x21d   : > { %v2093_v29 = vpop.f32.mrb[16].mxu0  ;;  %v5437_v5 = vadd.f32 %v5273_v41, %v2153_v60  ;;  %v2155_v15 = vpop.f32.mrb[61].mxu1  ;;  %2332 = vadd.xlane.f32.xlu1 %v2331_v1  ;;  %v2283_v60 = vmul.f32 %v5367_v6, %v5367_v6 }
 0x21e   : > { %v5442_v37 = vadd.f32 %v2093_v29, %v5231_v11  ;;  %v2095_v46 = vpop.f32.mrb[17].mxu0  ;;  %v5445_v42 = vadd.f32 %v5275_v45, %v2155_v15  ;;  %v2157_v58 = vpop.f32.mrb[62].mxu1 }
 0x21f   : > { %5990 = vst [vmem:[#allocation9_spill] sm:$0xff] %v5437_v5  ;;  %v5448_v26 = vadd.f32 %v2095_v46, %v5233_v16  ;;  %v2097_v22 = vpop.f32.mrb[18].mxu0  ;;  %v5451_v41 = vadd.f32 %v5277_v50, %v2157_v58  ;;  %v2159_v14 = vpop.f32.mrb[63].mxu1  ;;  %v2183_v16 = vsel %vm2162_vm1, %v5385_v44, 0.0  ;;  %v2180_v50 = vadd.f32 %v5361_v23, %v2179_v48 }
 0x220   : > { %5991 = vst [vmem:[#allocation10_spill] sm:$0xff] %v5442_v37  ;;  %5992 = vst [vmem:[#allocation11_spill] sm:$0xff] %v5445_v42  ;;  %v5456_v11 = vadd.f32 %v2097_v22, %v5235_v17  ;;  %v2099_v31 = vpop.f32.mrb[19].mxu0  ;;  %v5459_v45 = vadd.f32 %v5279_v53, %v2159_v14  ;;  %2376 = vadd.xlane.f32.xlu0 %v2375_v13  ;;  %v2184_v12 = vadd.f32 %v5375_v30, %v2183_v16 }
 0x221   : > { %5993 = vst [vmem:[#allocation12_spill] sm:$0xff] %v5448_v26  ;;  %5994 = vst [vmem:[#allocation13_spill] sm:$0xff] %v5451_v41  ;;  %v5464_v1 = vadd.f32 %v2099_v31, %v5237_v18  ;;  %2380 = vadd.xlane.f32.xlu1 %v2379_v34  ;;  %v2227_v17 = vsel %vm2162_vm1, %v5364_v40, 0.0  ;;  %v2231_v53 = vsel %vm2162_vm1, %v5378_v55, 0.0  ;;  %v2334_v13 = vsel %vm2162_vm1, %v2283_v60, 0.0 }
 0x222   : > { %5995 = vst [vmem:[#allocation14_spill] sm:$0xff] %v5459_v45  ;;  %v2228_v15 = vadd.f32 %v5358_v54, %v2227_v17  ;;  %v2232_v58 = vadd.f32 %v5370_v39, %v2231_v53  ;;  %v2307_v22 = vmul.f32 %v5364_v40, %v5364_v40  ;;  %v2338_v48 = vsel %vm2162_vm1, %v2285_v59, 0.0 }
 0x223   : > { %v2284_v16 = vmul.f32 %v5375_v30, %v5375_v30  ;;  %v2306_v17 = vmul.f32 %v5358_v54, %v5358_v54  ;;  %v2308_v53 = vmul.f32 %v5370_v39, %v5370_v39 }
 0x224   : > { %2181 = vadd.xlane.f32.xlu0 %v2180_v50 }
 0x225   : > { %v2103_v18 = vpop.f32.mrb[20].mxu0  ;;  %2185 = vadd.xlane.f32.xlu1 %v2184_v12  ;;  %v2382_v12 = vsel %vm2162_vm1, %v2307_v22, 0.0  ;;  %v2239_v22 = vsel %vm2162_vm1, %v5422_v49, 0.0 }
 0x226   : > { %v5477_v9 = vadd.f32 %v2103_v18, %v5239_v19  ;;  %v2105_v29 = vpop.f32.mrb[21].mxu0  ;;  %v2282_v19 = vmul.f32 %v5361_v23, %v5361_v23  ;;  %v2187_v18 = vsel %vm2162_vm1, %v5410_v3, 0.0 }
 0x227   : > { %v5481_v52 = vadd.f32 %v2105_v29, %v5241_v7  ;;  %v2107_v46 = vpop.f32.mrb[22].mxu0  ;;  %v2309_v7 = vmul.f32 %v5378_v55, %v5378_v55  ;;  %v2191_v29 = vsel %vm2162_vm1, %v5428_v61, 0.0 }
 0x228   : > { %5996 = vst [vmem:[#allocation15_spill] sm:$0xff] %v5477_v9  ;;  %v5488_v14 = vadd.f32 %v2107_v46, %v5243_v20  ;;  %v2109_v34 = vpop.f32.mrb[23].mxu0  ;;  %2229 = vadd.xlane.f32.xlu0 %v2228_v15  ;;  %v2335_v50 = vadd.f32 %v2334_v13, %v2282_v19  ;;  %v2339_v20 = vadd.f32 %v2338_v48, %v2284_v16  ;;  %v3627_v48 = vmov 0  }
 0x229   : > { %5997 = vst [vmem:[#allocation16_spill] sm:$0xff] %v5481_v52  ;;  %v5496_v31 = vadd.f32 %v2109_v34, %v5245_v21  ;;  %2233 = vadd.xlane.f32.xlu1 %v2232_v58  ;;  %v2386_v60 = vsel %vm2162_vm1, %v2309_v7, 0.0  ;;  %v2383_v21 = vadd.f32 %v2382_v12, %v2306_v17  ;;  %v2188_v15 = vadd.f32 %v5401_v27, %v2187_v18 }
 0x22a   : > { %5998 = vst [vmem:[#allocation17_spill] sm:$0xff] %v5488_v14  ;;  %v2387_v59 = vadd.f32 %v2386_v60, %v2308_v53  ;;  %v2192_v46 = vadd.f32 %v5419_v8, %v2191_v29  ;;  %v2235_v58 = vsel %vm2162_vm1, %v5404_v36, 0.0  ;;  %v2287_v13 = vmul.f32 %v5410_v3, %v5410_v3  ;;  %3512 = vset.pattern.permute.xlu0 %v3627_v48 }
 0x22b   : > { %5999 = vst [vmem:[#allocation18_spill] sm:$0xff] %v5496_v31  ;;  %v2289_v34 = vmul.f32 %v5428_v61, %v5428_v61  ;;  %v2236_v19 = vadd.f32 %v5397_v51, %v2235_v58  ;;  %3513 = vset.pattern.permute.xlu1 %v3627_v48  ;;  %v2240_v7 = vadd.f32 %v5413_v10, %v2239_v22  ;;  %v2199_v22 = vsel %vm2162_vm1, %v5464_v1, 0.0 }
 0x22c   : > { %2336 = vadd.xlane.f32.xlu0 %v2335_v50  ;;  %v2342_v16 = vsel %vm2162_vm1, %v2287_v13, 0.0  ;;  %v2311_v50 = vmul.f32 %v5404_v36, %v5404_v36  ;;  %v2313_v17 = vmul.f32 %v5422_v49, %v5422_v49  ;;  %v2288_v60 = vmul.f32 %v5419_v8, %v5419_v8  ;;  %v2506_v36 = vld [vmem:[%s5620_s30 + $0x60] sm:$0xff] }
 0x22d   : > { %2340 = vadd.xlane.f32.xlu1 %v2339_v20  ;;  %v2286_v20 = vmul.f32 %v5401_v27, %v5401_v27  ;;  %v2346_v12 = vsel %vm2162_vm1, %v2289_v34, 0.0  ;;  %v2310_v18 = vmul.f32 %v5397_v51, %v5397_v51  ;;  %v2195_v13 = vsel %vm2162_vm1, %v5448_v26, 0.0  ;;  %v2510_v8 = vld [vmem:[%s5620_s30 + $0x80] sm:$0xff] }
 0x22e   : > { %v2394_v29 = vsel %vm2162_vm1, %v2313_v17, 0.0  ;;  %v2196_v34 = vadd.f32 %v5442_v37, %v2195_v13  ;;  %v2243_v48 = vsel %vm2162_vm1, %v5445_v42, 0.0 }
 0x22f   : > { %v2343_v53 = vadd.f32 %v2342_v16, %v2286_v20  ;;  %v2247_v16 = vsel %vm2162_vm1, %v5459_v45, 0.0  ;;  %v2244_v20 = vadd.f32 %v5437_v5, %v2243_v48  ;;  %v2203_v48 = vsel %vm2162_vm1, %v5481_v52, 0.0 }
 0x230   : > { %2384 = vadd.xlane.f32.xlu0 %v2383_v21  ;;  %v2347_v21 = vadd.f32 %v2346_v12, %v2288_v60  ;;  %v2248_v12 = vadd.f32 %v5451_v41, %v2247_v16  ;;  %v2315_v60 = vmul.f32 %v5445_v42, %v5445_v42  ;;  %v2207_v16 = vsel %vm2162_vm1, %v5496_v31, 0.0 }
 0x231   : > { %2388 = vadd.xlane.f32.xlu1 %v2387_v59  ;;  %v2390_v59 = vsel %vm2162_vm1, %v2311_v50, 0.0  ;;  %v2293_v50 = vmul.f32 %v5464_v1, %v5464_v1 }
 0x234   : > { %2189 = vadd.xlane.f32.xlu0 %v2188_v15  ;;  %v2312_v15 = vmul.f32 %v5413_v10, %v5413_v10 }
 0x235   : > { %2193 = vadd.xlane.f32.xlu1 %v2192_v46  ;;  %v2391_v46 = vadd.f32 %v2390_v59, %v2310_v18  ;;  %v2317_v59 = vmul.f32 %v5459_v45, %v5459_v45  ;;  %v2292_v18 = vmul.f32 %v5456_v11, %v5456_v11 }
 0x236   : > { %v2395_v58 = vadd.f32 %v2394_v29, %v2312_v15 }
 0x237   : > { %v2402_v13 = vsel %vm2162_vm1, %v2317_v59, 0.0 }
 0x238   : > { %2237 = vadd.xlane.f32.xlu0 %v2236_v19  ;;  %v2200_v19 = vadd.f32 %v5456_v11, %v2199_v22  ;;  %v2316_v22 = vmul.f32 %v5451_v41, %v5451_v41 }
 0x239   : > { %2241 = vadd.xlane.f32.xlu1 %v2240_v7  ;;  %v2291_v7 = vmul.f32 %v5448_v26, %v5448_v26 }
 0x23b   : > { %v2350_v17 = vsel %vm2162_vm1, %v2291_v7, 0.0  ;;  %v2295_v7 = vmul.f32 %v5481_v52, %v5481_v52  ;;  %v2494_v52 = vld [vmem:[%s5620_s30] sm:$0xff] }
 0x23c   : > { %2344 = vadd.xlane.f32.xlu0 %v2343_v53  ;;  %v2290_v53 = vmul.f32 %v5442_v37, %v5442_v37 }
 0x23d   : > { %2348 = vadd.xlane.f32.xlu1 %v2347_v21  ;;  %v2354_v21 = vsel %vm2162_vm1, %v2293_v50, 0.0  ;;  %v2297_v50 = vmul.f32 %v5496_v31, %v5496_v31 }
 0x23e   : > { %v2351_v29 = vadd.f32 %v2350_v17, %v2290_v53  ;;  %v2355_v15 = vadd.f32 %v2354_v21, %v2292_v18  ;;  %v2358_v17 = vsel %vm2162_vm1, %v2295_v7, 0.0  ;;  %v2296_v21 = vmul.f32 %v5488_v14, %v5488_v14 }
 0x23f   : > { %v2362_v53 = vsel %vm2162_vm1, %v2297_v50, 0.0 }
 0x240   : > { %2392 = vadd.xlane.f32.xlu0 %v2391_v46  ;;  %v2398_v46 = vsel %vm2162_vm1, %v2315_v60, 0.0  ;;  %v2294_v60 = vmul.f32 %v5477_v9, %v5477_v9  ;;  %v2363_v18 = vadd.f32 %v2362_v53, %v2296_v21 }
 0x241   : > { %2396 = vadd.xlane.f32.xlu1 %v2395_v58  ;;  %v2314_v58 = vmul.f32 %v5437_v5, %v5437_v5 }
 0x242   : > { %v2359_v59 = vadd.f32 %v2358_v17, %v2294_v60 }
 0x244   : > { %2197 = vadd.xlane.f32.xlu0 %v2196_v34  ;;  %v2399_v34 = vadd.f32 %v2398_v46, %v2314_v58 }
 0x245   : > { %2201 = vadd.xlane.f32.xlu1 %v2200_v19  ;;  %v2403_v19 = vadd.f32 %v2402_v13, %v2316_v22 }
 0x248   : > { %2245 = vadd.xlane.f32.xlu0 %v2244_v20  ;;  %v2204_v20 = vadd.f32 %v5477_v9, %v2203_v48 }
 0x249   : > { %2249 = vadd.xlane.f32.xlu1 %v2248_v12  ;;  %v2208_v12 = vadd.f32 %v5488_v14, %v2207_v16  ;;  %v2507_v14 = vld [vmem:[%s5620_s30 + $0x68] sm:$0xff] }
 0x24c   : > { %2352 = vadd.xlane.f32.xlu0 %v2351_v29 }
 0x24d   : > { %2356 = vadd.xlane.f32.xlu1 %v2355_v15 }
 0x250   : > { %2400 = vadd.xlane.f32.xlu0 %v2399_v34 }
 0x251   : > { %2404 = vadd.xlane.f32.xlu1 %v2403_v19 }
 0x254   : > { %2205 = vadd.xlane.f32.xlu0 %v2204_v20 }
 0x255   : > { %2209 = vadd.xlane.f32.xlu1 %v2208_v12 }
 0x258   : > { %2360 = vadd.xlane.f32.xlu0 %v2359_v59 }
 0x259   : > { %2364 = vadd.xlane.f32.xlu1 %v2363_v18 }
 0x291   : > { %v2166_v29 = vpop.xlane.xlu0 %2165 }
 0x292   : > { %v2218_v15 = vpop.xlane.xlu1 %2217  ;;  %v5588_v34 = vmul.f32 0.0051020407, %v2166_v29 }
 0x293   : > { %v5586_v13 = vmul.f32 0.0051020407, %v2218_v15 }
 0x294   : > { %v2428_v60 = vmul.f32 %v5588_v34, %v5588_v34 }
 0x295   : > { %v2214_v46 = vpop.xlane.xlu0 %2213  ;;  %v2441_v7 = vmul.f32 %v5586_v13, %v5586_v13 }
 0x296   : > { %v2325_v58 = vpop.xlane.xlu1 %2324  ;;  %v5600_v53 = vmul.f32 0.0051020407, %v2214_v46 }
 0x297   : > { %v2407_v50 = vmul.f32 0.0051020407, %v2325_v58 }
 0x299   : > { %v2170_v22 = vpop.xlane.xlu0 %2169 }
 0x29a   : > { %v5590_v19 = vmul.f32 0.0051020407, %v2170_v22  ;;  %v2373_v48 = vpop.xlane.xlu1 %2372 }
 0x29b   : > { %v2419_v16 = vmul.f32 0.0051020407, %v2373_v48  ;;  %v2440_v48 = vmul.f32 %v5600_v53, %v5600_v53 }
 0x29c   : > { %v2429_v20 = vmul.f32 %v5590_v19, %v5590_v19 }
 0x29d   : > { %v2463_v12 = vsub.f32 %v2419_v16, %v2441_v7  ;;  %v2321_v17 = vpop.xlane.xlu0 %2320 }
 0x29e   : > { %v2451_v21 = vsub.f32 %v2407_v50, %v2429_v20  ;;  %v2406_v59 = vmul.f32 0.0051020407, %v2321_v17  ;;  %v2174_v18 = vpop.xlane.xlu1 %2173 }
 0x29f   : > { %v2485_v15 = vmax.f32 %v2463_v12, 0.0  ;;  %v5606_v12 = vmul.f32 0.0051020407, %v2174_v18 }
 0x2a0   : > { %v2473_v29 = vmax.f32 %v2451_v21, 0.0  ;;  %v2450_v22 = vsub.f32 %v2406_v59, %v2428_v60 }
 0x2a1   : > { %v2369_v58 = vpop.xlane.xlu0 %2368  ;;  %v2529_v46 = vadd.f32 1e-05, %v2485_v15 }
 0x2a2   : > { %v2517_v42 = vadd.f32 1e-05, %v2473_v29  ;;  %v2472_v5 = vmax.f32 %v2450_v22, 0.0  ;;  %v2418_v7 = vmul.f32 0.0051020407, %v2369_v58  ;;  %v2178_v16 = vpop.xlane.xlu1 %2177  ;;  %v2430_v58 = vmul.f32 %v5606_v12, %v5606_v12 }
 0x2a3   : > { %v5608_v59 = vmul.f32 0.0051020407, %v2178_v16 }
 0x2a4   : > { %3514 = vrsqrt.f32 %v2517_v42  ;;  %v2516_v50 = vadd.f32 1e-05, %v2472_v5  ;;  %v2462_v20 = vsub.f32 %v2418_v7, %v2440_v48 }
 0x2a5   : > { %v2222_v17 = vpop.xlane.xlu0 %2221  ;;  %v2431_v18 = vmul.f32 %v5608_v59, %v5608_v59 }
 0x2a6   : > { %3516 = vrsqrt.f32 %v2516_v50  ;;  %v2484_v60 = vmax.f32 %v2462_v20, 0.0  ;;  %v2226_v21 = vpop.xlane.xlu1 %2225  ;;  %v5613_v42 = vmul.f32 0.0051020407, %v2222_v17  ;;  %v2495_v17 = vld [vmem:[%s5620_s30 + $0x8] sm:$0xff] }
 0x2a7   : > { %3518 = vrsqrt.f32 %v2529_v46  ;;  %v5624_v48 = vmul.f32 0.0051020407, %v2226_v21 }
 0x2a8   : > { %v2528_v29 = vadd.f32 1e-05, %v2484_v60  ;;  %v2442_v60 = vmul.f32 %v5613_v42, %v5613_v42 }
 0x2a9   : > { %v2329_v22 = vpop.xlane.xlu0 %2328  ;;  %v2443_v9 = vmul.f32 %v5624_v48, %v5624_v48 }
 0x2aa   : > { %3520 = vrsqrt.f32 %v2528_v29  ;;  %v2408_v5 = vmul.f32 0.0051020407, %v2329_v22  ;;  %v2333_v15 = vpop.xlane.xlu1 %2332 }
 0x2ab   : > { %v2409_v7 = vmul.f32 0.0051020407, %v2333_v15 }
 0x2ac   : > { %v2452_v16 = vsub.f32 %v2408_v5, %v2430_v58 }
 0x2ad   : > { %v2453_v46 = vsub.f32 %v2409_v7, %v2431_v18  ;;  %v2377_v50 = vpop.xlane.xlu0 %2376 }
 0x2ae   : > { %v3515_v20 = vpop.eup %3514  ;;  %v2420_v29 = vmul.f32 0.0051020407, %v2377_v50  ;;  %v2381_v22 = vpop.xlane.xlu1 %2380  ;;  %v2474_v58 = vmax.f32 %v2452_v16, 0.0 }
 0x2af   : > { %v2475_v26 = vmax.f32 %v2453_v46, 0.0  ;;  %v2421_v21 = vmul.f32 0.0051020407, %v2381_v22  ;;  %v2561_v18 = vmul.f32 %v3515_v20, %v2495_v17 }
 0x2b0   : > { %v3517_v15 = vpop.eup %3516  ;;  %v2464_v5 = vsub.f32 %v2420_v29, %v2442_v60  ;;  %v2518_v46 = vadd.f32 1e-05, %v2474_v58  ;;  %v2583_v29 = vld [vmem:[%s5639_s11 + $0x8] sm:$0xff] }
 0x2b1   : > { %v2519_v7 = vadd.f32 1e-05, %v2475_v26  ;;  %v2465_v37 = vsub.f32 %v2421_v21, %v2443_v9  ;;  %v2182_v45 = vpop.xlane.xlu0 %2181  ;;  %v2560_v41 = vmul.f32 %v3517_v15, %v2494_v52  ;;  %v3519_v31 = vpop.eup %3518  ;;  %v2605_v9 = vmul.f32 %v2561_v18, %v5590_v19 }
 0x2b2   : > { %v2186_v50 = vpop.xlane.xlu1 %2185  ;;  %v2486_v26 = vmax.f32 %v2464_v5, 0.0  ;;  %v2573_v17 = vmul.f32 %v3519_v31, %v2507_v14  ;;  %v5647_v14 = vmul.f32 0.0051020407, %v2182_v45  ;;  %v2595_v31 = vld [vmem:[%s5639_s11 + $0x68] sm:$0xff]  ;;  %v2582_v5 = vld [vmem:[%s5639_s11] sm:$0xff] }
 0x2b3   : > { %3522 = vrsqrt.f32 %v2519_v7  ;;  %v2487_v51 = vmax.f32 %v2465_v37, 0.0  ;;  %2694 = vperm.xlu0 %3512, %v2560_v41   ;;  %v5643_v22 = vmul.f32 0.0051020407, %v2186_v50  ;;  %v2627_v58 = vsub.f32 %v2583_v29, %v2605_v9 }
 0x2b4   : > { %v3521_v16 = vpop.eup %3520  ;;  %v2530_v21 = vadd.f32 1e-05, %v2486_v26  ;;  %v2617_v19 = vmul.f32 %v2573_v17, %v5586_v13 }
 0x2b5   : > { %v2531_v52 = vadd.f32 1e-05, %v2487_v51  ;;  %v2230_v20 = vpop.xlane.xlu0 %2229  ;;  %v2572_v60 = vmul.f32 %v3521_v16, %v2506_v36  ;;  %v2604_v51 = vmul.f32 %v2560_v41, %v5588_v34  ;;  %v2433_v7 = vmul.f32 %v5643_v22, %v5643_v22 }
 0x2b6   : > { %v2234_v37 = vpop.xlane.xlu1 %2233  ;;  %v2639_v34 = vsub.f32 %v2595_v31, %v2617_v19  ;;  %v2509_v19 = vld [vmem:[%s5620_s30 + $0x78] sm:$0xff] }
 0x2b7   : > { %3524 = vrsqrt.f32 %v2531_v52  ;;  %2759 = vperm.xlu0 %3512, %v2573_v17   ;;  %2754 = vperm.xlu1 %3513, %v2572_v60   ;;  %v5653_v50 = vmul.f32 0.0051020407, %v2234_v37  ;;  %v2626_v9 = vsub.f32 %v2582_v5, %v2604_v51  ;;  %v2616_v52 = vmul.f32 %v2572_v60, %v5600_v53 }
 0x2b8   : > { %3526 = vrsqrt.f32 %v2518_v46  ;;  %v2497_v46 = vld [vmem:[%s5620_s30 + $0x18] sm:$0xff]  ;;  %v2432_v17 = vmul.f32 %v5647_v14, %v5647_v14  ;;  %v5659_v37 = vmul.f32 0.0051020407, %v2230_v20 }
 0x2b9   : > { %v2337_v15 = vpop.xlane.xlu0 %2336  ;;  %3528 = vrsqrt.f32 %v2530_v21 }
 0x2ba   : > { %v2341_v36 = vpop.xlane.xlu1 %2340  ;;  %v2410_v26 = vmul.f32 0.0051020407, %v2337_v15 }
 0x2bb   : > { %v2411_v16 = vmul.f32 0.0051020407, %v2341_v36  ;;  %2897 = vperm.xlu0 %3512, %v2627_v58   ;;  %2699 = vperm.xlu1 %3513, %v2561_v18   ;;  %v2594_v36 = vld [vmem:[%s5639_s11 + $0x60] sm:$0xff]  ;;  %v2445_v18 = vmul.f32 %v5653_v50, %v5653_v50 }
 0x2bc   : > { %v2454_v51 = vsub.f32 %v2410_v26, %v2432_v17 }
 0x2bd   : > { %v3523_v13 = vpop.eup %3522  ;;  %v2455_v41 = vsub.f32 %v2411_v16, %v2433_v7  ;;  %v2385_v45 = vpop.xlane.xlu0 %2384  ;;  %v2638_v7 = vsub.f32 %v2594_v36, %v2616_v52 }
 0x2be   : > { %v2389_v29 = vpop.xlane.xlu1 %2388  ;;  %v5662_v58 = vmul.f32 %v3523_v13, %v2497_v46  ;;  %v2422_v53 = vmul.f32 0.0051020407, %v2385_v45  ;;  %v2444_v46 = vmul.f32 %v5659_v37, %v5659_v37  ;;  %v2585_v45 = vld [vmem:[%s5639_s11 + $0x18] sm:$0xff] }
 0x2bf   : > { %v2477_v21 = vmax.f32 %v2455_v41, 0.0  ;;  %v2423_v15 = vmul.f32 0.0051020407, %v2389_v29  ;;  %2957 = vperm.xlu0 %3512, %v2639_v34   ;;  %2892 = vperm.xlu1 %3513, %v2626_v9   ;;  %v2496_v41 = vld [vmem:[%s5620_s30 + $0x10] sm:$0xff]  ;;  %v2476_v9 = vmax.f32 %v2454_v51, 0.0 }
 0x2c0   : > { %v2607_v34 = vmul.f32 %v5662_v58, %v5608_v59  ;;  %v2466_v17 = vsub.f32 %v2422_v53, %v2444_v46 }
 0x2c1   : > { %v3525_v60 = vpop.eup %3524  ;;  %v2521_v31 = vadd.f32 1e-05, %v2477_v21  ;;  %v2467_v20 = vsub.f32 %v2423_v15, %v2445_v18  ;;  %v2190_v5 = vpop.xlane.xlu0 %2189 }
 0x2c2   : > { %v3527_v16 = vpop.eup %3526  ;;  %v2194_v13 = vpop.xlane.xlu1 %2193  ;;  %v2575_v61 = vmul.f32 %v3525_v60, %v2509_v19  ;;  %v2629_v15 = vsub.f32 %v2585_v45, %v2607_v34  ;;  %v2508_v19 = vld [vmem:[%s5620_s30 + $0x70] sm:$0xff] }
 0x2c3   : > { %3530 = vrsqrt.f32 %v2521_v31  ;;  %v2489_v26 = vmax.f32 %v2467_v20, 0.0  ;;  %2952 = vperm.xlu1 %3513, %v2638_v7   ;;  %v2562_v36 = vmul.f32 %v3527_v16, %v2496_v41  ;;  %v3529_v18 = vpop.eup %3528  ;;  %v5675_v59 = vmul.f32 0.0051020407, %v2194_v13  ;;  %v2597_v31 = vld [vmem:[%s5639_s11 + $0x78] sm:$0xff] }
 0x2c4   : > { %2769 = vperm.xlu0 %3512, %v2575_v61   ;;  %v2619_v60 = vmul.f32 %v2575_v61, %v5624_v48  ;;  %v2520_v20 = vadd.f32 1e-05, %v2476_v9  ;;  %v2488_v7 = vmax.f32 %v2466_v17, 0.0  ;;  %v2574_v53 = vmul.f32 %v3529_v18, %v2508_v19  ;;  %v2499_v48 = vld [vmem:[%s5620_s30 + $0x28] sm:$0xff] }
 0x2c5   : > { %v2533_v52 = vadd.f32 1e-05, %v2489_v26  ;;  %v2238_v29 = vpop.xlane.xlu0 %2237  ;;  %v2435_v41 = vmul.f32 %v5675_v59, %v5675_v59  ;;  %v2606_v17 = vmul.f32 %v2562_v36, %v5606_v12 }
 0x2c6   : > { %v2242_v21 = vpop.xlane.xlu1 %2241  ;;  %v2641_v16 = vsub.f32 %v2597_v31, %v2619_v60  ;;  %v2532_v13 = vadd.f32 1e-05, %v2488_v7 }
 0x2c7   : > { %3532 = vrsqrt.f32 %v2533_v52  ;;  %2704 = vperm.xlu1 %3513, %v2562_v36   ;;  %v5680_v34 = vmul.f32 0.0051020407, %v2242_v21  ;;  %v5684_v52 = vmul.f32 0.0051020407, %v2190_v5 }
 0x2c8   : > { %2907 = vperm.xlu0 %3512, %v2629_v15   ;;  %3534 = vrsqrt.f32 %v2520_v20  ;;  %v2584_v15 = vld [vmem:[%s5639_s11 + $0x10] sm:$0xff]  ;;  %v2511_v20 = vld [vmem:[%s5620_s30 + $0x88] sm:$0xff] }
 0x2c9   : > { %v2345_v51 = vpop.xlane.xlu0 %2344  ;;  %v2447_v21 = vmul.f32 %v5680_v34, %v5680_v34  ;;  %3536 = vrsqrt.f32 %v2532_v13 }
 0x2ca   : > { %v2349_v46 = vpop.xlane.xlu1 %2348  ;;  %v2412_v7 = vmul.f32 0.0051020407, %v2345_v51 }
 0x2cb   : > { %v2413_v61 = vmul.f32 0.0051020407, %v2349_v46  ;;  %2764 = vperm.xlu1 %3513, %v2574_v53  }
 0x2cc   : > { %2967 = vperm.xlu0 %3512, %v2641_v16   ;;  %v2628_v16 = vsub.f32 %v2584_v15, %v2606_v17 }
 0x2cd   : > { %v3531_v26 = vpop.eup %3530  ;;  %v2457_v45 = vsub.f32 %v2413_v61, %v2435_v41  ;;  %v2393_v9 = vpop.xlane.xlu0 %2392  ;;  %v2618_v41 = vmul.f32 %v2574_v53, %v5613_v42  ;;  %v2434_v61 = vmul.f32 %v5684_v52, %v5684_v52 }
 0x2ce   : > { %v2397_v18 = vpop.xlane.xlu1 %2396  ;;  %v5687_v19 = vmul.f32 %v3531_v26, %v2499_v48  ;;  %v5698_v48 = vmul.f32 0.0051020407, %v2238_v29  ;;  %v2424_v15 = vmul.f32 0.0051020407, %v2393_v9  ;;  %v2599_v9 = vld [vmem:[%s5639_s11 + $0x88] sm:$0xff] }
 0x2cf   : > { %v2479_v60 = vmax.f32 %v2457_v45, 0.0  ;;  %v2425_v31 = vmul.f32 0.0051020407, %v2397_v18  ;;  %2709 = vperm.xlu1 %3513, %v5662_v58   ;;  %v2596_v58 = vld [vmem:[%s5639_s11 + $0x70] sm:$0xff]  ;;  %v2587_v18 = vld [vmem:[%s5639_s11 + $0x28] sm:$0xff]  ;;  %v2456_v17 = vsub.f32 %v2412_v7, %v2434_v61 }
 0x2d0   : > { %v2609_v51 = vmul.f32 %v5687_v19, %v5643_v22  ;;  %v2640_v29 = vsub.f32 %v2596_v58, %v2618_v41  ;;  %v2498_v22 = vld [vmem:[%s5620_s30 + $0x20] sm:$0xff] }
 0x2d1   : > { %v3533_v46 = vpop.eup %3532  ;;  %v2523_v12 = vadd.f32 1e-05, %v2479_v60  ;;  %v2469_v5 = vsub.f32 %v2425_v31, %v2447_v21  ;;  %v5693_v36 = vpop.xlane.xlu0 %2197  ;;  %v2446_v60 = vmul.f32 %v5698_v48, %v5698_v48  ;;  %v2478_v7 = vmax.f32 %v2456_v17, 0.0 }
 0x2d2   : > { %v2202_v26 = vpop.xlane.xlu1 %2201  ;;  %v2577_v45 = vmul.f32 %v3533_v46, %v2511_v20  ;;  %v3535_v21 = vpop.eup %3534  ;;  %v2631_v20 = vsub.f32 %v2587_v18, %v2609_v51 }
 0x2d3   : > { %3538 = vrsqrt.f32 %v2523_v12  ;;  %v2491_v13 = vmax.f32 %v2469_v5, 0.0  ;;  %2902 = vperm.xlu1 %3513, %v2628_v16   ;;  %v5710_v12 = vmul.f32 0.0051020407, %v2202_v26  ;;  %v2468_v5 = vsub.f32 %v2424_v15, %v2446_v60  ;;  %v3537_v61 = vpop.eup %3536  ;;  %v2501_v26 = vld [vmem:[%s5620_s30 + $0x38] sm:$0xff] }
 0x2d4   : > { %2779 = vperm.xlu0 %3512, %v2577_v45   ;;  %v2621_v46 = vmul.f32 %v2577_v45, %v5653_v50  ;;  %v2564_v41 = vmul.f32 %v3535_v21, %v2498_v22  ;;  %v2522_v45 = vadd.f32 1e-05, %v2478_v7  ;;  %v2576_v21 = vmul.f32 %v3537_v61, %v2510_v8 }
 0x2d5   : > { %v2535_v42 = vadd.f32 1e-05, %v2491_v13  ;;  %v5704_v53 = vpop.xlane.xlu0 %2245  ;;  %v2437_v51 = vmul.f32 %v5710_v12, %v5710_v12  ;;  %v5726_v8 = vmul.f32 0.0051020407, %v5693_v36 }
 0x2d6   : > { %v2250_v31 = vpop.xlane.xlu1 %2249  ;;  %v2643_v13 = vsub.f32 %v2599_v9, %v2621_v46  ;;  %v2513_v9 = vld [vmem:[%s5620_s30 + $0x98] sm:$0xff] }
 0x2d7   : > { %3540 = vrsqrt.f32 %v2535_v42  ;;  %2962 = vperm.xlu1 %3513, %v2640_v29   ;;  %v5716_v18 = vmul.f32 0.0051020407, %v2250_v31  ;;  %v2490_v42 = vmax.f32 %v2468_v5, 0.0 }
 0x2d8   : > { %2917 = vperm.xlu0 %3512, %v2631_v20   ;;  %3542 = vrsqrt.f32 %v2522_v45 }
 0x2d9   : > { %v2353_v16 = vpop.xlane.xlu0 %2352  ;;  %v2449_v22 = vmul.f32 %v5716_v18, %v5716_v18  ;;  %v2534_v7 = vadd.f32 1e-05, %v2490_v42  ;;  %v2589_v42 = vld [vmem:[%s5639_s11 + $0x38] sm:$0xff] }
 0x2da   : > { %v2357_v58 = vpop.xlane.xlu1 %2356 }
 0x2db   : > { %v2415_v50 = vmul.f32 0.0051020407, %v2357_v58  ;;  %2714 = vperm.xlu1 %3513, %v2564_v41  }
 0x2dc   : > { %2977 = vperm.xlu0 %3512, %v2643_v13  }
 0x2dd   : > { %v3539_v17 = vpop.eup %3538  ;;  %v2459_v15 = vsub.f32 %v2415_v50, %v2437_v51  ;;  %v2401_v29 = vpop.xlane.xlu0 %2400  ;;  %v2608_v51 = vmul.f32 %v2564_v41, %v5647_v14  ;;  %v2414_v14 = vmul.f32 0.0051020407, %v2353_v16 }
 0x2de   : > { %v2405_v60 = vpop.xlane.xlu1 %2404  ;;  %v5719_v20 = vmul.f32 %v3539_v17, %v2501_v26  ;;  %v2586_v26 = vld [vmem:[%s5639_s11 + $0x20] sm:$0xff] }
 0x2df   : > { %v2481_v31 = vmax.f32 %v2459_v15, 0.0  ;;  %v2427_v46 = vmul.f32 0.0051020407, %v2405_v60  ;;  %2774 = vperm.xlu1 %3513, %v2576_v21   ;;  %v2630_v41 = vsub.f32 %v2586_v26, %v2608_v51 }
 0x2e0   : > { %v2611_v17 = vmul.f32 %v5719_v20, %v5675_v59  ;;  %v2436_v59 = vmul.f32 %v5726_v8, %v5726_v8 }
 0x2e1   : > { %v3541_v5 = vpop.eup %3540  ;;  %v2525_v58 = vadd.f32 1e-05, %v2481_v31  ;;  %v2471_v13 = vsub.f32 %v2427_v46, %v2449_v22  ;;  %v2206_v45 = vpop.xlane.xlu0 %2205  ;;  %v2620_v22 = vmul.f32 %v2576_v21, %v5659_v37  ;;  %v5739_v31 = vmul.f32 0.0051020407, %v5704_v53  ;;  %v2601_v37 = vld [vmem:[%s5639_s11 + $0x98] sm:$0xff] }
 0x2e2   : > { %v2210_v61 = vpop.xlane.xlu1 %2209  ;;  %v2579_v50 = vmul.f32 %v3541_v5, %v2513_v9  ;;  %v2633_v9 = vsub.f32 %v2589_v42, %v2611_v17  ;;  %v2598_v5 = vld [vmem:[%s5639_s11 + $0x80] sm:$0xff]  ;;  %v2458_v21 = vsub.f32 %v2414_v14, %v2436_v59  ;;  %v2500_v17 = vld [vmem:[%s5620_s30 + $0x30] sm:$0xff]  ;;  %v2503_v42 = vld [vmem:[%s5620_s30 + $0x48] sm:$0xff] }
 0x2e3   : > { %3544 = vrsqrt.f32 %v2525_v58  ;;  %v2493_v15 = vmax.f32 %v2471_v13, 0.0  ;;  %v5731_v60 = vmul.f32 0.0051020407, %v2210_v61  ;;  %2719 = vperm.xlu1 %3513, %v5687_v19   ;;  %v2426_v58 = vmul.f32 0.0051020407, %v2401_v29  ;;  %v3543_v61 = vpop.eup %3542 }
 0x2e4   : > { %3546 = vrsqrt.f32 %v2534_v7  ;;  %2789 = vperm.xlu0 %3512, %v2579_v50   ;;  %v2623_v19 = vmul.f32 %v2579_v50, %v5680_v34  ;;  %v2642_v51 = vsub.f32 %v2598_v5, %v2620_v22  ;;  %v2448_v26 = vmul.f32 %v5739_v31, %v5739_v31  ;;  %v2512_v5 = vld [vmem:[%s5620_s30 + $0x90] sm:$0xff] }
 0x2e5   : > { %v2537_v36 = vadd.f32 1e-05, %v2493_v15  ;;  %v2439_v16 = vmul.f32 %v5731_v60, %v5731_v60  ;;  %v2361_v13 = vpop.xlane.xlu0 %2360  ;;  %v5748_v34 = vmul.f32 0.0051020407, %v2206_v45  ;;  %v2566_v22 = vmul.f32 %v3543_v61, %v2500_v17 }
 0x2e6   : > { %v2365_v46 = vpop.xlane.xlu1 %2364  ;;  %v2645_v50 = vsub.f32 %v2601_v37, %v2623_v19  ;;  %v2470_v14 = vsub.f32 %v2426_v58, %v2448_v26  ;;  %v2416_v29 = vmul.f32 0.0051020407, %v2361_v13  ;;  %v2515_v19 = vld [vmem:[%s5620_s30 + $0xa8] sm:$0xff] }
 0x2e7   : > { %3548 = vrsqrt.f32 %v2537_v36  ;;  %v2417_v7 = vmul.f32 0.0051020407, %v2365_v46  ;;  %2912 = vperm.xlu1 %3513, %v2630_v41   ;;  %v2480_v36 = vmax.f32 %v2458_v21, 0.0  ;;  %v2438_v45 = vmul.f32 %v5748_v34, %v5748_v34 }
 0x2e8   : > { %2927 = vperm.xlu0 %3512, %v2633_v9  }
 0x2e9   : > { %v2461_v53 = vsub.f32 %v2417_v7, %v2439_v16  ;;  %v2524_v16 = vadd.f32 1e-05, %v2480_v36  ;;  %v2492_v7 = vmax.f32 %v2470_v14, 0.0  ;;  %v2460_v37 = vsub.f32 %v2416_v29, %v2438_v45 }
 0x2eb   : > { %v2483_v15 = vmax.f32 %v2461_v53, 0.0  ;;  %2972 = vperm.xlu1 %3513, %v2642_v51   ;;  %v2591_v51 = vld [vmem:[%s5639_s11 + $0x48] sm:$0xff]  ;;  %v2536_v61 = vadd.f32 1e-05, %v2492_v7  ;;  %v2482_v26 = vmax.f32 %v2460_v37, 0.0  ;;  %v2514_v37 = vld [vmem:[%s5620_s30 + $0xa0] sm:$0xff] }
 0x2ec   : > { %2987 = vperm.xlu0 %3512, %v2645_v50   ;;  %v2610_v50 = vmul.f32 %v2566_v22, %v5684_v52 }
 0x2ed   : > { %v3545_v41 = vpop.eup %3544  ;;  %v2527_v59 = vadd.f32 1e-05, %v2483_v15  ;;  %v2588_v15 = vld [vmem:[%s5639_s11 + $0x30] sm:$0xff]  ;;  %v2526_v36 = vadd.f32 1e-05, %v2482_v26 }
 0x2ee   : > { %v3547_v46 = vpop.eup %3546  ;;  %v2569_v9 = vmul.f32 %v3545_v41, %v2503_v42  ;;  %v2505_v42 = vld [vmem:[%s5620_s30 + $0x58] sm:$0xff]  ;;  %v2632_v14 = vsub.f32 %v2588_v15, %v2610_v50  ;;  %v2592_v26 = vld [vmem:[%s5639_s11 + $0x50] sm:$0xff]  ;;  %v2602_v15 = vld [vmem:[%s5639_s11 + $0xa0] sm:$0xff] }
 0x2ef   : > { %3550 = vrsqrt.f32 %v2527_v59  ;;  %2724 = vperm.xlu1 %3513, %v2566_v22   ;;  %v2578_v58 = vmul.f32 %v3547_v46, %v2512_v5  ;;  %v2600_v59 = vld [vmem:[%s5639_s11 + $0x90] sm:$0xff]  ;;  %v2593_v46 = vld [vmem:[%s5639_s11 + $0x58] sm:$0xff] }
 0x2f0   : > { %2739 = vperm.xlu0 %3512, %v2569_v9   ;;  %v2613_v53 = vmul.f32 %v2569_v9, %v5710_v12  ;;  %3552 = vrsqrt.f32 %v2524_v16  ;;  %v2502_v9 = vld [vmem:[%s5620_s30 + $0x40] sm:$0xff] }
 0x2f1   : > { %v3549_v21 = vpop.eup %3548  ;;  %3554 = vrsqrt.f32 %v2536_v61  ;;  %v2622_v29 = vmul.f32 %v2578_v58, %v5698_v48 }
 0x2f2   : > { %v2581_v13 = vmul.f32 %v3549_v21, %v2515_v19  ;;  %v2635_v17 = vsub.f32 %v2591_v51, %v2613_v53  ;;  %3556 = vrsqrt.f32 %v2526_v36  ;;  %v2603_v19 = vld [vmem:[%s5639_s11 + $0xa8] sm:$0xff]  ;;  %v2590_v53 = vld [vmem:[%s5639_s11 + $0x40] sm:$0xff]  ;;  %v2504_v51 = vld [vmem:[%s5620_s30 + $0x50] sm:$0xff] }
 0x2f3   : > { %2784 = vperm.xlu1 %3513, %v2578_v58  }
 0x2f4   : > { %2799 = vperm.xlu0 %3512, %v2581_v13   ;;  %v2625_v5 = vmul.f32 %v2581_v13, %v5716_v18 }
 0x2f6   : > { %v2647_v7 = vsub.f32 %v2603_v19, %v2625_v5  ;;  %v2674_v5 = vld [vmem:[%s5783_s18 + $0xd0] sm:$0xff] }
 0x2f7   : > { %2729 = vperm.xlu1 %3513, %v5719_v20   ;;  %v2644_v20 = vsub.f32 %v2600_v59, %v2622_v29 }
 0x2f8   : > { %2937 = vperm.xlu0 %3512, %v2635_v17  }
 0x2f9   : > { %v3551_v12 = vpop.eup %3550 }
 0x2fa   : > { %v2571_v41 = vmul.f32 %v3551_v12, %v2505_v42  ;;  %v3553_v22 = vpop.eup %3552 }
 0x2fb   : > { %2922 = vperm.xlu1 %3513, %v2632_v14   ;;  %v2568_v48 = vmul.f32 %v3553_v22, %v2502_v9  ;;  %v3555_v16 = vpop.eup %3554  ;;  %v2648_v14 = vld [vmem:[%s5783_s18] sm:$0xff]  ;;  %v2649_v22 = vld [vmem:[%s5783_s18 + $0x8] sm:$0xff] }
 0x2fc   : > { %2749 = vperm.xlu0 %3512, %v2571_v41   ;;  %v2615_v52 = vmul.f32 %v2571_v41, %v5731_v60  ;;  %v2580_v60 = vmul.f32 %v3555_v16, %v2514_v37  ;;  %v3557_v58 = vpop.eup %3556  ;;  %v2673_v37 = vld [vmem:[%s5783_s18 + $0xc8] sm:$0xff] }
 0x2fd   : > { %v2612_v21 = vmul.f32 %v2568_v48, %v5726_v8  ;;  %v2570_v13 = vmul.f32 %v3557_v58, %v2504_v51 }
 0x2fe   : > { %v2637_v45 = vsub.f32 %v2593_v46, %v2615_v52  ;;  %v2624_v17 = vmul.f32 %v2580_v60, %v5739_v31  ;;  %v2650_v46 = vld [vmem:[%s5783_s18 + $0x10] sm:$0xff]  ;;  %v2651_v52 = vld [vmem:[%s5783_s18 + $0x18] sm:$0xff] }
 0x2ff   : > { %2982 = vperm.xlu1 %3513, %v2644_v20   ;;  %v2634_v18 = vsub.f32 %v2590_v53, %v2612_v21  ;;  %v2614_v61 = vmul.f32 %v2570_v13, %v5748_v34 }
 0x300   : > { %2947 = vperm.xlu0 %3512, %v2637_v45   ;;  %v2646_v42 = vsub.f32 %v2602_v15, %v2624_v17 }
 0x301   : > { %v2636_v50 = vsub.f32 %v2592_v26, %v2614_v61 }
 0x303   : > { %2734 = vperm.xlu1 %3513, %v2568_v48  }
 0x304   : > { %2997 = vperm.xlu0 %3512, %v2647_v7   ;;  %v2672_v7 = vld [vmem:[%s5783_s18 + $0xc0] sm:$0xff] }
 0x307   : > { %2794 = vperm.xlu1 %3513, %v2580_v60  }
 0x30b   : > { %2932 = vperm.xlu1 %3513, %v2634_v18  }
 0x30f   : > { %2744 = vperm.xlu1 %3513, %v2570_v13  }
 0x313   : > { %2942 = vperm.xlu1 %3513, %v2636_v50  }
 0x317   : > { %2992 = vperm.xlu1 %3513, %v2646_v42  }
 0x332   : > { %v2695_v8 = vpop.permute.xlu0 %2694 }
 0x333   : > { %v2802_v36 = vmul.f32 %v5284_v62, %v2695_v8  ;;  %v2803_v12 = vmul.f32 %v5289_v24, %v2695_v8  ;;  %v2675_v62 = vld [vmem:[%s5783_s18 + $0xd8] sm:$0xff] }
 0x335   : > { %v2846_v48 = vadd.f32 %v2802_v36, %v2648_v14  ;;  %v2847_v16 = vadd.f32 %v2803_v12, %v2649_v22  ;;  %v2679_v22 = vld [vmem:[%s5783_s18 + $0xf8] sm:$0xff] }
 0x336   : > { %v2755_v34 = vpop.permute.xlu1 %2754  ;;  %v2760_v31 = vpop.permute.xlu0 %2759 }
 0x337   : > { %v2828_v29 = vmul.f32 %v5291_v32, %v2760_v31  ;;  %v2829_v41 = vmul.f32 %v5297_v25, %v2760_v31  ;;  %v2826_v24 = vmul.f32 %v5281_v57, %v2755_v34  ;;  %v2827_v32 = vmul.f32 %v5286_v2, %v2755_v34 }
 0x339   : > { %v2872_v21 = vadd.f32 %v2828_v29, %v2674_v5  ;;  %v2873_v58 = vadd.f32 %v2829_v41, %v2675_v62  ;;  %v2870_v13 = vadd.f32 %v2826_v24, %v2672_v7  ;;  %v2871_v61 = vadd.f32 %v2827_v32, %v2673_v37  ;;  %v2655_v7 = vld [vmem:[%s5783_s18 + $0x38] sm:$0xff] }
 0x33a   : > { %v2700_v59 = vpop.permute.xlu1 %2699  ;;  %v2898_v20 = vpop.permute.xlu0 %2897 }
 0x33b   : > { %v2804_v45 = vmul.f32 %v5294_v38, %v2700_v59  ;;  %v2805_v9 = vmul.f32 %v5300_v4, %v2700_v59 }
 0x33d   : > { %v2848_v19 = vadd.f32 %v2804_v45, %v2650_v46  ;;  %v2849_v25 = vadd.f32 %v2805_v9, %v2651_v52 }
 0x33e   : > { %v2893_v60 = vpop.permute.xlu1 %2892  ;;  %v2958_v53 = vpop.permute.xlu0 %2957 }
 0x33f   : > { %v3002_v38 = vadd.f32 %v2898_v20, %v2848_v19  ;;  %v3003_v51 = vadd.f32 %v2898_v20, %v2849_v25  ;;  %v3000_v4 = vadd.f32 %v2893_v60, %v2846_v48  ;;  %v3001_v18 = vadd.f32 %v2893_v60, %v2847_v16  ;;  %v2678_v20 = vld [vmem:[%s5783_s18 + $0xf0] sm:$0xff]  ;;  %v2652_v19 = vld [vmem:[%s5783_s18 + $0x20] sm:$0xff]  ;;  %v2653_v60 = vld [vmem:[%s5783_s18 + $0x28] sm:$0xff] }
 0x340   : > { %v3026_v57 = vadd.f32 %v2958_v53, %v2872_v21  ;;  %v3027_v2 = vadd.f32 %v2958_v53, %v2873_v58  ;;  %v2654_v16 = vld [vmem:[%s5783_s18 + $0x30] sm:$0xff] }
 0x341   : > { %v3046_v26 = vmax.f32 %v3002_v38, 0.0  ;;  %v3047_v50 = vmax.f32 %v3003_v51, 0.0  ;;  %v3044_v17 = vmax.f32 %v3000_v4, 0.0  ;;  %v3045_v15 = vmax.f32 %v3001_v18, 0.0  ;;  %v2676_v18 = vld [vmem:[%s5783_s18 + $0xe0] sm:$0xff] }
 0x342   : > { %v3070_v42 = vmax.f32 %v3026_v57, 0.0  ;;  %v3071_v8 = vmax.f32 %v3027_v2, 0.0  ;;  %v2953_v34 = vpop.permute.xlu1 %2952  ;;  %v2677_v57 = vld [vmem:[%s5783_s18 + $0xe8] sm:$0xff] }
 0x343   : > { %3090 = vst [vmem:[%s5806_s9 + $0x10] sm:$0xff] %v3046_v26  ;;  %3091 = vst.msk [vmem:[%s5806_s9 + $0x18] sm:$0xff] %vm2162_vm1, %v3047_v50  ;;  %v3024_v31 = vadd.f32 %v2953_v34, %v2870_v13  ;;  %v3025_v36 = vadd.f32 %v2953_v34, %v2871_v61  ;;  %v2770_v12 = vpop.permute.xlu0 %2769 }
 0x344   : > { %3088 = vst [vmem:[%s5806_s9] sm:$0xff] %v3044_v17  ;;  %3089 = vst.msk [vmem:[%s5806_s9 + $0x8] sm:$0xff] %vm2162_vm1, %v3045_v15  ;;  %v2832_v41 = vmul.f32 %v5333_v33, %v2770_v12  ;;  %v2833_v59 = vmul.f32 %v5341_v28, %v2770_v12 }
 0x345   : > { %3114 = vst [vmem:[%s5806_s9 + $0xd0] sm:$0xff] %v3070_v42  ;;  %3115 = vst.msk [vmem:[%s5806_s9 + $0xd8] sm:$0xff] %vm2162_vm1, %v3071_v8  ;;  %v3068_v14 = vmax.f32 %v3024_v31, 0.0  ;;  %v3069_v29 = vmax.f32 %v3025_v36, 0.0 }
 0x346   : > { %v2705_v46 = vpop.permute.xlu1 %2704  ;;  %v2876_v9 = vadd.f32 %v2832_v41, %v2678_v20  ;;  %v2877_v5 = vadd.f32 %v2833_v59, %v2679_v22  ;;  %v2683_v41 = vld [vmem:[%s5783_s18 + $0x118] sm:$0xff] }
 0x347   : > { %3112 = vst [vmem:[%s5806_s9 + $0xc0] sm:$0xff] %v3068_v14  ;;  %3113 = vst.msk [vmem:[%s5806_s9 + $0xc8] sm:$0xff] %vm2162_vm1, %v3069_v29  ;;  %v2908_v52 = vpop.permute.xlu0 %2907  ;;  %v2806_v28 = vmul.f32 %v5321_v56, %v2705_v46  ;;  %v2807_v32 = vmul.f32 %v5330_v35, %v2705_v46  ;;  %v2682_v29 = vld [vmem:[%s5783_s18 + $0x110] sm:$0xff] }
 0x349   : > { %v2850_v51 = vadd.f32 %v2806_v28, %v2652_v19  ;;  %v2851_v4 = vadd.f32 %v2807_v32, %v2653_v60  ;;  %v2658_v28 = vld [vmem:[%s5783_s18 + $0x50] sm:$0xff]  ;;  %v2659_v32 = vld [vmem:[%s5783_s18 + $0x58] sm:$0xff] }
 0x34a   : > { %v2765_v45 = vpop.permute.xlu1 %2764 }
 0x34b   : > { %v2968_v62 = vpop.permute.xlu0 %2967  ;;  %v2830_v53 = vmul.f32 %v5315_v47, %v2765_v45  ;;  %v2831_v38 = vmul.f32 %v5324_v63, %v2765_v45 }
 0x34c   : > { %v3030_v24 = vadd.f32 %v2968_v62, %v2876_v9  ;;  %v3031_v33 = vadd.f32 %v2968_v62, %v2877_v5 }
 0x34d   : > { %v2874_v63 = vadd.f32 %v2830_v53, %v2676_v18  ;;  %v2875_v26 = vadd.f32 %v2831_v38, %v2677_v57  ;;  %v2680_v38 = vld [vmem:[%s5783_s18 + $0x100] sm:$0xff]  ;;  %v2686_v57 = vld [vmem:[%s5783_s18 + $0x130] sm:$0xff] }
 0x34e   : > { %v3074_v25 = vmax.f32 %v3030_v24, 0.0  ;;  %v3075_v48 = vmax.f32 %v3031_v33, 0.0  ;;  %v2710_v37 = vpop.permute.xlu1 %2709 }
 0x34f   : > { %v2808_v21 = vmul.f32 %v5338_v43, %v2710_v37  ;;  %v2809_v58 = vmul.f32 %v5345_v0, %v2710_v37 }
 0x350   : > { %3118 = vst [vmem:[%s5806_s9 + $0xf0] sm:$0xff] %v3074_v25  ;;  %3119 = vst.msk [vmem:[%s5806_s9 + $0xf8] sm:$0xff] %vm2162_vm1, %v3075_v48  ;;  %v2656_v25 = vld [vmem:[%s5783_s18 + $0x40] sm:$0xff]  ;;  %v2657_v48 = vld [vmem:[%s5783_s18 + $0x48] sm:$0xff] }
 0x351   : > { %v2852_v56 = vadd.f32 %v2808_v21, %v2654_v16  ;;  %v2853_v35 = vadd.f32 %v2809_v58, %v2655_v7 }
 0x352   : > { %v2903_v2 = vpop.permute.xlu1 %2902 }
 0x353   : > { %v3006_v13 = vadd.f32 %v2908_v52, %v2852_v56  ;;  %v3007_v43 = vadd.f32 %v2908_v52, %v2853_v35  ;;  %v3004_v0 = vadd.f32 %v2903_v2, %v2850_v51  ;;  %v3005_v47 = vadd.f32 %v2903_v2, %v2851_v4  ;;  %v2780_v61 = vpop.permute.xlu0 %2779  ;;  %v2681_v56 = vld [vmem:[%s5783_s18 + $0x108] sm:$0xff]  ;;  %v2687_v2 = vld [vmem:[%s5783_s18 + $0x138] sm:$0xff] }
 0x354   : > { %v2836_v8 = vmul.f32 %v5370_v39, %v2780_v61  ;;  %v2837_v34 = vmul.f32 %v5378_v55, %v2780_v61 }
 0x355   : > { %v3050_v50 = vmax.f32 %v3006_v13, 0.0  ;;  %v3051_v17 = vmax.f32 %v3007_v43, 0.0  ;;  %v3048_v15 = vmax.f32 %v3004_v0, 0.0  ;;  %v3049_v42 = vmax.f32 %v3005_v47, 0.0 }
 0x356   : > { %v2963_v31 = vpop.permute.xlu1 %2962  ;;  %v2880_v46 = vadd.f32 %v2836_v8, %v2682_v29  ;;  %v2881_v52 = vadd.f32 %v2837_v34, %v2683_v41 }
 0x357   : > { %3094 = vst [vmem:[%s5806_s9 + $0x30] sm:$0xff] %v3050_v50  ;;  %3095 = vst.msk [vmem:[%s5806_s9 + $0x38] sm:$0xff] %vm2162_vm1, %v3051_v17  ;;  %v3028_v36 = vadd.f32 %v2963_v31, %v2874_v63  ;;  %v3029_v12 = vadd.f32 %v2963_v31, %v2875_v26  ;;  %v2918_v14 = vpop.permute.xlu0 %2917 }
 0x358   : > { %3092 = vst [vmem:[%s5806_s9 + $0x20] sm:$0xff] %v3048_v15  ;;  %3093 = vst.msk [vmem:[%s5806_s9 + $0x28] sm:$0xff] %vm2162_vm1, %v3049_v42 }
 0x359   : > { %v3072_v59 = vmax.f32 %v3028_v36, 0.0  ;;  %v3073_v39 = vmax.f32 %v3029_v12, 0.0 }
 0x35a   : > { %v2715_v55 = vpop.permute.xlu1 %2714 }
 0x35b   : > { %3116 = vst [vmem:[%s5806_s9 + $0xe0] sm:$0xff] %v3072_v59  ;;  %3117 = vst.msk [vmem:[%s5806_s9 + $0xe8] sm:$0xff] %vm2162_vm1, %v3073_v39  ;;  %v2978_v20 = vpop.permute.xlu0 %2977  ;;  %v2810_v24 = vmul.f32 %v5361_v23, %v2715_v55  ;;  %v2811_v33 = vmul.f32 %v5367_v6, %v2715_v55 }
 0x35c   : > { %v3034_v22 = vadd.f32 %v2978_v20, %v2880_v46  ;;  %v3035_v45 = vadd.f32 %v2978_v20, %v2881_v52  ;;  %v2666_v46 = vld [vmem:[%s5783_s18 + $0x90] sm:$0xff]  ;;  %v2667_v52 = vld [vmem:[%s5783_s18 + $0x98] sm:$0xff] }
 0x35d   : > { %v2854_v6 = vadd.f32 %v2810_v24, %v2656_v25  ;;  %v2855_v53 = vadd.f32 %v2811_v33, %v2657_v48  ;;  %v2660_v33 = vld [vmem:[%s5783_s18 + $0x60] sm:$0xff] }
 0x35e   : > { %v3078_v9 = vmax.f32 %v3034_v22, 0.0  ;;  %v3079_v5 = vmax.f32 %v3035_v45, 0.0  ;;  %v2775_v62 = vpop.permute.xlu1 %2774  ;;  %v2662_v45 = vld [vmem:[%s5783_s18 + $0x70] sm:$0xff]  ;;  %v6002_v48 = vld [vmem:[#allocation5_spill] sm:$0xff] }
 0x35f   : > { %v2834_v60 = vmul.f32 %v5358_v54, %v2775_v62  ;;  %v2835_v21 = vmul.f32 %v5364_v40, %v2775_v62 }
 0x360   : > { %3122 = vst [vmem:[%s5806_s9 + $0x110] sm:$0xff] %v3078_v9  ;;  %3123 = vst.msk [vmem:[%s5806_s9 + $0x118] sm:$0xff] %vm2162_vm1, %v3079_v5  ;;  %v2663_v9 = vld [vmem:[%s5783_s18 + $0x78] sm:$0xff] }
 0x361   : > { %v2878_v13 = vadd.f32 %v2834_v60, %v2680_v38  ;;  %v2879_v43 = vadd.f32 %v2835_v21, %v2681_v56 }
 0x362   : > { %v2720_v19 = vpop.permute.xlu1 %2719 }
 0x363   : > { %v2812_v16 = vmul.f32 %v5375_v30, %v2720_v19  ;;  %v2813_v7 = vmul.f32 %v5385_v44, %v2720_v19  ;;  %v2790_v37 = vpop.permute.xlu0 %2789 }
 0x364   : > { %v2840_v35 = vmul.f32 %v5413_v10, %v2790_v37  ;;  %v2841_v51 = vmul.f32 %v5422_v49, %v2790_v37 }
 0x365   : > { %v2856_v23 = vadd.f32 %v2812_v16, %v2658_v28  ;;  %v2857_v58 = vadd.f32 %v2813_v7, %v2659_v32  ;;  %v2661_v28 = vld [vmem:[%s5783_s18 + $0x68] sm:$0xff] }
 0x366   : > { %v2913_v30 = vpop.permute.xlu1 %2912  ;;  %v2884_v63 = vadd.f32 %v2840_v35, %v2686_v57  ;;  %v2885_v26 = vadd.f32 %v2841_v51, %v2687_v2  ;;  %v6003_v7 = vld [vmem:[#allocation6_spill] sm:$0xff]  ;;  %v2671_v57 = vld [vmem:[%s5783_s18 + $0xb8] sm:$0xff]  ;;  %v6004_v2 = vld [vmem:[#allocation17_spill] sm:$0xff] }
 0x367   : > { %v3010_v4 = vadd.f32 %v2918_v14, %v2856_v23  ;;  %v3011_v44 = vadd.f32 %v2918_v14, %v2857_v58  ;;  %v3008_v54 = vadd.f32 %v2913_v30, %v2854_v6  ;;  %v3009_v18 = vadd.f32 %v2913_v30, %v2855_v53  ;;  %v5869_v40 = vpop.permute.xlu0 %2927  ;;  %v2684_v6 = vld [vmem:[%s5783_s18 + $0x120] sm:$0xff]  ;;  %v2685_v53 = vld [vmem:[%s5783_s18 + $0x128] sm:$0xff] }
 0x369   : > { %v3054_v0 = vmax.f32 %v3010_v4, 0.0  ;;  %v3055_v47 = vmax.f32 %v3011_v44, 0.0  ;;  %v3052_v10 = vmax.f32 %v3008_v54, 0.0  ;;  %v3053_v61 = vmax.f32 %v3009_v18, 0.0  ;;  %v2670_v18 = vld [vmem:[%s5783_s18 + $0xb0] sm:$0xff] }
 0x36a   : > { %v2973_v49 = vpop.permute.xlu1 %2972 }
 0x36b   : > { %3098 = vst [vmem:[%s5806_s9 + $0x50] sm:$0xff] %v3054_v0  ;;  %3099 = vst.msk [vmem:[%s5806_s9 + $0x58] sm:$0xff] %vm2162_vm1, %v3055_v47  ;;  %v3032_v50 = vadd.f32 %v2973_v49, %v2878_v13  ;;  %v3033_v17 = vadd.f32 %v2973_v49, %v2879_v43  ;;  %v2988_v15 = vpop.permute.xlu0 %2987  ;;  %v6005_v43 = vld [vmem:[#allocation18_spill] sm:$0xff] }
 0x36c   : > { %3096 = vst [vmem:[%s5806_s9 + $0x40] sm:$0xff] %v3052_v10  ;;  %3097 = vst.msk [vmem:[%s5806_s9 + $0x48] sm:$0xff] %vm2162_vm1, %v3053_v61  ;;  %v3038_v42 = vadd.f32 %v2988_v15, %v2884_v63  ;;  %v3039_v8 = vadd.f32 %v2988_v15, %v2885_v26  ;;  %v6006_v26 = vld [vmem:[#allocation13_spill] sm:$0xff] }
 0x36d   : > { %v3076_v34 = vmax.f32 %v3032_v50, 0.0  ;;  %v3077_v31 = vmax.f32 %v3033_v17, 0.0  ;;  %v6007_v17 = vld [vmem:[#allocation14_spill] sm:$0xff] }
 0x36e   : > { %v3082_v36 = vmax.f32 %v3038_v42, 0.0  ;;  %v3083_v12 = vmax.f32 %v3039_v8, 0.0  ;;  %v2725_v14 = vpop.permute.xlu1 %2724 }
 0x36f   : > { %3120 = vst [vmem:[%s5806_s9 + $0x100] sm:$0xff] %v3076_v34  ;;  %3121 = vst.msk [vmem:[%s5806_s9 + $0x108] sm:$0xff] %vm2162_vm1, %v3077_v31  ;;  %v2740_v29 = vpop.permute.xlu0 %2739  ;;  %v2814_v20 = vmul.f32 %v5401_v27, %v2725_v14  ;;  %v2815_v22 = vmul.f32 %v5410_v3, %v2725_v14  ;;  %v2690_v14 = vld [vmem:[%s5783_s18 + $0x150] sm:$0xff] }
 0x370   : > { %3126 = vst [vmem:[%s5806_s9 + $0x130] sm:$0xff] %v3082_v36  ;;  %3127 = vst.msk [vmem:[%s5806_s9 + $0x138] sm:$0xff] %vm2162_vm1, %v3083_v12  ;;  %v2820_v41 = vmul.f32 %v5456_v11, %v2740_v29  ;;  %v2821_v59 = vmul.f32 %v5464_v1, %v2740_v29  ;;  %v6000_v11 = vld [vmem:[#allocation7_spill] sm:$0xff]  ;;  %v6001_v1 = vld [vmem:[#allocation8_spill] sm:$0xff] }
 0x371   : > { %v2858_v23 = vadd.f32 %v2814_v20, %v2660_v33  ;;  %v2859_v58 = vadd.f32 %v2815_v22, %v2661_v28  ;;  %v2691_v29 = vld [vmem:[%s5783_s18 + $0x158] sm:$0xff] }
 0x372   : > { %v2785_v39 = vpop.permute.xlu1 %2784  ;;  %v2864_v62 = vadd.f32 %v2820_v41, %v2666_v46  ;;  %v2865_v24 = vadd.f32 %v2821_v59, %v2667_v52  ;;  %v6009_v28 = vld [vmem:[#allocation12_spill] sm:$0xff] }
 0x373   : > { %v2800_v55 = vpop.permute.xlu0 %2799  ;;  %v2838_v16 = vmul.f32 %v6002_v48, %v2785_v39  ;;  %v2839_v27 = vmul.f32 %v6003_v7, %v2785_v39  ;;  %v2665_v48 = vld [vmem:[%s5783_s18 + $0x88] sm:$0xff] }
 0x374   : > { %v2844_v50 = vmul.f32 %v6006_v26, %v2800_v55  ;;  %v2845_v15 = vmul.f32 %v6007_v17, %v2800_v55 }
 0x375   : > { %v2882_v47 = vadd.f32 %v2838_v16, %v2684_v6  ;;  %v2883_v10 = vadd.f32 %v2839_v27, %v2685_v53  ;;  %v2669_v6 = vld [vmem:[%s5783_s18 + $0xa8] sm:$0xff]  ;;  %v6010_v53 = vld [vmem:[#allocation15_spill] sm:$0xff] }
 0x376   : > { %v2730_v5 = vpop.permute.xlu1 %2729  ;;  %v2888_v22 = vadd.f32 %v2844_v50, %v2690_v14 }
 0x377   : > { %v2816_v32 = vmul.f32 %v6000_v11, %v2730_v5  ;;  %v2817_v19 = vmul.f32 %v6001_v1, %v2730_v5  ;;  %v2938_v25 = vpop.permute.xlu0 %2937 }
 0x378   : > { %v3018_v37 = vadd.f32 %v2938_v25, %v2864_v62  ;;  %v3019_v3 = vadd.f32 %v2938_v25, %v2865_v24  ;;  %v6008_v24 = vld [vmem:[#allocation10_spill] sm:$0xff]  ;;  %v2664_v25 = vld [vmem:[%s5783_s18 + $0x80] sm:$0xff] }
 0x379   : > { %v2860_v60 = vadd.f32 %v2816_v32, %v2662_v45  ;;  %v2861_v21 = vadd.f32 %v2817_v19, %v2663_v9  ;;  %v2889_v45 = vadd.f32 %v2845_v15, %v2691_v29 }
 0x37a   : > { %v3062_v38 = vmax.f32 %v3018_v37, 0.0  ;;  %v3063_v56 = vmax.f32 %v3019_v3, 0.0  ;;  %v2923_v35 = vpop.permute.xlu1 %2922 }
 0x37b   : > { %v3014_v51 = vadd.f32 %v5869_v40, %v2860_v60  ;;  %v3015_v30 = vadd.f32 %v5869_v40, %v2861_v21  ;;  %v3012_v4 = vadd.f32 %v2923_v35, %v2858_v23  ;;  %v3013_v44 = vadd.f32 %v2923_v35, %v2859_v58  ;;  %v2750_v54 = vpop.permute.xlu0 %2749  ;;  %v2668_v58 = vld [vmem:[%s5783_s18 + $0xa0] sm:$0xff] }
 0x37c   : > { %3106 = vst [vmem:[%s5806_s9 + $0x90] sm:$0xff] %v3062_v38  ;;  %3107 = vst.msk [vmem:[%s5806_s9 + $0x98] sm:$0xff] %vm2162_vm1, %v3063_v56  ;;  %v2824_v13 = vmul.f32 %v6004_v2, %v2750_v54  ;;  %v2825_v0 = vmul.f32 %v6005_v43, %v2750_v54  ;;  %v6011_v56 = vld [vmem:[#allocation16_spill] sm:$0xff]  ;;  %v2688_v2 = vld [vmem:[%s5783_s18 + $0x140] sm:$0xff] }
 0x37d   : > { %v3058_v61 = vmax.f32 %v3014_v51, 0.0  ;;  %v3059_v40 = vmax.f32 %v3015_v30, 0.0  ;;  %v3056_v49 = vmax.f32 %v3012_v4, 0.0  ;;  %v3057_v63 = vmax.f32 %v3013_v44, 0.0  ;;  %v6012_v51 = vld [vmem:[#allocation9_spill] sm:$0xff]  ;;  %v6013_v4 = vld [vmem:[#allocation11_spill] sm:$0xff] }
 0x37e   : > { %v2983_v42 = vpop.permute.xlu1 %2982  ;;  %v2868_v8 = vadd.f32 %v2824_v13, %v2670_v18  ;;  %v2869_v34 = vadd.f32 %v2825_v0, %v2671_v57  ;;  %v2689_v13 = vld [vmem:[%s5783_s18 + $0x148] sm:$0xff] }
 0x37f   : > { %3102 = vst [vmem:[%s5806_s9 + $0x70] sm:$0xff] %v3058_v61  ;;  %3103 = vst.msk [vmem:[%s5806_s9 + $0x78] sm:$0xff] %vm2162_vm1, %v3059_v40  ;;  %v3036_v31 = vadd.f32 %v2983_v42, %v2882_v47  ;;  %v3037_v36 = vadd.f32 %v2983_v42, %v2883_v10  ;;  %v2948_v12 = vpop.permute.xlu0 %2947 }
 0x380   : > { %3100 = vst [vmem:[%s5806_s9 + $0x60] sm:$0xff] %v3056_v49  ;;  %3101 = vst.msk [vmem:[%s5806_s9 + $0x68] sm:$0xff] %vm2162_vm1, %v3057_v63  ;;  %v3022_v41 = vadd.f32 %v2948_v12, %v2868_v8  ;;  %v3023_v59 = vadd.f32 %v2948_v12, %v2869_v34 }
 0x381   : > { %v3080_v39 = vmax.f32 %v3036_v31, 0.0  ;;  %v3081_v55 = vmax.f32 %v3037_v36, 0.0 }
 0x382   : > { %v3066_v46 = vmax.f32 %v3022_v41, 0.0  ;;  %v3067_v52 = vmax.f32 %v3023_v59, 0.0  ;;  %v2735_v20 = vpop.permute.xlu1 %2734 }
 0x383   : > { %3124 = vst [vmem:[%s5806_s9 + $0x120] sm:$0xff] %v3080_v39  ;;  %3125 = vst.msk [vmem:[%s5806_s9 + $0x128] sm:$0xff] %vm2162_vm1, %v3081_v55  ;;  %v2998_v9 = vpop.permute.xlu0 %2997  ;;  %v2818_v33 = vmul.f32 %v6008_v24, %v2735_v20  ;;  %v2819_v11 = vmul.f32 %v6009_v28, %v2735_v20 }
 0x384   : > { %3110 = vst [vmem:[%s5806_s9 + $0xb0] sm:$0xff] %v3066_v46  ;;  %3111 = vst.msk [vmem:[%s5806_s9 + $0xb8] sm:$0xff] %vm2162_vm1, %v3067_v52  ;;  %v3042_v5 = vadd.f32 %v2998_v9, %v2888_v22  ;;  %v3043_v62 = vadd.f32 %v2998_v9, %v2889_v45 }
 0x385   : > { %v2862_v16 = vadd.f32 %v2818_v33, %v2664_v25  ;;  %v2863_v7 = vadd.f32 %v2819_v11, %v2665_v48 }
 0x386   : > { %v3086_v32 = vmax.f32 %v3042_v5, 0.0  ;;  %v3087_v1 = vmax.f32 %v3043_v62, 0.0  ;;  %v2795_v19 = vpop.permute.xlu1 %2794 }
 0x387   : > { %v2842_v30 = vmul.f32 %v6012_v51, %v2795_v19  ;;  %v2843_v44 = vmul.f32 %v6013_v4, %v2795_v19 }
 0x388   : > { %3130 = vst [vmem:[%s5806_s9 + $0x150] sm:$0xff] %v3086_v32  ;;  %3131 = vst.msk [vmem:[%s5806_s9 + $0x158] sm:$0xff] %vm2162_vm1, %v3087_v1 }
 0x389   : > { %v2886_v61 = vadd.f32 %v2842_v30, %v2688_v2  ;;  %v2887_v40 = vadd.f32 %v2843_v44, %v2689_v13 }
 0x38a   : > { %v2933_v27 = vpop.permute.xlu1 %2932 }
 0x38b   : > { %v3016_v37 = vadd.f32 %v2933_v27, %v2862_v16  ;;  %v3017_v3 = vadd.f32 %v2933_v27, %v2863_v7 }
 0x38d   : > { %v3060_v60 = vmax.f32 %v3016_v37, 0.0  ;;  %v3061_v21 = vmax.f32 %v3017_v3, 0.0 }
 0x38e   : > { %v2745_v23 = vpop.permute.xlu1 %2744 }
 0x38f   : > { %3104 = vst [vmem:[%s5806_s9 + $0x80] sm:$0xff] %v3060_v60  ;;  %3105 = vst.msk [vmem:[%s5806_s9 + $0x88] sm:$0xff] %vm2162_vm1, %v3061_v21  ;;  %v2822_v38 = vmul.f32 %v6010_v53, %v2745_v23  ;;  %v2823_v35 = vmul.f32 %v6011_v56, %v2745_v23 }
 0x391   : > { %v2866_v54 = vadd.f32 %v2822_v38, %v2668_v58  ;;  %v2867_v18 = vadd.f32 %v2823_v35, %v2669_v6 }
 0x392   : > { %v2943_v57 = vpop.permute.xlu1 %2942 }
 0x393   : > { %v3020_v43 = vadd.f32 %v2943_v57, %v2866_v54  ;;  %v3021_v0 = vadd.f32 %v2943_v57, %v2867_v18 }
 0x395   : > { %v3064_v47 = vmax.f32 %v3020_v43, 0.0  ;;  %v3065_v10 = vmax.f32 %v3021_v0, 0.0 }
 0x396   : > { %v2993_v49 = vpop.permute.xlu1 %2992 }
 0x397   : > { %3108 = vst [vmem:[%s5806_s9 + $0xa0] sm:$0xff] %v3064_v47  ;;  %3109 = vst.msk [vmem:[%s5806_s9 + $0xa8] sm:$0xff] %vm2162_vm1, %v3065_v10  ;;  %v3040_v63 = vadd.f32 %v2993_v49, %v2886_v61  ;;  %v3041_v26 = vadd.f32 %v2993_v49, %v2887_v40 }
 0x399   : > { %v3084_v50 = vmax.f32 %v3040_v63, 0.0  ;;  %v3085_v17 = vmax.f32 %v3041_v26, 0.0 }
 0x39b   : > { %3128 = vst [vmem:[%s5806_s9 + $0x140] sm:$0xff] %v3084_v50  ;;  %3129 = vst.msk [vmem:[%s5806_s9 + $0x148] sm:$0xff] %vm2162_vm1, %v3085_v17 }
 0x39c PF: > { %p16_p8 = scmp.ge.s32.totalorder %s3683_s26, 9   ;;  %s6014_s21 = smov %s3614_s22 }
 0x39d   : > { %s6015_s22 = smov %s3618_s23  ;;  %s6016_s23 = smov %s3693_s29 }
 0x39e   : > { %s6017_s24 = smov %s3683_s26  ;;  %18 = sbr.rel (!%p16_p8) target bundleno = 3 (0x3), region = 93 }
 0x3a5   :  { %3156 = vsyncpa [#allocation3], 1 }
 0x3a6   :  { %3158 = vsyncpa [#allocation3 + $0x1], 1 }

</bundles_post_ra>
